<compile_context>
chip_gen: v7x
topology: tpu7x:2x2x1
jax: 0.10.0
libtpu: 0.0.40
codegen_flags: <defaults>
</compile_context>

<pallas_src>
import functools

import jax
import jax.numpy as jnp
from jax.experimental import pallas as pl
from jax.experimental.pallas import tpu as pltpu

_LANE = 128
_SUBLANE = 8
_ROW_PAD = 8  # slack rows appended to every flat activation buffer


def _round_up(x, m):
    return ((x + m - 1) // m) * m


# ----------------------------------------------------------------------------
# Kernel 1: fused stride-1 conv (KH*KW shifted GEMMs) + bias + ReLU
#   x_ref: (bt, L_in, Cin)  flat row-major (H,W) spatial, zero-padded tail
#   w_ref: (KH*KW, Cin, OC) per-tap weights
#   b_ref: (1, OC)          f32 bias
#   o_ref: (bt, L_out, OC)  rows [0, OH*Ws) are the conv output (junk in the
#                           right-edge columns only), tail rows zeroed
# ----------------------------------------------------------------------------
def _conv_relu_kernel(x_ref, w_ref, b_ref, o_ref, *, kh, kw, ws, oh, bt):
    m = oh * ws                       # output rows computed per image
    l_out = o_ref.shape[1]
    oc = o_ref.shape[2]
    for bi in range(bt):
        acc = jnp.zeros((m, oc), jnp.float32)
        for t in range(kh * kw):
            off = (t // kw) * ws + (t % kw)          # static flat offset
            win = x_ref[bi, pl.ds(off, m), :]         # contiguous (m, Cin)
            acc += jnp.dot(win, w_ref[t],
                           preferred_element_type=jnp.float32)
        y = jnp.maximum(acc + b_ref[...], 0.0)
        o_ref[bi, pl.ds(0, m), :] = y.astype(o_ref.dtype)
        if l_out > m:                                  # keep pad tail finite
            o_ref[bi, pl.ds(m, l_out - m), :] = jnp.zeros(
                (l_out - m, oc), o_ref.dtype)


def conv_relu_flat(x, w, b, *, kh, kw, ws, oh, l_out, batch_tile=8):
    """x: (B, L_in, Cin) bf16 flat spatial; returns (B, l_out, OC) bf16."""
    B, l_in, cin = x.shape
    taps, cin2, oc = w.shape
    assert taps == kh * kw and cin2 == cin
    bt = min(batch_tile, B)
    grid = (pl.cdiv(B, bt),)
    kern = functools.partial(_conv_relu_kernel,
                             kh=kh, kw=kw, ws=ws, oh=oh, bt=bt)
    return pl.pallas_call(
        kern,
        out_shape=jax.ShapeDtypeStruct((B, l_out, oc), jnp.bfloat16),
        grid=grid,
        in_specs=[
            pl.BlockSpec((bt, l_in, cin), lambda i: (i, 0, 0)),   # images
            pl.BlockSpec((taps, cin, oc), lambda i: (0, 0, 0)),   # weights
            pl.BlockSpec((1, oc), lambda i: (0, 0)),              # bias
        ],
        out_specs=pl.BlockSpec((bt, l_out, oc), lambda i: (i, 0, 0)),
        compiler_params=pltpu.CompilerParams(
            dimension_semantics=("parallel",)),
    )(x, w, b.reshape(1, oc))


# ----------------------------------------------------------------------------
# Kernel 2: fused GEMM + bias + ReLU (used for the Linear layer)
# ----------------------------------------------------------------------------
def _matmul_bias_relu_kernel(x_ref, w_ref, b_ref, o_ref):
    acc = jnp.dot(x_ref[...], w_ref[...], preferred_element_type=jnp.float32)
    o_ref[...] = jnp.maximum(acc + b_ref[...], 0.0).astype(o_ref.dtype)


def matmul_bias_relu(x, w, b, *, tm=512, out_dtype=jnp.float32):
    """ReLU(x @ w + b); w is (K, N) with N a multiple of 128 (lane dense)."""
    M, K = x.shape
    K2, N = w.shape
    assert K == K2 and N % _LANE == 0 and b.shape == (N,)

    tm_eff = M if M <= tm else tm
    tn_eff = 256 if N % 256 == 0 else 128            # 256 feeds v6e/v7x MXU width
    grid = (pl.cdiv(M, tm_eff), N // tn_eff)

    return pl.pallas_call(
        _matmul_bias_relu_kernel,
        out_shape=jax.ShapeDtypeStruct((M, N), out_dtype),
        grid=grid,
        in_specs=[
            pl.BlockSpec((tm_eff, K), lambda i, j: (i, 0)),
            pl.BlockSpec((K, tn_eff), lambda i, j: (0, j)),
            pl.BlockSpec((1, tn_eff), lambda i, j: (0, j)),
        ],
        out_specs=pl.BlockSpec((tm_eff, tn_eff), lambda i, j: (i, j)),
        compiler_params=pltpu.CompilerParams(
            dimension_semantics=("parallel", "parallel"),
            vmem_limit_bytes=32 * 1024 * 1024),      # v5e scoped default is 16 MiB
    )(x, w, b.reshape(1, N))


# ----------------------------------------------------------------------------
# Space-to-depth -> flat (B, L, s*s*C) with zero-padded tail rows (plain JAX)
# ----------------------------------------------------------------------------
def _space_to_depth_flat(x_nhwc, s, slack=_ROW_PAD):
    B, H, W, C = x_nhwc.shape
    hs, ws = H // s, W // s
    x = x_nhwc[:, :hs * s, :ws * s, :]
    if s > 1:
        x = x.reshape(B, hs, s, ws, s, C).transpose(0, 1, 3, 2, 4, 5)
        x = x.reshape(B, hs, ws, s * s * C)
    rows = hs * ws
    l_pad = _round_up(rows + slack, _SUBLANE)
    x = x.reshape(B, rows, s * s * C)
    return jnp.pad(x, ((0, 0), (0, l_pad - rows), (0, 0))), hs, ws


# ----------------------------------------------------------------------------
# One-off parameter preparation (outside the hot path)
# ----------------------------------------------------------------------------
def _prep_conv(w_oihw, b, s):
    oc, ic, kh, kw = w_oihw.shape
    khp, kwp = kh // s, kw // s
    # OIHW -> (KH, KW, IC, OC) -> (kh', ph, kw', pw, IC, OC) -> taps x (s*s*IC) x OC
    wt = jnp.transpose(w_oihw, (2, 3, 1, 0))
    wt = wt.reshape(khp, s, kwp, s, ic, oc).transpose(0, 2, 1, 3, 4, 5)
    wt = wt.reshape(khp * kwp, s * s * ic, oc).astype(jnp.bfloat16)
    return dict(w=wt, b=b.astype(jnp.float32), oc=oc, kh=khp, kw=kwp, s=s)


def prepare_params(params):
    prepped = {
        "conv1": _prep_conv(params["w1"], params["b1"], s=4),
        "conv2": _prep_conv(params["w2"], params["b2"], s=2),
        "conv3": _prep_conv(params["w3"], params["b3"], s=1),
    }
    # Linear: PyTorch flatten order is (C, H, W); our NHWC flatten is (H, W, C).
    wl, bl = params["wl"], params["bl"]
    feat, n_flatten = wl.shape
    oc3 = params["w3"].shape[0]
    hw = n_flatten // oc3
    wl_perm = wl.reshape(feat, oc3, hw).transpose(0, 2, 1).reshape(feat, n_flatten)
    n_pad = _round_up(feat, _LANE)
    w_mat = jnp.pad(wl_perm.T, ((0, 0), (0, n_pad - feat))).astype(jnp.bfloat16)
    b_pad = jnp.pad(bl, (0, n_pad - feat)).astype(jnp.float32)
    prepped["linear"] = dict(w=w_mat, b=b_pad, oc=feat)
    return prepped


# ----------------------------------------------------------------------------
# Forward pass (matches PyTorch NatureCNN semantics; input is NCHW)
# ----------------------------------------------------------------------------
def nature_cnn_forward(x_nchw, p):
    B = x_nchw.shape[0]
    h = jnp.transpose(x_nchw, (0, 2, 3, 1)).astype(jnp.bfloat16)      # NHWC bf16

    # conv1 (8x8 s4 -> 2x2 s1 after space-to-depth by 4)
    c1 = p["conv1"]
    xf, hs1, ws1 = _space_to_depth_flat(h, c1["s"])
    oh1, ow1 = hs1 - c1["kh"] + 1, ws1 - c1["kw"] + 1
    l1 = _round_up(oh1 * ws1 + _ROW_PAD, _SUBLANE)
    a1 = conv_relu_flat(xf, c1["w"], c1["b"], kh=c1["kh"], kw=c1["kw"],
                        ws=ws1, oh=oh1, l_out=l1)

    # conv2 (4x4 s2 -> 2x2 s1): unflatten a1, keep valid columns, s2d by 2
    # TODO(synk): fold this 1x-size repack into conv1's output write.
    c2 = p["conv2"]
    a1v = a1[:, :oh1 * ws1, :].reshape(B, oh1, ws1, c1["oc"])[:, :, :ow1, :]
    xf2, hs2, ws2 = _space_to_depth_flat(a1v, c2["s"])
    oh2, ow2 = hs2 - c2["kh"] + 1, ws2 - c2["kw"] + 1
    l2 = _round_up(oh2 * ws2 + _ROW_PAD, _SUBLANE)
    a2 = conv_relu_flat(xf2, c2["w"], c2["b"], kh=c2["kh"], kw=c2["kw"],
                        ws=ws2, oh=oh2, l_out=l2)

    # conv3 (3x3 s1): consumes conv2's flat output buffer directly; junk
    # columns/rows in a2 only ever feed conv3's own junk columns/rows.
    c3 = p["conv3"]
    oh3, ow3 = oh2 - c3["kh"] + 1, ow2 - c3["kw"] + 1
    l3 = _round_up(oh3 * ws2 + _ROW_PAD, _SUBLANE)
    a3 = conv_relu_flat(a2, c3["w"], c3["b"], kh=c3["kh"], kw=c3["kw"],
                        ws=ws2, oh=oh3, l_out=l3)

    # Flatten the valid (oh3, ow3, oc3) block in NHWC order, then Linear+ReLU.
    # TODO(synk): fold this small gather into the Linear kernel's index_map.
    flat = a3[:, :oh3 * ws2, :].reshape(B, oh3, ws2, c3["oc"])[:, :, :ow3, :]
    flat = flat.reshape(B, oh3 * ow3 * c3["oc"])
    lin = p["linear"]
    out = matmul_bias_relu(flat, lin["w"], lin["b"], out_dtype=jnp.float32)
    return out[:, :lin["oc"]]


# ----------------------------------------------------------------------------
# Params init + pure-JAX f32 reference (independent of the Pallas path)
# ----------------------------------------------------------------------------
def init_params(key, in_channels, n_flatten, features_dim):
    ks = jax.random.split(key, 8)
    s = 0.05
    return {
        "w1": s * jax.random.normal(ks[0], (32, in_channels, 8, 8), jnp.float32),
        "b1": s * jax.random.normal(ks[1], (32,), jnp.float32),
        "w2": s * jax.random.normal(ks[2], (64, 32, 4, 4), jnp.float32),
        "b2": s * jax.random.normal(ks[3], (64,), jnp.float32),
        "w3": s * jax.random.normal(ks[4], (64, 64, 3, 3), jnp.float32),
        "b3": s * jax.random.normal(ks[5], (64,), jnp.float32),
        "wl": s * jax.random.normal(ks[6], (features_dim, n_flatten), jnp.float32),
        "bl": s * jax.random.normal(ks[7], (features_dim,), jnp.float32),
    }


def reference_forward(x, params):
    def conv(h, w, b, stride):
        y = jax.lax.conv_general_dilated(
            h, w, window_strides=(stride, stride), padding="VALID",
            dimension_numbers=("NCHW", "OIHW", "NCHW"))
        return jax.nn.relu(y + b[None, :, None, None])
    h = conv(x, params["w1"], params["b1"], 4)
    h = conv(h, params["w2"], params["b2"], 2)
    h = conv(h, params["w3"], params["b3"], 1)
    flat = h.reshape(h.shape[0], -1)
    return jax.nn.relu(flat @ params["wl"].T + params["bl"])


if __name__ == "__main__":
    # Small but shape-consistent config: 36x36 input gives
    # conv1 -> 8x8, conv2 -> 3x3, conv3 -> 1x1, so n_flatten = 64.
    B, C, H, W = 2, 4, 36, 36
    features_dim = 128
    n_flatten = 64 * 1 * 1

    key = jax.random.PRNGKey(0)
    k_x, k_p = jax.random.split(key)
    x = jax.random.normal(k_x, (B, C, H, W), jnp.float32)
    params = init_params(k_p, C, n_flatten, features_dim)
    prepped = prepare_params(params)                 # one-off weight prep

    fwd = jax.jit(lambda obs: nature_cnn_forward(obs, prepped))
    out = jax.block_until_ready(fwd(x))
    ref = jax.block_until_ready(reference_forward(x, params))

    assert out.shape == (B, features_dim), out.shape
    # bf16 operands / activations with f32 accumulation -> loosened tolerance.
    assert jnp.allclose(out, ref, rtol=5e-2, atol=3e-2), "mismatch vs reference"
    print("KERNEL_OK")
</pallas_src>

<mosaic_0001>
module attributes {stable_mosaic.version = 11 : i64} {
  func.func @_conv_relu_kernel(%arg0: i32, %arg1: memref<2x96x64xbf16, #tpu.memory_space<vmem>>, %arg2: memref<4x64x32xbf16, #tpu.memory_space<vmem>>, %arg3: memref<1x32xf32, #tpu.memory_space<vmem>>, %arg4: memref<2x80x32xbf16, #tpu.memory_space<vmem>>) attributes {dimension_semantics = [#tpu.dimension_semantics<parallel>], iteration_bounds = array<i64: 1>, scalar_prefetch = 0 : i64, scratch_operands = 0 : i64, tpu.core_type = #tpu.core_type<tc>, window_params = [{transform_indices = @transform_0, window_bounds = array<i64: 2, 96, 64>}, {pipeline_mode = #tpu.pipeline_mode<synchronous>, transform_indices = @transform_1, window_bounds = array<i64: 4, 64, 32>}, {pipeline_mode = #tpu.pipeline_mode<synchronous>, transform_indices = @transform_2, window_bounds = array<i64: 1, 32>}, {transform_indices = @transform_3, window_bounds = array<i64: 2, 80, 32>}]} {
    %cst = arith.constant 0.000000e+00 : f32
    %0 = vector.broadcast %cst : f32 to vector<72x32xf32>
    %c0 = arith.constant 0 : index
    %c0_0 = arith.constant 0 : index
    %c0_1 = arith.constant 0 : index
    %1 = vector.load %arg1[%c0, %c0_0, %c0_1] : memref<2x96x64xbf16, #tpu.memory_space<vmem>>, vector<1x72x64xbf16>
    %2 = vector.shape_cast %1 : vector<1x72x64xbf16> to vector<72x64xbf16>
    %c0_2 = arith.constant 0 : index
    %c0_3 = arith.constant 0 : index
    %c0_4 = arith.constant 0 : index
    %3 = vector.load %arg2[%c0_2, %c0_3, %c0_4] : memref<4x64x32xbf16, #tpu.memory_space<vmem>>, vector<1x64x32xbf16>
    %4 = vector.shape_cast %3 : vector<1x64x32xbf16> to vector<64x32xbf16>
    %cst_5 = arith.constant dense<0.000000e+00> : vector<72x32xf32>
    %5 = tpu.matmul %2, %4, %cst_5 {dimension_numbers = #tpu.dot_dimension_numbers<[1], [0], [0], [1], [0, 0, 1, 1], [], []>} : vector<72x64xbf16>, vector<64x32xbf16>, vector<72x32xf32> -> vector<72x32xf32>
    %6 = arith.addf %0, %5 : vector<72x32xf32>
    %c0_6 = arith.constant 0 : index
    %c1 = arith.constant 1 : index
    %c0_7 = arith.constant 0 : index
    %7 = vector.load %arg1[%c0_6, %c1, %c0_7] : memref<2x96x64xbf16, #tpu.memory_space<vmem>>, vector<1x72x64xbf16>
    %8 = vector.shape_cast %7 : vector<1x72x64xbf16> to vector<72x64xbf16>
    %c1_8 = arith.constant 1 : index
    %c0_9 = arith.constant 0 : index
    %c0_10 = arith.constant 0 : index
    %9 = vector.load %arg2[%c1_8, %c0_9, %c0_10] : memref<4x64x32xbf16, #tpu.memory_space<vmem>>, vector<1x64x32xbf16>
    %10 = vector.shape_cast %9 : vector<1x64x32xbf16> to vector<64x32xbf16>
    %cst_11 = arith.constant dense<0.000000e+00> : vector<72x32xf32>
    %11 = tpu.matmul %8, %10, %cst_11 {dimension_numbers = #tpu.dot_dimension_numbers<[1], [0], [0], [1], [0, 0, 1, 1], [], []>} : vector<72x64xbf16>, vector<64x32xbf16>, vector<72x32xf32> -> vector<72x32xf32>
    %12 = arith.addf %6, %11 : vector<72x32xf32>
    %c0_12 = arith.constant 0 : index
    %c9 = arith.constant 9 : index
    %c0_13 = arith.constant 0 : index
    %13 = vector.load %arg1[%c0_12, %c9, %c0_13] : memref<2x96x64xbf16, #tpu.memory_space<vmem>>, vector<1x72x64xbf16>
    %14 = vector.shape_cast %13 : vector<1x72x64xbf16> to vector<72x64xbf16>
    %c2 = arith.constant 2 : index
    %c0_14 = arith.constant 0 : index
    %c0_15 = arith.constant 0 : index
    %15 = vector.load %arg2[%c2, %c0_14, %c0_15] : memref<4x64x32xbf16, #tpu.memory_space<vmem>>, vector<1x64x32xbf16>
    %16 = vector.shape_cast %15 : vector<1x64x32xbf16> to vector<64x32xbf16>
    %cst_16 = arith.constant dense<0.000000e+00> : vector<72x32xf32>
    %17 = tpu.matmul %14, %16, %cst_16 {dimension_numbers = #tpu.dot_dimension_numbers<[1], [0], [0], [1], [0, 0, 1, 1], [], []>} : vector<72x64xbf16>, vector<64x32xbf16>, vector<72x32xf32> -> vector<72x32xf32>
    %18 = arith.addf %12, %17 : vector<72x32xf32>
    %c0_17 = arith.constant 0 : index
    %c10 = arith.constant 10 : index
    %c0_18 = arith.constant 0 : index
    %19 = vector.load %arg1[%c0_17, %c10, %c0_18] : memref<2x96x64xbf16, #tpu.memory_space<vmem>>, vector<1x72x64xbf16>
    %20 = vector.shape_cast %19 : vector<1x72x64xbf16> to vector<72x64xbf16>
    %c3 = arith.constant 3 : index
    %c0_19 = arith.constant 0 : index
    %c0_20 = arith.constant 0 : index
    %21 = vector.load %arg2[%c3, %c0_19, %c0_20] : memref<4x64x32xbf16, #tpu.memory_space<vmem>>, vector<1x64x32xbf16>
    %22 = vector.shape_cast %21 : vector<1x64x32xbf16> to vector<64x32xbf16>
    %cst_21 = arith.constant dense<0.000000e+00> : vector<72x32xf32>
    %23 = tpu.matmul %20, %22, %cst_21 {dimension_numbers = #tpu.dot_dimension_numbers<[1], [0], [0], [1], [0, 0, 1, 1], [], []>} : vector<72x64xbf16>, vector<64x32xbf16>, vector<72x32xf32> -> vector<72x32xf32>
    %24 = arith.addf %18, %23 : vector<72x32xf32>
    %c0_22 = arith.constant 0 : index
    %c0_23 = arith.constant 0 : index
    %25 = vector.load %arg3[%c0_22, %c0_23] : memref<1x32xf32, #tpu.memory_space<vmem>>, vector<1x32xf32>
    %26 = vector.broadcast %25 : vector<1x32xf32> to vector<72x32xf32>
    %27 = arith.addf %24, %26 : vector<72x32xf32>
    %cst_24 = arith.constant 0.000000e+00 : f32
    %28 = vector.broadcast %cst_24 : f32 to vector<72x32xf32>
    %29 = arith.maximumf %27, %28 : vector<72x32xf32>
    %30 = arith.truncf %29 : vector<72x32xf32> to vector<72x32xbf16>
    %c0_25 = arith.constant 0 : index
    %c0_26 = arith.constant 0 : index
    %c0_27 = arith.constant 0 : index
    %31 = vector.load %arg4[%c0_25, %c0_26, %c0_27] : memref<2x80x32xbf16, #tpu.memory_space<vmem>>, vector<1x72x32xbf16>
    %32 = vector.shape_cast %31 : vector<1x72x32xbf16> to vector<72x32xbf16>
    %33 = vector.shape_cast %30 : vector<72x32xbf16> to vector<1x72x32xbf16>
    tpu.vector_store %arg4[%c0_25, %c0_26, %c0_27], %33 {strides = array<i32>} : memref<2x80x32xbf16, #tpu.memory_space<vmem>>, vector<1x72x32xbf16>,
    %cst_28 = arith.constant 0.000000e+00 : bf16
    %34 = vector.broadcast %cst_28 : bf16 to vector<8x32xbf16>
    %c0_29 = arith.constant 0 : index
    %c72 = arith.constant 72 : index
    %c0_30 = arith.constant 0 : index
    %35 = vector.load %arg4[%c0_29, %c72, %c0_30] : memref<2x80x32xbf16, #tpu.memory_space<vmem>>, vector<1x8x32xbf16>
    %36 = vector.shape_cast %35 : vector<1x8x32xbf16> to vector<8x32xbf16>
    %37 = vector.shape_cast %34 : vector<8x32xbf16> to vector<1x8x32xbf16>
    tpu.vector_store %arg4[%c0_29, %c72, %c0_30], %37 {strides = array<i32>} : memref<2x80x32xbf16, #tpu.memory_space<vmem>>, vector<1x8x32xbf16>,
    %cst_31 = arith.constant 0.000000e+00 : f32
    %38 = vector.broadcast %cst_31 : f32 to vector<72x32xf32>
    %c1_32 = arith.constant 1 : index
    %c0_33 = arith.constant 0 : index
    %c0_34 = arith.constant 0 : index
    %39 = vector.load %arg1[%c1_32, %c0_33, %c0_34] : memref<2x96x64xbf16, #tpu.memory_space<vmem>>, vector<1x72x64xbf16>
    %40 = vector.shape_cast %39 : vector<1x72x64xbf16> to vector<72x64xbf16>
    %c0_35 = arith.constant 0 : index
    %c0_36 = arith.constant 0 : index
    %c0_37 = arith.constant 0 : index
    %41 = vector.load %arg2[%c0_35, %c0_36, %c0_37] : memref<4x64x32xbf16, #tpu.memory_space<vmem>>, vector<1x64x32xbf16>
    %42 = vector.shape_cast %41 : vector<1x64x32xbf16> to vector<64x32xbf16>
    %cst_38 = arith.constant dense<0.000000e+00> : vector<72x32xf32>
    %43 = tpu.matmul %40, %42, %cst_38 {dimension_numbers = #tpu.dot_dimension_numbers<[1], [0], [0], [1], [0, 0, 1, 1], [], []>} : vector<72x64xbf16>, vector<64x32xbf16>, vector<72x32xf32> -> vector<72x32xf32>
    %44 = arith.addf %38, %43 : vector<72x32xf32>
    %c1_39 = arith.constant 1 : index
    %c1_40 = arith.constant 1 : index
    %c0_41 = arith.constant 0 : index
    %45 = vector.load %arg1[%c1_39, %c1_40, %c0_41] : memref<2x96x64xbf16, #tpu.memory_space<vmem>>, vector<1x72x64xbf16>
    %46 = vector.shape_cast %45 : vector<1x72x64xbf16> to vector<72x64xbf16>
    %c1_42 = arith.constant 1 : index
    %c0_43 = arith.constant 0 : index
    %c0_44 = arith.constant 0 : index
    %47 = vector.load %arg2[%c1_42, %c0_43, %c0_44] : memref<4x64x32xbf16, #tpu.memory_space<vmem>>, vector<1x64x32xbf16>
    %48 = vector.shape_cast %47 : vector<1x64x32xbf16> to vector<64x32xbf16>
    %cst_45 = arith.constant dense<0.000000e+00> : vector<72x32xf32>
    %49 = tpu.matmul %46, %48, %cst_45 {dimension_numbers = #tpu.dot_dimension_numbers<[1], [0], [0], [1], [0, 0, 1, 1], [], []>} : vector<72x64xbf16>, vector<64x32xbf16>, vector<72x32xf32> -> vector<72x32xf32>
    %50 = arith.addf %44, %49 : vector<72x32xf32>
    %c1_46 = arith.constant 1 : index
    %c9_47 = arith.constant 9 : index
    %c0_48 = arith.constant 0 : index
    %51 = vector.load %arg1[%c1_46, %c9_47, %c0_48] : memref<2x96x64xbf16, #tpu.memory_space<vmem>>, vector<1x72x64xbf16>
    %52 = vector.shape_cast %51 : vector<1x72x64xbf16> to vector<72x64xbf16>
    %c2_49 = arith.constant 2 : index
    %c0_50 = arith.constant 0 : index
    %c0_51 = arith.constant 0 : index
    %53 = vector.load %arg2[%c2_49, %c0_50, %c0_51] : memref<4x64x32xbf16, #tpu.memory_space<vmem>>, vector<1x64x32xbf16>
    %54 = vector.shape_cast %53 : vector<1x64x32xbf16> to vector<64x32xbf16>
    %cst_52 = arith.constant dense<0.000000e+00> : vector<72x32xf32>
    %55 = tpu.matmul %52, %54, %cst_52 {dimension_numbers = #tpu.dot_dimension_numbers<[1], [0], [0], [1], [0, 0, 1, 1], [], []>} : vector<72x64xbf16>, vector<64x32xbf16>, vector<72x32xf32> -> vector<72x32xf32>
    %56 = arith.addf %50, %55 : vector<72x32xf32>
    %c1_53 = arith.constant 1 : index
    %c10_54 = arith.constant 10 : index
    %c0_55 = arith.constant 0 : index
    %57 = vector.load %arg1[%c1_53, %c10_54, %c0_55] : memref<2x96x64xbf16, #tpu.memory_space<vmem>>, vector<1x72x64xbf16>
    %58 = vector.shape_cast %57 : vector<1x72x64xbf16> to vector<72x64xbf16>
    %c3_56 = arith.constant 3 : index
    %c0_57 = arith.constant 0 : index
    %c0_58 = arith.constant 0 : index
    %59 = vector.load %arg2[%c3_56, %c0_57, %c0_58] : memref<4x64x32xbf16, #tpu.memory_space<vmem>>, vector<1x64x32xbf16>
    %60 = vector.shape_cast %59 : vector<1x64x32xbf16> to vector<64x32xbf16>
    %cst_59 = arith.constant dense<0.000000e+00> : vector<72x32xf32>
    %61 = tpu.matmul %58, %60, %cst_59 {dimension_numbers = #tpu.dot_dimension_numbers<[1], [0], [0], [1], [0, 0, 1, 1], [], []>} : vector<72x64xbf16>, vector<64x32xbf16>, vector<72x32xf32> -> vector<72x32xf32>
    %62 = arith.addf %56, %61 : vector<72x32xf32>
    %c0_60 = arith.constant 0 : index
    %c0_61 = arith.constant 0 : index
    %63 = vector.load %arg3[%c0_60, %c0_61] : memref<1x32xf32, #tpu.memory_space<vmem>>, vector<1x32xf32>
    %64 = vector.broadcast %63 : vector<1x32xf32> to vector<72x32xf32>
    %65 = arith.addf %62, %64 : vector<72x32xf32>
    %cst_62 = arith.constant 0.000000e+00 : f32
    %66 = vector.broadcast %cst_62 : f32 to vector<72x32xf32>
    %67 = arith.maximumf %65, %66 : vector<72x32xf32>
    %68 = arith.truncf %67 : vector<72x32xf32> to vector<72x32xbf16>
    %c1_63 = arith.constant 1 : index
    %c0_64 = arith.constant 0 : index
    %c0_65 = arith.constant 0 : index
    %69 = vector.load %arg4[%c1_63, %c0_64, %c0_65] : memref<2x80x32xbf16, #tpu.memory_space<vmem>>, vector<1x72x32xbf16>
    %70 = vector.shape_cast %69 : vector<1x72x32xbf16> to vector<72x32xbf16>
    %71 = vector.shape_cast %68 : vector<72x32xbf16> to vector<1x72x32xbf16>
    tpu.vector_store %arg4[%c1_63, %c0_64, %c0_65], %71 {strides = array<i32>} : memref<2x80x32xbf16, #tpu.memory_space<vmem>>, vector<1x72x32xbf16>,
    %cst_66 = arith.constant 0.000000e+00 : bf16
    %72 = vector.broadcast %cst_66 : bf16 to vector<8x32xbf16>
    %c1_67 = arith.constant 1 : index
    %c72_68 = arith.constant 72 : index
    %c0_69 = arith.constant 0 : index
    %73 = vector.load %arg4[%c1_67, %c72_68, %c0_69] : memref<2x80x32xbf16, #tpu.memory_space<vmem>>, vector<1x8x32xbf16>
    %74 = vector.shape_cast %73 : vector<1x8x32xbf16> to vector<8x32xbf16>
    %75 = vector.shape_cast %72 : vector<8x32xbf16> to vector<1x8x32xbf16>
    tpu.vector_store %arg4[%c1_67, %c72_68, %c0_69], %75 {strides = array<i32>} : memref<2x80x32xbf16, #tpu.memory_space<vmem>>, vector<1x8x32xbf16>,
    return
  }
  func.func @transform_0(%arg0: i32) -> (i32, i32, i32) {
    %c0_i32 = arith.constant 0 : i32
    %c0_i32_0 = arith.constant 0 : i32
    %c0_i32_1 = arith.constant 0 : i32
    return %arg0, %c0_i32, %c0_i32_0 : i32, i32, i32
  }
  func.func @transform_1(%arg0: i32) -> (i32, i32, i32) {
    %c0_i32 = arith.constant 0 : i32
    %c0_i32_0 = arith.constant 0 : i32
    %c0_i32_1 = arith.constant 0 : i32
    %c0_i32_2 = arith.constant 0 : i32
    return %c0_i32, %c0_i32_0, %c0_i32_1 : i32, i32, i32
  }
  func.func @transform_2(%arg0: i32) -> (i32, i32) {
    %c0_i32 = arith.constant 0 : i32
    %c0_i32_0 = arith.constant 0 : i32
    %c0_i32_1 = arith.constant 0 : i32
    return %c0_i32, %c0_i32_0 : i32, i32
  }
  func.func @transform_3(%arg0: i32) -> (i32, i32, i32) {
    %c0_i32 = arith.constant 0 : i32
    %c0_i32_0 = arith.constant 0 : i32
    %c0_i32_1 = arith.constant 0 : i32
    return %arg0, %c0_i32, %c0_i32_0 : i32, i32, i32
  }
}

module attributes {stable_mosaic.version = 11 : i64} {
  func.func @_conv_relu_kernel(%arg0: i32, %arg1: memref<2x24x128xbf16, #tpu.memory_space<vmem>>, %arg2: memref<4x128x64xbf16, #tpu.memory_space<vmem>>, %arg3: memref<1x64xf32, #tpu.memory_space<vmem>>, %arg4: memref<2x24x64xbf16, #tpu.memory_space<vmem>>) attributes {dimension_semantics = [#tpu.dimension_semantics<parallel>], iteration_bounds = array<i64: 1>, scalar_prefetch = 0 : i64, scratch_operands = 0 : i64, tpu.core_type = #tpu.core_type<tc>, window_params = [{transform_indices = @transform_0, window_bounds = array<i64: 2, 24, 128>}, {pipeline_mode = #tpu.pipeline_mode<synchronous>, transform_indices = @transform_1, window_bounds = array<i64: 4, 128, 64>}, {pipeline_mode = #tpu.pipeline_mode<synchronous>, transform_indices = @transform_2, window_bounds = array<i64: 1, 64>}, {transform_indices = @transform_3, window_bounds = array<i64: 2, 24, 64>}]} {
    %cst = arith.constant 0.000000e+00 : f32
    %0 = vector.broadcast %cst : f32 to vector<12x64xf32>
    %c0 = arith.constant 0 : index
    %c0_0 = arith.constant 0 : index
    %c0_1 = arith.constant 0 : index
    %1 = vector.load %arg1[%c0, %c0_0, %c0_1] : memref<2x24x128xbf16, #tpu.memory_space<vmem>>, vector<1x12x128xbf16>
    %2 = vector.shape_cast %1 : vector<1x12x128xbf16> to vector<12x128xbf16>
    %c0_2 = arith.constant 0 : index
    %c0_3 = arith.constant 0 : index
    %c0_4 = arith.constant 0 : index
    %3 = vector.load %arg2[%c0_2, %c0_3, %c0_4] : memref<4x128x64xbf16, #tpu.memory_space<vmem>>, vector<1x128x64xbf16>
    %4 = vector.shape_cast %3 : vector<1x128x64xbf16> to vector<128x64xbf16>
    %cst_5 = arith.constant dense<0.000000e+00> : vector<12x64xf32>
    %5 = tpu.matmul %2, %4, %cst_5 {dimension_numbers = #tpu.dot_dimension_numbers<[1], [0], [0], [1], [0, 0, 1, 1], [], []>} : vector<12x128xbf16>, vector<128x64xbf16>, vector<12x64xf32> -> vector<12x64xf32>
    %6 = arith.addf %0, %5 : vector<12x64xf32>
    %c0_6 = arith.constant 0 : index
    %c1 = arith.constant 1 : index
    %c0_7 = arith.constant 0 : index
    %7 = vector.load %arg1[%c0_6, %c1, %c0_7] : memref<2x24x128xbf16, #tpu.memory_space<vmem>>, vector<1x12x128xbf16>
    %8 = vector.shape_cast %7 : vector<1x12x128xbf16> to vector<12x128xbf16>
    %c1_8 = arith.constant 1 : index
    %c0_9 = arith.constant 0 : index
    %c0_10 = arith.constant 0 : index
    %9 = vector.load %arg2[%c1_8, %c0_9, %c0_10] : memref<4x128x64xbf16, #tpu.memory_space<vmem>>, vector<1x128x64xbf16>
    %10 = vector.shape_cast %9 : vector<1x128x64xbf16> to vector<128x64xbf16>
    %cst_11 = arith.constant dense<0.000000e+00> : vector<12x64xf32>
    %11 = tpu.matmul %8, %10, %cst_11 {dimension_numbers = #tpu.dot_dimension_numbers<[1], [0], [0], [1], [0, 0, 1, 1], [], []>} : vector<12x128xbf16>, vector<128x64xbf16>, vector<12x64xf32> -> vector<12x64xf32>
    %12 = arith.addf %6, %11 : vector<12x64xf32>
    %c0_12 = arith.constant 0 : index
    %c4 = arith.constant 4 : index
    %c0_13 = arith.constant 0 : index
    %13 = vector.load %arg1[%c0_12, %c4, %c0_13] : memref<2x24x128xbf16, #tpu.memory_space<vmem>>, vector<1x12x128xbf16>
    %14 = vector.shape_cast %13 : vector<1x12x128xbf16> to vector<12x128xbf16>
    %c2 = arith.constant 2 : index
    %c0_14 = arith.constant 0 : index
    %c0_15 = arith.constant 0 : index
    %15 = vector.load %arg2[%c2, %c0_14, %c0_15] : memref<4x128x64xbf16, #tpu.memory_space<vmem>>, vector<1x128x64xbf16>
    %16 = vector.shape_cast %15 : vector<1x128x64xbf16> to vector<128x64xbf16>
    %cst_16 = arith.constant dense<0.000000e+00> : vector<12x64xf32>
    %17 = tpu.matmul %14, %16, %cst_16 {dimension_numbers = #tpu.dot_dimension_numbers<[1], [0], [0], [1], [0, 0, 1, 1], [], []>} : vector<12x128xbf16>, vector<128x64xbf16>, vector<12x64xf32> -> vector<12x64xf32>
    %18 = arith.addf %12, %17 : vector<12x64xf32>
    %c0_17 = arith.constant 0 : index
    %c5 = arith.constant 5 : index
    %c0_18 = arith.constant 0 : index
    %19 = vector.load %arg1[%c0_17, %c5, %c0_18] : memref<2x24x128xbf16, #tpu.memory_space<vmem>>, vector<1x12x128xbf16>
    %20 = vector.shape_cast %19 : vector<1x12x128xbf16> to vector<12x128xbf16>
    %c3 = arith.constant 3 : index
    %c0_19 = arith.constant 0 : index
    %c0_20 = arith.constant 0 : index
    %21 = vector.load %arg2[%c3, %c0_19, %c0_20] : memref<4x128x64xbf16, #tpu.memory_space<vmem>>, vector<1x128x64xbf16>
    %22 = vector.shape_cast %21 : vector<1x128x64xbf16> to vector<128x64xbf16>
    %cst_21 = arith.constant dense<0.000000e+00> : vector<12x64xf32>
    %23 = tpu.matmul %20, %22, %cst_21 {dimension_numbers = #tpu.dot_dimension_numbers<[1], [0], [0], [1], [0, 0, 1, 1], [], []>} : vector<12x128xbf16>, vector<128x64xbf16>, vector<12x64xf32> -> vector<12x64xf32>
    %24 = arith.addf %18, %23 : vector<12x64xf32>
    %c0_22 = arith.constant 0 : index
    %c0_23 = arith.constant 0 : index
    %25 = vector.load %arg3[%c0_22, %c0_23] : memref<1x64xf32, #tpu.memory_space<vmem>>, vector<1x64xf32>
    %26 = vector.broadcast %25 : vector<1x64xf32> to vector<12x64xf32>
    %27 = arith.addf %24, %26 : vector<12x64xf32>
    %cst_24 = arith.constant 0.000000e+00 : f32
    %28 = vector.broadcast %cst_24 : f32 to vector<12x64xf32>
    %29 = arith.maximumf %27, %28 : vector<12x64xf32>
    %30 = arith.truncf %29 : vector<12x64xf32> to vector<12x64xbf16>
    %c0_25 = arith.constant 0 : index
    %c0_26 = arith.constant 0 : index
    %c0_27 = arith.constant 0 : index
    %31 = vector.load %arg4[%c0_25, %c0_26, %c0_27] : memref<2x24x64xbf16, #tpu.memory_space<vmem>>, vector<1x12x64xbf16>
    %32 = vector.shape_cast %31 : vector<1x12x64xbf16> to vector<12x64xbf16>
    %33 = vector.shape_cast %30 : vector<12x64xbf16> to vector<1x12x64xbf16>
    tpu.vector_store %arg4[%c0_25, %c0_26, %c0_27], %33 {strides = array<i32>} : memref<2x24x64xbf16, #tpu.memory_space<vmem>>, vector<1x12x64xbf16>,
    %cst_28 = arith.constant 0.000000e+00 : bf16
    %34 = vector.broadcast %cst_28 : bf16 to vector<12x64xbf16>
    %c0_29 = arith.constant 0 : index
    %c12 = arith.constant 12 : index
    %c0_30 = arith.constant 0 : index
    %35 = vector.load %arg4[%c0_29, %c12, %c0_30] : memref<2x24x64xbf16, #tpu.memory_space<vmem>>, vector<1x12x64xbf16>
    %36 = vector.shape_cast %35 : vector<1x12x64xbf16> to vector<12x64xbf16>
    %37 = vector.shape_cast %34 : vector<12x64xbf16> to vector<1x12x64xbf16>
    tpu.vector_store %arg4[%c0_29, %c12, %c0_30], %37 {strides = array<i32>} : memref<2x24x64xbf16, #tpu.memory_space<vmem>>, vector<1x12x64xbf16>,
    %cst_31 = arith.constant 0.000000e+00 : f32
    %38 = vector.broadcast %cst_31 : f32 to vector<12x64xf32>
    %c1_32 = arith.constant 1 : index
    %c0_33 = arith.constant 0 : index
    %c0_34 = arith.constant 0 : index
    %39 = vector.load %arg1[%c1_32, %c0_33, %c0_34] : memref<2x24x128xbf16, #tpu.memory_space<vmem>>, vector<1x12x128xbf16>
    %40 = vector.shape_cast %39 : vector<1x12x128xbf16> to vector<12x128xbf16>
    %c0_35 = arith.constant 0 : index
    %c0_36 = arith.constant 0 : index
    %c0_37 = arith.constant 0 : index
    %41 = vector.load %arg2[%c0_35, %c0_36, %c0_37] : memref<4x128x64xbf16, #tpu.memory_space<vmem>>, vector<1x128x64xbf16>
    %42 = vector.shape_cast %41 : vector<1x128x64xbf16> to vector<128x64xbf16>
    %cst_38 = arith.constant dense<0.000000e+00> : vector<12x64xf32>
    %43 = tpu.matmul %40, %42, %cst_38 {dimension_numbers = #tpu.dot_dimension_numbers<[1], [0], [0], [1], [0, 0, 1, 1], [], []>} : vector<12x128xbf16>, vector<128x64xbf16>, vector<12x64xf32> -> vector<12x64xf32>
    %44 = arith.addf %38, %43 : vector<12x64xf32>
    %c1_39 = arith.constant 1 : index
    %c1_40 = arith.constant 1 : index
    %c0_41 = arith.constant 0 : index
    %45 = vector.load %arg1[%c1_39, %c1_40, %c0_41] : memref<2x24x128xbf16, #tpu.memory_space<vmem>>, vector<1x12x128xbf16>
    %46 = vector.shape_cast %45 : vector<1x12x128xbf16> to vector<12x128xbf16>
    %c1_42 = arith.constant 1 : index
    %c0_43 = arith.constant 0 : index
    %c0_44 = arith.constant 0 : index
    %47 = vector.load %arg2[%c1_42, %c0_43, %c0_44] : memref<4x128x64xbf16, #tpu.memory_space<vmem>>, vector<1x128x64xbf16>
    %48 = vector.shape_cast %47 : vector<1x128x64xbf16> to vector<128x64xbf16>
    %cst_45 = arith.constant dense<0.000000e+00> : vector<12x64xf32>
    %49 = tpu.matmul %46, %48, %cst_45 {dimension_numbers = #tpu.dot_dimension_numbers<[1], [0], [0], [1], [0, 0, 1, 1], [], []>} : vector<12x128xbf16>, vector<128x64xbf16>, vector<12x64xf32> -> vector<12x64xf32>
    %50 = arith.addf %44, %49 : vector<12x64xf32>
    %c1_46 = arith.constant 1 : index
    %c4_47 = arith.constant 4 : index
    %c0_48 = arith.constant 0 : index
    %51 = vector.load %arg1[%c1_46, %c4_47, %c0_48] : memref<2x24x128xbf16, #tpu.memory_space<vmem>>, vector<1x12x128xbf16>
    %52 = vector.shape_cast %51 : vector<1x12x128xbf16> to vector<12x128xbf16>
    %c2_49 = arith.constant 2 : index
    %c0_50 = arith.constant 0 : index
    %c0_51 = arith.constant 0 : index
    %53 = vector.load %arg2[%c2_49, %c0_50, %c0_51] : memref<4x128x64xbf16, #tpu.memory_space<vmem>>, vector<1x128x64xbf16>
    %54 = vector.shape_cast %53 : vector<1x128x64xbf16> to vector<128x64xbf16>
    %cst_52 = arith.constant dense<0.000000e+00> : vector<12x64xf32>
    %55 = tpu.matmul %52, %54, %cst_52 {dimension_numbers = #tpu.dot_dimension_numbers<[1], [0], [0], [1], [0, 0, 1, 1], [], []>} : vector<12x128xbf16>, vector<128x64xbf16>, vector<12x64xf32> -> vector<12x64xf32>
    %56 = arith.addf %50, %55 : vector<12x64xf32>
    %c1_53 = arith.constant 1 : index
    %c5_54 = arith.constant 5 : index
    %c0_55 = arith.constant 0 : index
    %57 = vector.load %arg1[%c1_53, %c5_54, %c0_55] : memref<2x24x128xbf16, #tpu.memory_space<vmem>>, vector<1x12x128xbf16>
    %58 = vector.shape_cast %57 : vector<1x12x128xbf16> to vector<12x128xbf16>
    %c3_56 = arith.constant 3 : index
    %c0_57 = arith.constant 0 : index
    %c0_58 = arith.constant 0 : index
    %59 = vector.load %arg2[%c3_56, %c0_57, %c0_58] : memref<4x128x64xbf16, #tpu.memory_space<vmem>>, vector<1x128x64xbf16>
    %60 = vector.shape_cast %59 : vector<1x128x64xbf16> to vector<128x64xbf16>
    %cst_59 = arith.constant dense<0.000000e+00> : vector<12x64xf32>
    %61 = tpu.matmul %58, %60, %cst_59 {dimension_numbers = #tpu.dot_dimension_numbers<[1], [0], [0], [1], [0, 0, 1, 1], [], []>} : vector<12x128xbf16>, vector<128x64xbf16>, vector<12x64xf32> -> vector<12x64xf32>
    %62 = arith.addf %56, %61 : vector<12x64xf32>
    %c0_60 = arith.constant 0 : index
    %c0_61 = arith.constant 0 : index
    %63 = vector.load %arg3[%c0_60, %c0_61] : memref<1x64xf32, #tpu.memory_space<vmem>>, vector<1x64xf32>
    %64 = vector.broadcast %63 : vector<1x64xf32> to vector<12x64xf32>
    %65 = arith.addf %62, %64 : vector<12x64xf32>
    %cst_62 = arith.constant 0.000000e+00 : f32
    %66 = vector.broadcast %cst_62 : f32 to vector<12x64xf32>
    %67 = arith.maximumf %65, %66 : vector<12x64xf32>
    %68 = arith.truncf %67 : vector<12x64xf32> to vector<12x64xbf16>
    %c1_63 = arith.constant 1 : index
    %c0_64 = arith.constant 0 : index
    %c0_65 = arith.constant 0 : index
    %69 = vector.load %arg4[%c1_63, %c0_64, %c0_65] : memref<2x24x64xbf16, #tpu.memory_space<vmem>>, vector<1x12x64xbf16>
    %70 = vector.shape_cast %69 : vector<1x12x64xbf16> to vector<12x64xbf16>
    %71 = vector.shape_cast %68 : vector<12x64xbf16> to vector<1x12x64xbf16>
    tpu.vector_store %arg4[%c1_63, %c0_64, %c0_65], %71 {strides = array<i32>} : memref<2x24x64xbf16, #tpu.memory_space<vmem>>, vector<1x12x64xbf16>,
    %cst_66 = arith.constant 0.000000e+00 : bf16
    %72 = vector.broadcast %cst_66 : bf16 to vector<12x64xbf16>
    %c1_67 = arith.constant 1 : index
    %c12_68 = arith.constant 12 : index
    %c0_69 = arith.constant 0 : index
    %73 = vector.load %arg4[%c1_67, %c12_68, %c0_69] : memref<2x24x64xbf16, #tpu.memory_space<vmem>>, vector<1x12x64xbf16>
    %74 = vector.shape_cast %73 : vector<1x12x64xbf16> to vector<12x64xbf16>
    %75 = vector.shape_cast %72 : vector<12x64xbf16> to vector<1x12x64xbf16>
    tpu.vector_store %arg4[%c1_67, %c12_68, %c0_69], %75 {strides = array<i32>} : memref<2x24x64xbf16, #tpu.memory_space<vmem>>, vector<1x12x64xbf16>,
    return
  }
  func.func @transform_0(%arg0: i32) -> (i32, i32, i32) {
    %c0_i32 = arith.constant 0 : i32
    %c0_i32_0 = arith.constant 0 : i32
    %c0_i32_1 = arith.constant 0 : i32
    return %arg0, %c0_i32, %c0_i32_0 : i32, i32, i32
  }
  func.func @transform_1(%arg0: i32) -> (i32, i32, i32) {
    %c0_i32 = arith.constant 0 : i32
    %c0_i32_0 = arith.constant 0 : i32
    %c0_i32_1 = arith.constant 0 : i32
    %c0_i32_2 = arith.constant 0 : i32
    return %c0_i32, %c0_i32_0, %c0_i32_1 : i32, i32, i32
  }
  func.func @transform_2(%arg0: i32) -> (i32, i32) {
    %c0_i32 = arith.constant 0 : i32
    %c0_i32_0 = arith.constant 0 : i32
    %c0_i32_1 = arith.constant 0 : i32
    return %c0_i32, %c0_i32_0 : i32, i32
  }
  func.func @transform_3(%arg0: i32) -> (i32, i32, i32) {
    %c0_i32 = arith.constant 0 : i32
    %c0_i32_0 = arith.constant 0 : i32
    %c0_i32_1 = arith.constant 0 : i32
    return %arg0, %c0_i32, %c0_i32_0 : i32, i32, i32
  }
}

module attributes {stable_mosaic.version = 11 : i64} {
  func.func @_conv_relu_kernel(%arg0: i32, %arg1: memref<2x24x64xbf16, #tpu.memory_space<vmem>>, %arg2: memref<9x64x64xbf16, #tpu.memory_space<vmem>>, %arg3: memref<1x64xf32, #tpu.memory_space<vmem>>, %arg4: memref<2x16x64xbf16, #tpu.memory_space<vmem>>) attributes {dimension_semantics = [#tpu.dimension_semantics<parallel>], iteration_bounds = array<i64: 1>, scalar_prefetch = 0 : i64, scratch_operands = 0 : i64, tpu.core_type = #tpu.core_type<tc>, window_params = [{transform_indices = @transform_0, window_bounds = array<i64: 2, 24, 64>}, {pipeline_mode = #tpu.pipeline_mode<synchronous>, transform_indices = @transform_1, window_bounds = array<i64: 9, 64, 64>}, {pipeline_mode = #tpu.pipeline_mode<synchronous>, transform_indices = @transform_2, window_bounds = array<i64: 1, 64>}, {transform_indices = @transform_3, window_bounds = array<i64: 2, 16, 64>}]} {
    %cst = arith.constant 0.000000e+00 : f32
    %0 = vector.broadcast %cst : f32 to vector<4x64xf32>
    %c0 = arith.constant 0 : index
    %c0_0 = arith.constant 0 : index
    %c0_1 = arith.constant 0 : index
    %1 = vector.load %arg1[%c0, %c0_0, %c0_1] : memref<2x24x64xbf16, #tpu.memory_space<vmem>>, vector<1x4x64xbf16>
    %2 = vector.shape_cast %1 : vector<1x4x64xbf16> to vector<4x64xbf16>
    %c0_2 = arith.constant 0 : index
    %c0_3 = arith.constant 0 : index
    %c0_4 = arith.constant 0 : index
    %3 = vector.load %arg2[%c0_2, %c0_3, %c0_4] : memref<9x64x64xbf16, #tpu.memory_space<vmem>>, vector<1x64x64xbf16>
    %4 = vector.shape_cast %3 : vector<1x64x64xbf16> to vector<64x64xbf16>
    %cst_5 = arith.constant dense<0.000000e+00> : vector<4x64xf32>
    %5 = tpu.matmul %2, %4, %cst_5 {dimension_numbers = #tpu.dot_dimension_numbers<[1], [0], [0], [1], [0, 0, 1, 1], [], []>} : vector<4x64xbf16>, vector<64x64xbf16>, vector<4x64xf32> -> vector<4x64xf32>
    %6 = arith.addf %0, %5 : vector<4x64xf32>
    %c0_6 = arith.constant 0 : index
    %c1 = arith.constant 1 : index
    %c0_7 = arith.constant 0 : index
    %7 = vector.load %arg1[%c0_6, %c1, %c0_7] : memref<2x24x64xbf16, #tpu.memory_space<vmem>>, vector<1x4x64xbf16>
    %8 = vector.shape_cast %7 : vector<1x4x64xbf16> to vector<4x64xbf16>
    %c1_8 = arith.constant 1 : index
    %c0_9 = arith.constant 0 : index
    %c0_10 = arith.constant 0 : index
    %9 = vector.load %arg2[%c1_8, %c0_9, %c0_10] : memref<9x64x64xbf16, #tpu.memory_space<vmem>>, vector<1x64x64xbf16>
    %10 = vector.shape_cast %9 : vector<1x64x64xbf16> to vector<64x64xbf16>
    %cst_11 = arith.constant dense<0.000000e+00> : vector<4x64xf32>
    %11 = tpu.matmul %8, %10, %cst_11 {dimension_numbers = #tpu.dot_dimension_numbers<[1], [0], [0], [1], [0, 0, 1, 1], [], []>} : vector<4x64xbf16>, vector<64x64xbf16>, vector<4x64xf32> -> vector<4x64xf32>
    %12 = arith.addf %6, %11 : vector<4x64xf32>
    %c0_12 = arith.constant 0 : index
    %c2 = arith.constant 2 : index
    %c0_13 = arith.constant 0 : index
    %13 = vector.load %arg1[%c0_12, %c2, %c0_13] : memref<2x24x64xbf16, #tpu.memory_space<vmem>>, vector<1x4x64xbf16>
    %14 = vector.shape_cast %13 : vector<1x4x64xbf16> to vector<4x64xbf16>
    %c2_14 = arith.constant 2 : index
    %c0_15 = arith.constant 0 : index
    %c0_16 = arith.constant 0 : index
    %15 = vector.load %arg2[%c2_14, %c0_15, %c0_16] : memref<9x64x64xbf16, #tpu.memory_space<vmem>>, vector<1x64x64xbf16>
    %16 = vector.shape_cast %15 : vector<1x64x64xbf16> to vector<64x64xbf16>
    %cst_17 = arith.constant dense<0.000000e+00> : vector<4x64xf32>
    %17 = tpu.matmul %14, %16, %cst_17 {dimension_numbers = #tpu.dot_dimension_numbers<[1], [0], [0], [1], [0, 0, 1, 1], [], []>} : vector<4x64xbf16>, vector<64x64xbf16>, vector<4x64xf32> -> vector<4x64xf32>
    %18 = arith.addf %12, %17 : vector<4x64xf32>
    %c0_18 = arith.constant 0 : index
    %c4 = arith.constant 4 : index
    %c0_19 = arith.constant 0 : index
    %19 = vector.load %arg1[%c0_18, %c4, %c0_19] : memref<2x24x64xbf16, #tpu.memory_space<vmem>>, vector<1x4x64xbf16>
    %20 = vector.shape_cast %19 : vector<1x4x64xbf16> to vector<4x64xbf16>
    %c3 = arith.constant 3 : index
    %c0_20 = arith.constant 0 : index
    %c0_21 = arith.constant 0 : index
    %21 = vector.load %arg2[%c3, %c0_20, %c0_21] : memref<9x64x64xbf16, #tpu.memory_space<vmem>>, vector<1x64x64xbf16>
    %22 = vector.shape_cast %21 : vector<1x64x64xbf16> to vector<64x64xbf16>
    %cst_22 = arith.constant dense<0.000000e+00> : vector<4x64xf32>
    %23 = tpu.matmul %20, %22, %cst_22 {dimension_numbers = #tpu.dot_dimension_numbers<[1], [0], [0], [1], [0, 0, 1, 1], [], []>} : vector<4x64xbf16>, vector<64x64xbf16>, vector<4x64xf32> -> vector<4x64xf32>
    %24 = arith.addf %18, %23 : vector<4x64xf32>
    %c0_23 = arith.constant 0 : index
    %c5 = arith.constant 5 : index
    %c0_24 = arith.constant 0 : index
    %25 = vector.load %arg1[%c0_23, %c5, %c0_24] : memref<2x24x64xbf16, #tpu.memory_space<vmem>>, vector<1x4x64xbf16>
    %26 = vector.shape_cast %25 : vector<1x4x64xbf16> to vector<4x64xbf16>
    %c4_25 = arith.constant 4 : index
    %c0_26 = arith.constant 0 : index
    %c0_27 = arith.constant 0 : index
    %27 = vector.load %arg2[%c4_25, %c0_26, %c0_27] : memref<9x64x64xbf16, #tpu.memory_space<vmem>>, vector<1x64x64xbf16>
    %28 = vector.shape_cast %27 : vector<1x64x64xbf16> to vector<64x64xbf16>
    %cst_28 = arith.constant dense<0.000000e+00> : vector<4x64xf32>
    %29 = tpu.matmul %26, %28, %cst_28 {dimension_numbers = #tpu.dot_dimension_numbers<[1], [0], [0], [1], [0, 0, 1, 1], [], []>} : vector<4x64xbf16>, vector<64x64xbf16>, vector<4x64xf32> -> vector<4x64xf32>
    %30 = arith.addf %24, %29 : vector<4x64xf32>
    %c0_29 = arith.constant 0 : index
    %c6 = arith.constant 6 : index
    %c0_30 = arith.constant 0 : index
    %31 = vector.load %arg1[%c0_29, %c6, %c0_30] : memref<2x24x64xbf16, #tpu.memory_space<vmem>>, vector<1x4x64xbf16>
    %32 = vector.shape_cast %31 : vector<1x4x64xbf16> to vector<4x64xbf16>
    %c5_31 = arith.constant 5 : index
    %c0_32 = arith.constant 0 : index
    %c0_33 = arith.constant 0 : index
    %33 = vector.load %arg2[%c5_31, %c0_32, %c0_33] : memref<9x64x64xbf16, #tpu.memory_space<vmem>>, vector<1x64x64xbf16>
    %34 = vector.shape_cast %33 : vector<1x64x64xbf16> to vector<64x64xbf16>
    %cst_34 = arith.constant dense<0.000000e+00> : vector<4x64xf32>
    %35 = tpu.matmul %32, %34, %cst_34 {dimension_numbers = #tpu.dot_dimension_numbers<[1], [0], [0], [1], [0, 0, 1, 1], [], []>} : vector<4x64xbf16>, vector<64x64xbf16>, vector<4x64xf32> -> vector<4x64xf32>
    %36 = arith.addf %30, %35 : vector<4x64xf32>
    %c0_35 = arith.constant 0 : index
    %c8 = arith.constant 8 : index
    %c0_36 = arith.constant 0 : index
    %37 = vector.load %arg1[%c0_35, %c8, %c0_36] : memref<2x24x64xbf16, #tpu.memory_space<vmem>>, vector<1x4x64xbf16>
    %38 = vector.shape_cast %37 : vector<1x4x64xbf16> to vector<4x64xbf16>
    %c6_37 = arith.constant 6 : index
    %c0_38 = arith.constant 0 : index
    %c0_39 = arith.constant 0 : index
    %39 = vector.load %arg2[%c6_37, %c0_38, %c0_39] : memref<9x64x64xbf16, #tpu.memory_space<vmem>>, vector<1x64x64xbf16>
    %40 = vector.shape_cast %39 : vector<1x64x64xbf16> to vector<64x64xbf16>
    %cst_40 = arith.constant dense<0.000000e+00> : vector<4x64xf32>
    %41 = tpu.matmul %38, %40, %cst_40 {dimension_numbers = #tpu.dot_dimension_numbers<[1], [0], [0], [1], [0, 0, 1, 1], [], []>} : vector<4x64xbf16>, vector<64x64xbf16>, vector<4x64xf32> -> vector<4x64xf32>
    %42 = arith.addf %36, %41 : vector<4x64xf32>
    %c0_41 = arith.constant 0 : index
    %c9 = arith.constant 9 : index
    %c0_42 = arith.constant 0 : index
    %43 = vector.load %arg1[%c0_41, %c9, %c0_42] : memref<2x24x64xbf16, #tpu.memory_space<vmem>>, vector<1x4x64xbf16>
    %44 = vector.shape_cast %43 : vector<1x4x64xbf16> to vector<4x64xbf16>
    %c7 = arith.constant 7 : index
    %c0_43 = arith.constant 0 : index
    %c0_44 = arith.constant 0 : index
    %45 = vector.load %arg2[%c7, %c0_43, %c0_44] : memref<9x64x64xbf16, #tpu.memory_space<vmem>>, vector<1x64x64xbf16>
    %46 = vector.shape_cast %45 : vector<1x64x64xbf16> to vector<64x64xbf16>
    %cst_45 = arith.constant dense<0.000000e+00> : vector<4x64xf32>
    %47 = tpu.matmul %44, %46, %cst_45 {dimension_numbers = #tpu.dot_dimension_numbers<[1], [0], [0], [1], [0, 0, 1, 1], [], []>} : vector<4x64xbf16>, vector<64x64xbf16>, vector<4x64xf32> -> vector<4x64xf32>
    %48 = arith.addf %42, %47 : vector<4x64xf32>
    %c0_46 = arith.constant 0 : index
    %c10 = arith.constant 10 : index
    %c0_47 = arith.constant 0 : index
    %49 = vector.load %arg1[%c0_46, %c10, %c0_47] : memref<2x24x64xbf16, #tpu.memory_space<vmem>>, vector<1x4x64xbf16>
    %50 = vector.shape_cast %49 : vector<1x4x64xbf16> to vector<4x64xbf16>
    %c8_48 = arith.constant 8 : index
    %c0_49 = arith.constant 0 : index
    %c0_50 = arith.constant 0 : index
    %51 = vector.load %arg2[%c8_48, %c0_49, %c0_50] : memref<9x64x64xbf16, #tpu.memory_space<vmem>>, vector<1x64x64xbf16>
    %52 = vector.shape_cast %51 : vector<1x64x64xbf16> to vector<64x64xbf16>
    %cst_51 = arith.constant dense<0.000000e+00> : vector<4x64xf32>
    %53 = tpu.matmul %50, %52, %cst_51 {dimension_numbers = #tpu.dot_dimension_numbers<[1], [0], [0], [1], [0, 0, 1, 1], [], []>} : vector<4x64xbf16>, vector<64x64xbf16>, vector<4x64xf32> -> vector<4x64xf32>
    %54 = arith.addf %48, %53 : vector<4x64xf32>
    %c0_52 = arith.constant 0 : index
    %c0_53 = arith.constant 0 : index
    %55 = vector.load %arg3[%c0_52, %c0_53] : memref<1x64xf32, #tpu.memory_space<vmem>>, vector<1x64xf32>
    %56 = vector.broadcast %55 : vector<1x64xf32> to vector<4x64xf32>
    %57 = arith.addf %54, %56 : vector<4x64xf32>
    %cst_54 = arith.constant 0.000000e+00 : f32
    %58 = vector.broadcast %cst_54 : f32 to vector<4x64xf32>
    %59 = arith.maximumf %57, %58 : vector<4x64xf32>
    %60 = arith.truncf %59 : vector<4x64xf32> to vector<4x64xbf16>
    %c0_55 = arith.constant 0 : index
    %c0_56 = arith.constant 0 : index
    %c0_57 = arith.constant 0 : index
    %61 = vector.load %arg4[%c0_55, %c0_56, %c0_57] : memref<2x16x64xbf16, #tpu.memory_space<vmem>>, vector<1x4x64xbf16>
    %62 = vector.shape_cast %61 : vector<1x4x64xbf16> to vector<4x64xbf16>
    %63 = vector.shape_cast %60 : vector<4x64xbf16> to vector<1x4x64xbf16>
    tpu.vector_store %arg4[%c0_55, %c0_56, %c0_57], %63 {strides = array<i32>} : memref<2x16x64xbf16, #tpu.memory_space<vmem>>, vector<1x4x64xbf16>,
    %cst_58 = arith.constant 0.000000e+00 : bf16
    %64 = vector.broadcast %cst_58 : bf16 to vector<12x64xbf16>
    %c0_59 = arith.constant 0 : index
    %c4_60 = arith.constant 4 : index
    %c0_61 = arith.constant 0 : index
    %65 = vector.load %arg4[%c0_59, %c4_60, %c0_61] : memref<2x16x64xbf16, #tpu.memory_space<vmem>>, vector<1x12x64xbf16>
    %66 = vector.shape_cast %65 : vector<1x12x64xbf16> to vector<12x64xbf16>
    %67 = vector.shape_cast %64 : vector<12x64xbf16> to vector<1x12x64xbf16>
    tpu.vector_store %arg4[%c0_59, %c4_60, %c0_61], %67 {strides = array<i32>} : memref<2x16x64xbf16, #tpu.memory_space<vmem>>, vector<1x12x64xbf16>,
    %cst_62 = arith.constant 0.000000e+00 : f32
    %68 = vector.broadcast %cst_62 : f32 to vector<4x64xf32>
    %c1_63 = arith.constant 1 : index
    %c0_64 = arith.constant 0 : index
    %c0_65 = arith.constant 0 : index
    %69 = vector.load %arg1[%c1_63, %c0_64, %c0_65] : memref<2x24x64xbf16, #tpu.memory_space<vmem>>, vector<1x4x64xbf16>
    %70 = vector.shape_cast %69 : vector<1x4x64xbf16> to vector<4x64xbf16>
    %c0_66 = arith.constant 0 : index
    %c0_67 = arith.constant 0 : index
    %c0_68 = arith.constant 0 : index
    %71 = vector.load %arg2[%c0_66, %c0_67, %c0_68] : memref<9x64x64xbf16, #tpu.memory_space<vmem>>, vector<1x64x64xbf16>
    %72 = vector.shape_cast %71 : vector<1x64x64xbf16> to vector<64x64xbf16>
    %cst_69 = arith.constant dense<0.000000e+00> : vector<4x64xf32>
    %73 = tpu.matmul %70, %72, %cst_69 {dimension_numbers = #tpu.dot_dimension_numbers<[1], [0], [0], [1], [0, 0, 1, 1], [], []>} : vector<4x64xbf16>, vector<64x64xbf16>, vector<4x64xf32> -> vector<4x64xf32>
    %74 = arith.addf %68, %73 : vector<4x64xf32>
    %c1_70 = arith.constant 1 : index
    %c1_71 = arith.constant 1 : index
    %c0_72 = arith.constant 0 : index
    %75 = vector.load %arg1[%c1_70, %c1_71, %c0_72] : memref<2x24x64xbf16, #tpu.memory_space<vmem>>, vector<1x4x64xbf16>
    %76 = vector.shape_cast %75 : vector<1x4x64xbf16> to vector<4x64xbf16>
    %c1_73 = arith.constant 1 : index
    %c0_74 = arith.constant 0 : index
    %c0_75 = arith.constant 0 : index
    %77 = vector.load %arg2[%c1_73, %c0_74, %c0_75] : memref<9x64x64xbf16, #tpu.memory_space<vmem>>, vector<1x64x64xbf16>
    %78 = vector.shape_cast %77 : vector<1x64x64xbf16> to vector<64x64xbf16>
    %cst_76 = arith.constant dense<0.000000e+00> : vector<4x64xf32>
    %79 = tpu.matmul %76, %78, %cst_76 {dimension_numbers = #tpu.dot_dimension_numbers<[1], [0], [0], [1], [0, 0, 1, 1], [], []>} : vector<4x64xbf16>, vector<64x64xbf16>, vector<4x64xf32> -> vector<4x64xf32>
    %80 = arith.addf %74, %79 : vector<4x64xf32>
    %c1_77 = arith.constant 1 : index
    %c2_78 = arith.constant 2 : index
    %c0_79 = arith.constant 0 : index
    %81 = vector.load %arg1[%c1_77, %c2_78, %c0_79] : memref<2x24x64xbf16, #tpu.memory_space<vmem>>, vector<1x4x64xbf16>
    %82 = vector.shape_cast %81 : vector<1x4x64xbf16> to vector<4x64xbf16>
    %c2_80 = arith.constant 2 : index
    %c0_81 = arith.constant 0 : index
    %c0_82 = arith.constant 0 : index
    %83 = vector.load %arg2[%c2_80, %c0_81, %c0_82] : memref<9x64x64xbf16, #tpu.memory_space<vmem>>, vector<1x64x64xbf16>
    %84 = vector.shape_cast %83 : vector<1x64x64xbf16> to vector<64x64xbf16>
    %cst_83 = arith.constant dense<0.000000e+00> : vector<4x64xf32>
    %85 = tpu.matmul %82, %84, %cst_83 {dimension_numbers = #tpu.dot_dimension_numbers<[1], [0], [0], [1], [0, 0, 1, 1], [], []>} : vector<4x64xbf16>, vector<64x64xbf16>, vector<4x64xf32> -> vector<4x64xf32>
    %86 = arith.addf %80, %85 : vector<4x64xf32>
    %c1_84 = arith.constant 1 : index
    %c4_85 = arith.constant 4 : index
    %c0_86 = arith.constant 0 : index
    %87 = vector.load %arg1[%c1_84, %c4_85, %c0_86] : memref<2x24x64xbf16, #tpu.memory_space<vmem>>, vector<1x4x64xbf16>
    %88 = vector.shape_cast %87 : vector<1x4x64xbf16> to vector<4x64xbf16>
    %c3_87 = arith.constant 3 : index
    %c0_88 = arith.constant 0 : index
    %c0_89 = arith.constant 0 : index
    %89 = vector.load %arg2[%c3_87, %c0_88, %c0_89] : memref<9x64x64xbf16, #tpu.memory_space<vmem>>, vector<1x64x64xbf16>
    %90 = vector.shape_cast %89 : vector<1x64x64xbf16> to vector<64x64xbf16>
    %cst_90 = arith.constant dense<0.000000e+00> : vector<4x64xf32>
    %91 = tpu.matmul %88, %90, %cst_90 {dimension_numbers = #tpu.dot_dimension_numbers<[1], [0], [0], [1], [0, 0, 1, 1], [], []>} : vector<4x64xbf16>, vector<64x64xbf16>, vector<4x64xf32> -> vector<4x64xf32>
    %92 = arith.addf %86, %91 : vector<4x64xf32>
    %c1_91 = arith.constant 1 : index
    %c5_92 = arith.constant 5 : index
    %c0_93 = arith.constant 0 : index
    %93 = vector.load %arg1[%c1_91, %c5_92, %c0_93] : memref<2x24x64xbf16, #tpu.memory_space<vmem>>, vector<1x4x64xbf16>
    %94 = vector.shape_cast %93 : vector<1x4x64xbf16> to vector<4x64xbf16>
    %c4_94 = arith.constant 4 : index
    %c0_95 = arith.constant 0 : index
    %c0_96 = arith.constant 0 : index
    %95 = vector.load %arg2[%c4_94, %c0_95, %c0_96] : memref<9x64x64xbf16, #tpu.memory_space<vmem>>, vector<1x64x64xbf16>
    %96 = vector.shape_cast %95 : vector<1x64x64xbf16> to vector<64x64xbf16>
    %cst_97 = arith.constant dense<0.000000e+00> : vector<4x64xf32>
    %97 = tpu.matmul %94, %96, %cst_97 {dimension_numbers = #tpu.dot_dimension_numbers<[1], [0], [0], [1], [0, 0, 1, 1], [], []>} : vector<4x64xbf16>, vector<64x64xbf16>, vector<4x64xf32> -> vector<4x64xf32>
    %98 = arith.addf %92, %97 : vector<4x64xf32>
    %c1_98 = arith.constant 1 : index
    %c6_99 = arith.constant 6 : index
    %c0_100 = arith.constant 0 : index
    %99 = vector.load %arg1[%c1_98, %c6_99, %c0_100] : memref<2x24x64xbf16, #tpu.memory_space<vmem>>, vector<1x4x64xbf16>
    %100 = vector.shape_cast %99 : vector<1x4x64xbf16> to vector<4x64xbf16>
    %c5_101 = arith.constant 5 : index
    %c0_102 = arith.constant 0 : index
    %c0_103 = arith.constant 0 : index
    %101 = vector.load %arg2[%c5_101, %c0_102, %c0_103] : memref<9x64x64xbf16, #tpu.memory_space<vmem>>, vector<1x64x64xbf16>
    %102 = vector.shape_cast %101 : vector<1x64x64xbf16> to vector<64x64xbf16>
    %cst_104 = arith.constant dense<0.000000e+00> : vector<4x64xf32>
    %103 = tpu.matmul %100, %102, %cst_104 {dimension_numbers = #tpu.dot_dimension_numbers<[1], [0], [0], [1], [0, 0, 1, 1], [], []>} : vector<4x64xbf16>, vector<64x64xbf16>, vector<4x64xf32> -> vector<4x64xf32>
    %104 = arith.addf %98, %103 : vector<4x64xf32>
    %c1_105 = arith.constant 1 : index
    %c8_106 = arith.constant 8 : index
    %c0_107 = arith.constant 0 : index
    %105 = vector.load %arg1[%c1_105, %c8_106, %c0_107] : memref<2x24x64xbf16, #tpu.memory_space<vmem>>, vector<1x4x64xbf16>
    %106 = vector.shape_cast %105 : vector<1x4x64xbf16> to vector<4x64xbf16>
    %c6_108 = arith.constant 6 : index
    %c0_109 = arith.constant 0 : index
    %c0_110 = arith.constant 0 : index
    %107 = vector.load %arg2[%c6_108, %c0_109, %c0_110] : memref<9x64x64xbf16, #tpu.memory_space<vmem>>, vector<1x64x64xbf16>
    %108 = vector.shape_cast %107 : vector<1x64x64xbf16> to vector<64x64xbf16>
    %cst_111 = arith.constant dense<0.000000e+00> : vector<4x64xf32>
    %109 = tpu.matmul %106, %108, %cst_111 {dimension_numbers = #tpu.dot_dimension_numbers<[1], [0], [0], [1], [0, 0, 1, 1], [], []>} : vector<4x64xbf16>, vector<64x64xbf16>, vector<4x64xf32> -> vector<4x64xf32>
    %110 = arith.addf %104, %109 : vector<4x64xf32>
    %c1_112 = arith.constant 1 : index
    %c9_113 = arith.constant 9 : index
    %c0_114 = arith.constant 0 : index
    %111 = vector.load %arg1[%c1_112, %c9_113, %c0_114] : memref<2x24x64xbf16, #tpu.memory_space<vmem>>, vector<1x4x64xbf16>
    %112 = vector.shape_cast %111 : vector<1x4x64xbf16> to vector<4x64xbf16>
    %c7_115 = arith.constant 7 : index
    %c0_116 = arith.constant 0 : index
    %c0_117 = arith.constant 0 : index
    %113 = vector.load %arg2[%c7_115, %c0_116, %c0_117] : memref<9x64x64xbf16, #tpu.memory_space<vmem>>, vector<1x64x64xbf16>
    %114 = vector.shape_cast %113 : vector<1x64x64xbf16> to vector<64x64xbf16>
    %cst_118 = arith.constant dense<0.000000e+00> : vector<4x64xf32>
    %115 = tpu.matmul %112, %114, %cst_118 {dimension_numbers = #tpu.dot_dimension_numbers<[1], [0], [0], [1], [0, 0, 1, 1], [], []>} : vector<4x64xbf16>, vector<64x64xbf16>, vector<4x64xf32> -> vector<4x64xf32>
    %116 = arith.addf %110, %115 : vector<4x64xf32>
    %c1_119 = arith.constant 1 : index
    %c10_120 = arith.constant 10 : index
    %c0_121 = arith.constant 0 : index
    %117 = vector.load %arg1[%c1_119, %c10_120, %c0_121] : memref<2x24x64xbf16, #tpu.memory_space<vmem>>, vector<1x4x64xbf16>
    %118 = vector.shape_cast %117 : vector<1x4x64xbf16> to vector<4x64xbf16>
    %c8_122 = arith.constant 8 : index
    %c0_123 = arith.constant 0 : index
    %c0_124 = arith.constant 0 : index
    %119 = vector.load %arg2[%c8_122, %c0_123, %c0_124] : memref<9x64x64xbf16, #tpu.memory_space<vmem>>, vector<1x64x64xbf16>
    %120 = vector.shape_cast %119 : vector<1x64x64xbf16> to vector<64x64xbf16>
    %cst_125 = arith.constant dense<0.000000e+00> : vector<4x64xf32>
    %121 = tpu.matmul %118, %120, %cst_125 {dimension_numbers = #tpu.dot_dimension_numbers<[1], [0], [0], [1], [0, 0, 1, 1], [], []>} : vector<4x64xbf16>, vector<64x64xbf16>, vector<4x64xf32> -> vector<4x64xf32>
    %122 = arith.addf %116, %121 : vector<4x64xf32>
    %c0_126 = arith.constant 0 : index
    %c0_127 = arith.constant 0 : index
    %123 = vector.load %arg3[%c0_126, %c0_127] : memref<1x64xf32, #tpu.memory_space<vmem>>, vector<1x64xf32>
    %124 = vector.broadcast %123 : vector<1x64xf32> to vector<4x64xf32>
    %125 = arith.addf %122, %124 : vector<4x64xf32>
    %cst_128 = arith.constant 0.000000e+00 : f32
    %126 = vector.broadcast %cst_128 : f32 to vector<4x64xf32>
    %127 = arith.maximumf %125, %126 : vector<4x64xf32>
    %128 = arith.truncf %127 : vector<4x64xf32> to vector<4x64xbf16>
    %c1_129 = arith.constant 1 : index
    %c0_130 = arith.constant 0 : index
    %c0_131 = arith.constant 0 : index
    %129 = vector.load %arg4[%c1_129, %c0_130, %c0_131] : memref<2x16x64xbf16, #tpu.memory_space<vmem>>, vector<1x4x64xbf16>
    %130 = vector.shape_cast %129 : vector<1x4x64xbf16> to vector<4x64xbf16>
    %131 = vector.shape_cast %128 : vector<4x64xbf16> to vector<1x4x64xbf16>
    tpu.vector_store %arg4[%c1_129, %c0_130, %c0_131], %131 {strides = array<i32>} : memref<2x16x64xbf16, #tpu.memory_space<vmem>>, vector<1x4x64xbf16>,
    %cst_132 = arith.constant 0.000000e+00 : bf16
    %132 = vector.broadcast %cst_132 : bf16 to vector<12x64xbf16>
    %c1_133 = arith.constant 1 : index
    %c4_134 = arith.constant 4 : index
    %c0_135 = arith.constant 0 : index
    %133 = vector.load %arg4[%c1_133, %c4_134, %c0_135] : memref<2x16x64xbf16, #tpu.memory_space<vmem>>, vector<1x12x64xbf16>
    %134 = vector.shape_cast %133 : vector<1x12x64xbf16> to vector<12x64xbf16>
    %135 = vector.shape_cast %132 : vector<12x64xbf16> to vector<1x12x64xbf16>
    tpu.vector_store %arg4[%c1_133, %c4_134, %c0_135], %135 {strides = array<i32>} : memref<2x16x64xbf16, #tpu.memory_space<vmem>>, vector<1x12x64xbf16>,
    return
  }
  func.func @transform_0(%arg0: i32) -> (i32, i32, i32) {
    %c0_i32 = arith.constant 0 : i32
    %c0_i32_0 = arith.constant 0 : i32
    %c0_i32_1 = arith.constant 0 : i32
    return %arg0, %c0_i32, %c0_i32_0 : i32, i32, i32
  }
  func.func @transform_1(%arg0: i32) -> (i32, i32, i32) {
    %c0_i32 = arith.constant 0 : i32
    %c0_i32_0 = arith.constant 0 : i32
    %c0_i32_1 = arith.constant 0 : i32
    %c0_i32_2 = arith.constant 0 : i32
    return %c0_i32, %c0_i32_0, %c0_i32_1 : i32, i32, i32
  }
  func.func @transform_2(%arg0: i32) -> (i32, i32) {
    %c0_i32 = arith.constant 0 : i32
    %c0_i32_0 = arith.constant 0 : i32
    %c0_i32_1 = arith.constant 0 : i32
    return %c0_i32, %c0_i32_0 : i32, i32
  }
  func.func @transform_3(%arg0: i32) -> (i32, i32, i32) {
    %c0_i32 = arith.constant 0 : i32
    %c0_i32_0 = arith.constant 0 : i32
    %c0_i32_1 = arith.constant 0 : i32
    return %arg0, %c0_i32, %c0_i32_0 : i32, i32, i32
  }
}

module attributes {stable_mosaic.version = 11 : i64} {
  func.func @_matmul_bias_relu_kernel(%arg0: i32, %arg1: i32, %arg2: memref<2x64xbf16, #tpu.memory_space<vmem>>, %arg3: memref<64x128xbf16, #tpu.memory_space<vmem>>, %arg4: memref<1x128xf32, #tpu.memory_space<vmem>>, %arg5: memref<2x128xf32, #tpu.memory_space<vmem>>) attributes {dimension_semantics = [#tpu.dimension_semantics<parallel>, #tpu.dimension_semantics<parallel>], iteration_bounds = array<i64: 1, 1>, scalar_prefetch = 0 : i64, scratch_operands = 0 : i64, tpu.core_type = #tpu.core_type<tc>, window_params = [{transform_indices = @transform_0, window_bounds = array<i64: 2, 64>}, {transform_indices = @transform_1, window_bounds = array<i64: 64, 128>}, {transform_indices = @transform_2, window_bounds = array<i64: 1, 128>}, {transform_indices = @transform_3, window_bounds = array<i64: 2, 128>}]} {
    %c0 = arith.constant 0 : index
    %c0_0 = arith.constant 0 : index
    %0 = vector.load %arg2[%c0, %c0_0] : memref<2x64xbf16, #tpu.memory_space<vmem>>, vector<2x64xbf16>
    %c0_1 = arith.constant 0 : index
    %c0_2 = arith.constant 0 : index
    %1 = vector.load %arg3[%c0_1, %c0_2] : memref<64x128xbf16, #tpu.memory_space<vmem>>, vector<64x128xbf16>
    %cst = arith.constant dense<0.000000e+00> : vector<2x128xf32>
    %2 = tpu.matmul %0, %1, %cst {dimension_numbers = #tpu.dot_dimension_numbers<[1], [0], [0], [1], [0, 0, 1, 1], [], []>} : vector<2x64xbf16>, vector<64x128xbf16>, vector<2x128xf32> -> vector<2x128xf32>
    %c0_3 = arith.constant 0 : index
    %c0_4 = arith.constant 0 : index
    %3 = vector.load %arg4[%c0_3, %c0_4] : memref<1x128xf32, #tpu.memory_space<vmem>>, vector<1x128xf32>
    %4 = vector.broadcast %3 : vector<1x128xf32> to vector<2x128xf32>
    %5 = arith.addf %2, %4 : vector<2x128xf32>
    %cst_5 = arith.constant 0.000000e+00 : f32
    %6 = vector.broadcast %cst_5 : f32 to vector<2x128xf32>
    %7 = arith.maximumf %5, %6 : vector<2x128xf32>
    %c0_6 = arith.constant 0 : index
    %c0_7 = arith.constant 0 : index
    %8 = vector.load %arg5[%c0_6, %c0_7] : memref<2x128xf32, #tpu.memory_space<vmem>>, vector<2x128xf32>
    tpu.vector_store %arg5[%c0_6, %c0_7], %7 {strides = array<i32>} : memref<2x128xf32, #tpu.memory_space<vmem>>, vector<2x128xf32>,
    return
  }
  func.func @transform_0(%arg0: i32, %arg1: i32) -> (i32, i32) {
    %c0_i32 = arith.constant 0 : i32
    %c0_i32_0 = arith.constant 0 : i32
    return %arg0, %c0_i32 : i32, i32
  }
  func.func @transform_1(%arg0: i32, %arg1: i32) -> (i32, i32) {
    %c0_i32 = arith.constant 0 : i32
    %c0_i32_0 = arith.constant 0 : i32
    return %c0_i32, %arg1 : i32, i32
  }
  func.func @transform_2(%arg0: i32, %arg1: i32) -> (i32, i32) {
    %c0_i32 = arith.constant 0 : i32
    %c0_i32_0 = arith.constant 0 : i32
    return %c0_i32, %arg1 : i32, i32
  }
  func.func @transform_3(%arg0: i32, %arg1: i32) -> (i32, i32) {
    %c0_i32 = arith.constant 0 : i32
    return %arg0, %arg1 : i32, i32
  }
}

</mosaic_0001>

<bundles_post_ra>
// kernel: _lambda_.4
= control target key start
LH: loop header
LB: loop body
LE: loop exit
PB: predicated region body
PF: predicated region fallthrough
CT: control target
= control target key end

     0   :  { %v2044_v0 = vmov 0.0   ;;  %vm2045_vm0 = vmmov 0   ;;  %vm67_vm1 = vsmask.f32 7424  ;;  %vm131_vm2 = vcmask 523264   ;;  %s2689_s1 = inlined_call_operand.vmem [shape: bf16[4,64,32], index: 1, kind: input, shape index: {}]   ;;  %s2690_s0 = inlined_call_operand.vmem [shape: bf16[2,96,64], index: 0, kind: input, shape index: {}]   ;;  %s2691_s3 = inlined_call_operand.vmem [shape: bf16[2,80,32], index: 3, kind: output, shape index: {}]   ;;  %s2692_s2 = inlined_call_operand.vmem [shape: f32[1,32], index: 2, kind: input, shape index: {}]  }
   0x1   :  { %1761 = vmatprep.subr.bf16.mxu0 %v2044_v0  ;;  %1789 = vmatprep.subr.bf16.mxu1 %v2044_v0  ;;  %v1988_v1 = vld [vmem:[%s2689_s1 + $0x20] sm:$0xff]   ;;  %v1990_v3 = vld [vmem:[%s2689_s1 + $0x28] sm:$0xff]   ;;  %v1992_v5 = vld [vmem:[%s2689_s1 + $0x30] sm:$0xff]   ;;  %vm543_vm3 = vcmask 1046528   ;;  %vm735_vm4 = vcmask 257024  }
   0x2   :  { %v1989_v2 = vld [vmem:[%s2689_s1] sm:$0xff]   ;;  %1769 = vmatprep.mubr.msk.bf16.mxu0 %vm2045_vm0, %v2044_v0  ;;  %1797 = vmatprep.mubr.msk.bf16.mxu1 %vm2045_vm0, %v2044_v0  ;;  %v1991_v4 = vld [vmem:[%s2689_s1 + $0x8] sm:$0xff]   ;;  %v1993_v6 = vld [vmem:[%s2689_s1 + $0x10] sm:$0xff]  }
   0x3   :  { %1762 = vmatpush3.bf16.msra.mxu0 %v1988_v1  ;;  %1790 = vmatpush3.bf16.msra.mxu1 %v1989_v2  ;;  %v1996_v7 = vld [vmem:[%s2690_s0] sm:$0xff]   ;;  %v1997_v8 = vld [vmem:[%s2690_s0 + $0x8] sm:$0xff]   ;;  %v1994_v9 = vld [vmem:[%s2689_s1 + $0x38] sm:$0xff]  }
   0x4   :  { %1763 = vmatprep.subr.bf16.mxu0 %v2044_v0  ;;  %1791 = vmatprep.subr.bf16.mxu1 %v2044_v0  ;;  %v1995_v10 = vld [vmem:[%s2689_s1 + $0x18] sm:$0xff]   ;;  %v69_v11 = vshrl.u32 %v1996_v7, 16  ;;  %v71_v12 = vshll.u32 %v1996_v7, 16  ;;  %v76_v13 = vshll.u32 %v1997_v8, 16  ;;  %v1998_v16 = vld [vmem:[%s2689_s1 + $0x40] sm:$0xff]   ;;  %v2000_v17 = vld [vmem:[%s2690_s0 + $0x10] sm:$0xff]  }
   0x5   :  { %v1999_v18 = vld [vmem:[%s2689_s1 + $0x60] sm:$0xff]   ;;  %v80_v20 = vshrl.u32 %v1997_v8, 16  ;;  %v84_v21 = vshll.u32 %v2000_v17, 16  ;;  %v2001_v23 = vld [vmem:[%s2689_s1 + $0x48] sm:$0xff]   ;;  %v2132_v27 = vld [vmem:[%s2690_s0 + $0x18] sm:$0xff]   ;;  %v88_v28 = vshrl.u32 %v2000_v17, 16 }
   0x6   :  { %v73_v14 = vrot.slane %v71_v12, 1  ;;  %v78_v15 = vrot.slane %v76_v13, 1  ;;  %v2002_v26 = vld [vmem:[%s2689_s1 + $0x68] sm:$0xff]   ;;  %v2004_v29 = vld [vmem:[%s2689_s1 + $0x50] sm:$0xff]   ;;  %v92_v31 = vshll.u32 %v2132_v27, 16  ;;  %v2007_v38 = vld [vmem:[%s2689_s1 + $0x58] sm:$0xff]  }
   0x7   :  { %1764 = vmatpush3.bf16.msra.mxu0 %v1990_v3  ;;  %1792 = vmatpush3.bf16.msra.mxu1 %v1991_v4  ;;  %v86_v25 = vrot.slane %v84_v21, 1  ;;  %v2005_v32 = vld [vmem:[%s2689_s1 + $0x70] sm:$0xff]   ;;  %v2151_v33 = vld [vmem:[%s2690_s0 + $0x20] sm:$0xf]  ;;  %v32_v34 = vld [vmem:[%s2690_s0 + $0x24] sm:$0x1] }
   0x8   :  { %1765 = vmatprep.subr.bf16.mxu0 %v2044_v0  ;;  %1793 = vmatprep.subr.bf16.mxu1 %v2044_v0  ;;  %v74_v19 = vor.u32 %v73_v14, %v69_v11  ;;  %v82_v24 = vor.u32 %v80_v20, %v78_v15  ;;  %v94_v36 = vrot.slane %v92_v31, 1  ;;  %v2165_v37 = vcombine.low %v2151_v33, %v32_v34  ;;  %v2009_v39 = vld [vmem:[%s2689_s1 + $0x78] sm:$0xff]   ;;  %v327_v42 = vld [vmem:[%s2690_s0 + $0x4] sm:$0xf]  ;;  %v328_v46 = vld [vmem:[%s2690_s0 + $0x8] sm:$0xf] }
   0x9   :  { %v90_v35 = vor.u32 %v88_v28, %v86_v25  ;;  %v96_v40 = vshrl.u32 %v2132_v27, 16  ;;  %v2179_v41 = vld [vmem:[%s2690_s0 + $0x1c] sm:$0xff]   ;;  %v2200_v49 = vld [vmem:[%s2690_s0 + $0x24] sm:$0x1f]   ;;  %v1516_v52 = vcombine.low %v327_v42, %v328_v46  ;;  %v2209_v53 = vld [vmem:[%s2690_s0 + $0xc] sm:$0xff]  }
   0xa   :  { %v79_v22 = vsel %vm67_vm1, %v74_v19, %v78_v15  ;;  %v87_v30 = vsel %vm67_vm1, %v82_v24, %v86_v25  ;;  %v100_v44 = vshll.u32 %v2165_v37, 16  ;;  %v395_v45 = vshll.u32 %v2179_v41, 16  ;;  %v530_v56 = vld [vmem:[%s2690_s0 + $0x4] sm:$0xe]  ;;  %v2222_v59 = vld [vmem:[%s2690_s0 + $0x30] sm:$0xff]   ;;  %v2227_v60 = vld [vmem:[%s2690_s0 + $0x38] sm:$0xff]  }
   0xb   :  { %1766 = vmatpush3.bf16.msra.mxu0 %v1992_v5  ;;  %1794 = vmatpush3.bf16.msra.mxu1 %v1993_v6  ;;  %v95_v43 = vsel %vm67_vm1, %v90_v35, %v94_v36  ;;  %v399_v48 = vshrl.u32 %v2179_v41, 16  ;;  %v98_v50 = vor.u32 %v96_v40, %v94_v36  ;;  %v403_v55 = vshll.u32 %v2200_v49, 16  ;;  %v2240_v5 = vld [vmem:[%s2690_s0 + $0x40] sm:$0xff]   ;;  %v2255_v11 = vld [vmem:[%s2690_s0 + $0x14] sm:$0xff]   ;;  %v2277_v28 = vld [vmem:[%s2690_s0 + $0x50] sm:$0xf] }
   0xc   :  { %1767 = vmatprep.subr.bf16.mxu0 %v2044_v0  ;;  %1795 = vmatprep.subr.bf16.mxu1 %v2044_v0  ;;  %v2192_v47 = vrot.slane %v395_v45, 1  ;;  %v102_v51 = vrot.slane %v100_v44, 1  ;;  %v104_v57 = vshrl.u32 %v2165_v37, 16  ;;  %v372_v62 = vshrl.u32 %v1516_v52, 16  ;;  %v2039_v45 = vld [vmem:[%s2690_s0 + $0x3c] sm:$0xff]  }
   0xd   :  { %v2217_v58 = vrot.slane %v403_v55, 1  ;;  %v374_v63 = vshll.u32 %v1516_v52, 16  ;;  %v379_v1 = vshll.u32 %v2209_v53, 16  ;;  %v799_v3 = vshrl.u32 %v2222_v59, 16  ;;  %v2041_v52 = vld [vmem:[%s2690_s0 + $0x44] sm:$0xff]  }
   0xe   :  { %v401_v54 = vor.u32 %v399_v48, %v2192_v47  ;;  %v103_v61 = vsel %vm67_vm1, %v98_v50, %v102_v51  ;;  %v801_v4 = vshll.u32 %v2222_v59, 16  ;;  %v806_v6 = vshll.u32 %v2227_v60, 16  ;;  %v2014_v55 = vld [vmem:[%s2689_s1] sm:$0xff]  }
   0xf   :  { %1768 = vmatpush3.bf16.msra.mxu0 %v1994_v9  ;;  %1796 = vmatpush3.bf16.msra.mxu1 %v1995_v10  ;;  %v814_v10 = vshll.u32 %v2240_v5, 16  ;;  %v545_v13 = vrot.slane %v2209_v53, 1  ;;  %v818_v19 = vshrl.u32 %v2240_v5, 16  ;;  %v106_v20 = vor.u32 %v104_v57, %v102_v51  ;;  %v1632_v51 = vld [vmem:[%s2690_s0 + $0x34] sm:$0xe] }
  0x10   :  { %1817 = vmatprep.subr.bf16.mxu0 %v2044_v0  ;;  %1845 = vmatprep.subr.bf16.mxu1 %v2044_v0  ;;  %v2233_v2 = vsel %vm67_vm1, %v401_v54, %v2217_v58  ;;  %v803_v9 = vrot.slane %v801_v4, 1  ;;  %v808_v12 = vrot.slane %v806_v6, 1  ;;  %v376_v21 = vrot.slane %v374_v63, 1  ;;  %v2013_v54 = vld [vmem:[%s2689_s1 + $0x20] sm:$0xff]   ;;  %v2042_v63 = vld [vmem:[%s2690_s0 + $0x4c] sm:$0xff]  }
  0x11   :  { %v816_v15 = vrot.slane %v814_v10, 1  ;;  %v387_v24 = vshll.u32 %v2255_v11, 16  ;;  %v547_v36 = vrot.slane %v2255_v11, 1  ;;  %v1271_v4 = vrot.slane %v2039_v45, 1 }
  0x12   :  { %1770 = vmatmul.mubr.msk.bf16.vlgmr.msra.gmra.mrb[0].mxu0 %vm131_vm2, %v79_v22  ;;  %1798 = vmatmul.mubr.msk.bf16.vlgmr.msra.gmra.mrb[0].mxu1 %vm131_vm2, %v1996_v7  ;;  %v810_v7 = vshrl.u32 %v2227_v60, 16  ;;  %v804_v14 = vor.u32 %v803_v9, %v799_v3  ;;  %v377_v35 = vor.u32 %v376_v21, %v372_v62  ;;  %v1111_v6 = vshrl.u32 %v2039_v45, 16 }
  0x13   :  { %1818 = vmatpush3.bf16.msra.mxu0 %v1998_v16  ;;  %1846 = vmatpush3.bf16.msra.mxu1 %v1999_v18  ;;  %v1498_v16 = vcombine.low %v2151_v33, %v2151_v33  ;;  %v2263_v18 = vld [vmem:[%s2690_s0 + $0x48] sm:$0xff]   ;;  %v381_v33 = vrot.slane %v379_v1, 1  ;;  %v2301_v40 = vrot.slane %v387_v24, 1  ;;  %v1115_v10 = vshll.u32 %v2041_v52, 16 }
  0x14   :  { %1773 = vmatprep.mubr.msk.bf16.mxu0 %vm2045_vm0, %v2044_v0  ;;  %1801 = vmatprep.mubr.msk.bf16.mxu1 %vm2045_vm0, %v2044_v0 }
  0x15   :  { %1819 = vmatprep.subr.bf16.mxu0 %v2044_v0  ;;  %1847 = vmatprep.subr.bf16.mxu1 %v2044_v0  ;;  %v382_v1 = vsel %vm67_vm1, %v377_v35, %v381_v33  ;;  %v1117_v21 = vrot.slane %v1115_v10, 1 }
  0x17   :  { %1820 = vmatpush3.bf16.msra.mxu0 %v2001_v23  ;;  %1848 = vmatpush3.bf16.msra.mxu1 %v2002_v26  ;;  %v2267_v23 = vsel %vm67_vm1, %v804_v14, %v808_v12  ;;  %v820_v26 = vor.u32 %v818_v19, %v816_v15  ;;  %v1119_v14 = vshrl.u32 %v2041_v52, 16 }
  0x18   :  { %1821 = vmatprep.subr.bf16.mxu0 %v2044_v0  ;;  %1849 = vmatprep.subr.bf16.mxu1 %v2044_v0 }
  0x19   :  { %v1121_v35 = vor.u32 %v1119_v14, %v1117_v21 }
  0x1a   :  { %1774 = vmatmul.mubr.msk.bf16.gmra.mrb[4].mxu0 %vm131_vm2, %v87_v30  ;;  %1802 = vmatmul.mubr.msk.bf16.gmra.mrb[4].mxu1 %vm131_vm2, %v1997_v8  ;;  %v1538_v8 = vcombine.low %v530_v56, %v328_v46  ;;  %v383_v30 = vshrl.u32 %v2209_v53, 16  ;;  %v2020_v53 = vld [vmem:[%s2689_s1 + $0x10] sm:$0xff]  }
  0x1b   :  { %1777 = vmatprep.mubr.msk.bf16.mxu0 %vm2045_vm0, %v2044_v0  ;;  %1805 = vmatprep.mubr.msk.bf16.mxu1 %vm2045_vm0, %v2044_v0 }
  0x1c   :  { %1822 = vmatpush3.bf16.msra.mxu0 %v2004_v29  ;;  %1850 = vmatpush3.bf16.msra.mxu1 %v2005_v32  ;;  %v544_v22 = vrot.slane %v1538_v8, 1  ;;  %v1567_v29 = vld [vmem:[%s2690_s0 + $0x54] sm:$0x1]  ;;  %v826_v32 = vshrl.u32 %v2263_v18, 16  ;;  %v385_v48 = vor.u32 %v383_v30, %v381_v33  ;;  %v2016_v30 = vld [vmem:[%s2689_s1 + $0x28] sm:$0xff]  }
  0x1d   :  { %1823 = vmatprep.subr.bf16.mxu0 %v2044_v0  ;;  %1851 = vmatprep.subr.bf16.mxu1 %v2044_v0  ;;  %v2284_v31 = vcombine.low %v2277_v28, %v1567_v29  ;;  %v1127_v29 = vshrl.u32 %v2042_v63, 16 }
  0x1e   :  { %v546_v46 = vsel %vm543_vm3, %v544_v22, %v545_v13  ;;  %v2340_v22 = vld [vmem:[%s2690_s0 + $0x54] sm:$0x1f]  }
  0x1f   :  { %v830_v37 = vshll.u32 %v2284_v31, 16 }
  0x20   :  { %1824 = vmatpush3.bf16.msra.mxu0 %v2007_v38  ;;  %1852 = vmatpush3.bf16.msra.mxu1 %v2009_v39  ;;  %v1600_v38 = vld [vmem:[%s2690_s0 + $0x34] sm:$0xf]  ;;  %v1601_v39 = vld [vmem:[%s2690_s0 + $0x38] sm:$0xf] }
  0x21   :  { %1873 = vmatprep.subr.bf16.mxu0 %v2044_v0  ;;  %1901 = vmatprep.subr.bf16.mxu1 %v2044_v0  ;;  %v1618_v44 = vcombine.low %v1600_v38, %v1601_v39  ;;  %v2312_v50 = vrot.slane %v830_v37, 1  ;;  %v1641_v62 = vcombine.low %v1632_v51, %v1601_v39  ;;  %v1131_v37 = vshll.u32 %v2340_v22, 16 }
  0x22   :  { %1778 = vmatmul.mubr.msk.bf16.gmra.mrb[8].mxu0 %vm131_vm2, %v95_v43  ;;  %1806 = vmatmul.mubr.msk.bf16.gmra.mrb[8].mxu1 %vm131_vm2, %v2000_v17  ;;  %v812_v17 = vor.u32 %v810_v7, %v808_v12  ;;  %v1273_v12 = vrot.slane %v2041_v52, 1  ;;  %v1277_v39 = vrot.slane %v2340_v22, 1  ;;  %v548_v51 = vsel %vm543_vm3, %v545_v13, %v547_v36 }
  0x23   :  { %1781 = vmatprep.mubr.msk.bf16.mxu0 %vm2045_vm0, %v2044_v0  ;;  %1809 = vmatprep.mubr.msk.bf16.mxu1 %vm2045_vm0, %v2044_v0  ;;  %v1100_v56 = vshrl.u32 %v1618_v44, 16  ;;  %v1102_v57 = vshll.u32 %v1618_v44, 16  ;;  %v1270_v9 = vrot.slane %v1641_v62, 1  ;;  %v2373_v44 = vrot.slane %v1131_v37, 1  ;;  %v2030_v62 = vld [vmem:[%s2689_s1 + $0x68] sm:$0xff]  }
  0x24   :  { %v2271_v25 = vsel %vm67_vm1, %v812_v17, %v816_v15  ;;  %v1123_v15 = vshll.u32 %v2042_v63, 16  ;;  %v2345_v24 = vsel %vm543_vm3, %v1271_v4, %v1273_v12  ;;  %v391_v52 = vshrl.u32 %v2255_v11, 16 }
  0x25   :  { %v1104_v7 = vrot.slane %v1102_v57, 1  ;;  %v2335_v19 = vsel %vm543_vm3, %v1270_v9, %v1271_v4  ;;  %v2023_v57 = vld [vmem:[%s2689_s1 + $0x18] sm:$0xff]  }
  0x26   :  { %v393_v13 = vor.u32 %v391_v52, %v2301_v40 }
  0x27   :  { %v1105_v17 = vor.u32 %v1104_v7, %v1100_v56  ;;  %v2022_v56 = vld [vmem:[%s2689_s1 + $0x38] sm:$0xff]  }
  0x2a   :  { %1782 = vmatmul.mubr.msk.bf16.gmra.mrb[12].mxu0 %vm131_vm2, %v103_v61  ;;  %1810 = vmatmul.mubr.msk.bf16.gmra.mrb[12].mxu1 %vm131_vm2, %v2132_v27  ;;  %v822_v27 = vshll.u32 %v2263_v18, 16  ;;  %v1107_v61 = vshll.u32 %v2039_v45, 16 }
  0x2b   :  { %1785 = vmatprep.mubr.msk.bf16.mxu0 %vm2045_vm0, %v2044_v0  ;;  %1813 = vmatprep.mubr.msk.bf16.mxu1 %vm2045_vm0, %v2044_v0 }
  0x2c   :  { %v824_v34 = vrot.slane %v822_v27, 1  ;;  %v1109_v8 = vrot.slane %v1107_v61, 1  ;;  %v398_v61 = vsel %vm67_vm1, %v393_v13, %v2192_v47  ;;  %v551_v47 = vrot.slane %v2200_v49, 1 }
  0x2e   :  { %v2304_v42 = vsel %vm67_vm1, %v820_v26, %v824_v34  ;;  %v828_v43 = vor.u32 %v826_v32, %v824_v34  ;;  %v1125_v26 = vrot.slane %v1123_v15, 1  ;;  %v2017_v32 = vld [vmem:[%s2689_s1 + $0x8] sm:$0xff]   ;;  %v2357_v33 = vsel %vm67_vm1, %v1105_v17, %v1109_v8 }
  0x30   :  { %v2332_v3 = vsel %vm67_vm1, %v828_v43, %v2312_v50  ;;  %v1129_v38 = vor.u32 %v1127_v29, %v1125_v26  ;;  %v2371_v43 = vsel %vm67_vm1, %v1121_v35, %v1125_v26 }
  0x32   :  { %1786 = vmatmul.mubr.msk.bf16.gmra.mrb[16].mxu0 %vm131_vm2, %v106_v20  ;;  %1814 = vmatmul.mubr.msk.bf16.gmra.mrb[16].mxu1 %vm131_vm2, %v1498_v16  ;;  %v1275_v16 = vrot.slane %v2042_v63, 1  ;;  %v1113_v20 = vor.u32 %v1111_v6, %v1109_v8  ;;  %v2035_v63 = vld [vmem:[%s2689_s1 + $0x58] sm:$0xff]  }
  0x33   :  { %1825 = vmatprep.mubr.msk.bf16.mxu0 %vm2045_vm0, %v2044_v0  ;;  %1853 = vmatprep.mubr.msk.bf16.mxu1 %vm2045_vm0, %v2044_v0 }
  0x34   :  { %v2348_v27 = vsel %vm543_vm3, %v1273_v12, %v1275_v16  ;;  %v2360_v34 = vsel %vm67_vm1, %v1113_v20, %v1117_v21  ;;  %v2378_v45 = vsel %vm543_vm3, %v1275_v16, %v1277_v39 }
  0x3a   :  { %1826 = vmatmul.mubr.msk.bf16.vlgmr.msra.gmra.mrb[20].mxu0 %vm131_vm2, %v382_v1  ;;  %1854 = vmatmul.mubr.msk.bf16.vlgmr.msra.gmra.mrb[20].mxu1 %vm131_vm2, %v546_v46  ;;  %v390_v46 = vsel %vm67_vm1, %v385_v48, %v2301_v40  ;;  %v2019_v48 = vld [vmem:[%s2689_s1 + $0x30] sm:$0xff]   ;;  %v2037_v1 = vld [vmem:[%s2689_s1 + $0x78] sm:$0xff]  }
  0x3b   :  { %1874 = vmatpush3.bf16.msra.mxu0 %v2013_v54  ;;  %1902 = vmatpush3.bf16.msra.mxu1 %v2014_v55  ;;  %v2390_v54 = vsel %vm67_vm1, %v1129_v38, %v2373_v44  ;;  %v549_v55 = vrot.slane %v2179_v41, 1 }
  0x3c   :  { %1829 = vmatprep.mubr.msk.bf16.mxu0 %vm2045_vm0, %v2044_v0  ;;  %1857 = vmatprep.mubr.msk.bf16.mxu1 %vm2045_vm0, %v2044_v0 }
  0x3d   :  { %1875 = vmatprep.subr.bf16.mxu0 %v2044_v0  ;;  %1903 = vmatprep.subr.bf16.mxu1 %v2044_v0  ;;  %v550_v41 = vsel %vm543_vm3, %v547_v36, %v549_v55  ;;  %v552_v11 = vsel %vm543_vm3, %v549_v55, %v551_v47  ;;  %v407_v36 = vshrl.u32 %v2200_v49, 16  ;;  %v2026_v49 = vld [vmem:[%s2689_s1 + $0x40] sm:$0xff]  }
  0x3f   :  { %1876 = vmatpush3.bf16.msra.mxu0 %v2016_v30  ;;  %1904 = vmatpush3.bf16.msra.mxu1 %v2017_v32  ;;  %v409_v40 = vor.u32 %v407_v36, %v2217_v58  ;;  %v2029_v58 = vld [vmem:[%s2689_s1 + $0x48] sm:$0xff]  }
  0x40   :  { %1877 = vmatprep.subr.bf16.mxu0 %v2044_v0  ;;  %1905 = vmatprep.subr.bf16.mxu1 %v2044_v0 }
  0x42   :  { %1830 = vmatmul.mubr.msk.bf16.gmra.mrb[24].mxu0 %vm131_vm2, %v390_v46  ;;  %1858 = vmatmul.mubr.msk.bf16.gmra.mrb[24].mxu1 %vm131_vm2, %v548_v51 }
  0x43   :  { %1833 = vmatprep.mubr.msk.bf16.mxu0 %vm2045_vm0, %v2044_v0  ;;  %1861 = vmatprep.mubr.msk.bf16.mxu1 %vm2045_vm0, %v2044_v0 }
  0x44   :  { %1878 = vmatpush3.bf16.msra.mxu0 %v2019_v48  ;;  %1906 = vmatpush3.bf16.msra.mxu1 %v2020_v53 }
  0x45   :  { %1879 = vmatprep.subr.bf16.mxu0 %v2044_v0  ;;  %1907 = vmatprep.subr.bf16.mxu1 %v2044_v0 }
  0x48   :  { %1880 = vmatpush3.bf16.msra.mxu0 %v2022_v56  ;;  %1908 = vmatpush3.bf16.msra.mxu1 %v2023_v57 }
  0x49   :  { %1929 = vmatprep.subr.bf16.mxu0 %v2044_v0  ;;  %1957 = vmatprep.subr.bf16.mxu1 %v2044_v0 }
  0x4a   :  { %1834 = vmatmul.mubr.msk.bf16.gmra.mrb[28].mxu0 %vm131_vm2, %v398_v61  ;;  %1862 = vmatmul.mubr.msk.bf16.gmra.mrb[28].mxu1 %vm131_vm2, %v550_v41 }
  0x4b   :  { %1837 = vmatprep.mubr.msk.bf16.mxu0 %vm2045_vm0, %v2044_v0  ;;  %1865 = vmatprep.mubr.msk.bf16.mxu1 %vm2045_vm0, %v2044_v0 }
  0x52   :  { %1838 = vmatmul.mubr.msk.bf16.gmra.mrb[32].mxu0 %vm131_vm2, %v2233_v2  ;;  %1866 = vmatmul.mubr.msk.bf16.gmra.mrb[32].mxu1 %vm131_vm2, %v552_v11  ;;  %v2027_v2 = vld [vmem:[%s2689_s1 + $0x60] sm:$0xff]  }
  0x53   :  { %1841 = vmatprep.mubr.msk.bf16.mxu0 %vm2045_vm0, %v2044_v0  ;;  %1869 = vmatprep.mubr.msk.bf16.mxu1 %vm2045_vm0, %v2044_v0 }
  0x5a   :  { %1842 = vmatmul.mubr.msk.bf16.gmra.mrb[36].mxu0 %vm131_vm2, %v409_v40  ;;  %1870 = vmatmul.mubr.msk.bf16.gmra.mrb[36].mxu1 %vm131_vm2, %v551_v47 }
  0x5b   :  { %1881 = vmatprep.mubr.msk.bf16.mxu0 %vm2045_vm0, %v2044_v0  ;;  %1909 = vmatprep.mubr.msk.bf16.mxu1 %vm2045_vm0, %v2044_v0 }
  0x62   :  { %1882 = vmatmul.mubr.msk.bf16.vlgmr.msra.gmra.mrb[40].mxu0 %vm131_vm2, %v2267_v23  ;;  %1910 = vmatmul.mubr.msk.bf16.vlgmr.msra.gmra.mrb[40].mxu1 %vm131_vm2, %v2222_v59  ;;  %v2032_v59 = vld [vmem:[%s2689_s1 + $0x50] sm:$0xff]  }
  0x63   :  { %1930 = vmatpush3.bf16.msra.mxu0 %v2026_v49  ;;  %1958 = vmatpush3.bf16.msra.mxu1 %v2027_v2  ;;  %v2033_v23 = vld [vmem:[%s2689_s1 + $0x70] sm:$0xff]  }
  0x64   :  { %1885 = vmatprep.mubr.msk.bf16.mxu0 %vm2045_vm0, %v2044_v0  ;;  %1913 = vmatprep.mubr.msk.bf16.mxu1 %vm2045_vm0, %v2044_v0 }
  0x65   :  { %1931 = vmatprep.subr.bf16.mxu0 %v2044_v0  ;;  %1959 = vmatprep.subr.bf16.mxu1 %v2044_v0 }
  0x67   :  { %1932 = vmatpush3.bf16.msra.mxu0 %v2029_v58  ;;  %1960 = vmatpush3.bf16.msra.mxu1 %v2030_v62 }
  0x68   :  { %1933 = vmatprep.subr.bf16.mxu0 %v2044_v0  ;;  %1961 = vmatprep.subr.bf16.mxu1 %v2044_v0 }
  0x6a   :  { %1886 = vmatmul.mubr.msk.bf16.gmra.mrb[44].mxu0 %vm131_vm2, %v2271_v25  ;;  %1914 = vmatmul.mubr.msk.bf16.gmra.mrb[44].mxu1 %vm131_vm2, %v2227_v60  ;;  %v834_v60 = vshrl.u32 %v2284_v31, 16  ;;  %v1590_v25 = vcombine.low %v2277_v28, %v2277_v28  ;;  %v1135_v28 = vshrl.u32 %v2340_v22, 16 }
  0x6b   :  { %1889 = vmatprep.mubr.msk.bf16.mxu0 %vm2045_vm0, %v2044_v0  ;;  %1917 = vmatprep.mubr.msk.bf16.mxu1 %vm2045_vm0, %v2044_v0 }
  0x6c   :  { %1934 = vmatpush3.bf16.msra.mxu0 %v2032_v59  ;;  %1962 = vmatpush3.bf16.msra.mxu1 %v2033_v23  ;;  %v1137_v31 = vor.u32 %v1135_v28, %v2373_v44  ;;  %v2577_v59 = vld [vmem:[%s2692_s2] ss:$0 sm:$0xff] }
  0x6d   :  { %1935 = vmatprep.subr.bf16.mxu0 %v2044_v0  ;;  %1963 = vmatprep.subr.bf16.mxu1 %v2044_v0 }
  0x70   :  { %1936 = vmatpush3.bf16.msra.mxu0 %v2035_v63  ;;  %1964 = vmatpush3.bf16.msra.mxu1 %v2037_v1 }
  0x72   :  { %1890 = vmatmul.mubr.msk.bf16.gmra.mrb[48].mxu0 %vm131_vm2, %v2304_v42  ;;  %1918 = vmatmul.mubr.msk.bf16.gmra.mrb[48].mxu1 %vm131_vm2, %v2240_v5  ;;  %v836_v5 = vor.u32 %v834_v60, %v2312_v50 }
  0x73   :  { %1893 = vmatprep.mubr.msk.bf16.mxu0 %vm2045_vm0, %v2044_v0  ;;  %1921 = vmatprep.mubr.msk.bf16.mxu1 %vm2045_vm0, %v2044_v0 }
  0x7a   :  { %1894 = vmatmul.mubr.msk.bf16.gmra.mrb[52].mxu0 %vm131_vm2, %v2332_v3  ;;  %1922 = vmatmul.mubr.msk.bf16.gmra.mrb[52].mxu1 %vm131_vm2, %v2263_v18  ;;  %v2046_v18 = vmov 0  }
  0x7b   :  { %1897 = vmatprep.mubr.msk.bf16.mxu0 %vm2045_vm0, %v2044_v0  ;;  %1925 = vmatprep.mubr.msk.bf16.mxu1 %vm2045_vm0, %v2044_v0  ;;  %745 = vst.msk [vmem:[%s2691_s3 + $0x24] sm:$0xf] %vm735_vm4, %v2046_v18  ;;  %1670 = vst.msk [vmem:[%s2691_s3 + $0x4c] sm:$0xf] %vm735_vm4, %v2046_v18 }
  0x82   :  { %1898 = vmatmul.mubr.msk.bf16.gmra.mrb[56].mxu0 %vm131_vm2, %v836_v5  ;;  %1926 = vmatmul.mubr.msk.bf16.gmra.mrb[56].mxu1 %vm131_vm2, %v1590_v25 }
  0x83   :  { %1937 = vmatprep.mubr.msk.bf16.mxu0 %vm2045_vm0, %v2044_v0  ;;  %1965 = vmatprep.mubr.msk.bf16.mxu1 %vm2045_vm0, %v2044_v0 }
  0x8a   :  { %1938 = vmatmul.mubr.msk.bf16.vlgmr.msra.gmra.mrb[60].mxu0 %vm131_vm2, %v2357_v33  ;;  %1966 = vmatmul.mubr.msk.bf16.vlgmr.msra.gmra.mrb[60].mxu1 %vm131_vm2, %v2335_v19 }
  0x8b   :  { %1941 = vmatprep.mubr.msk.bf16.mxu0 %vm2045_vm0, %v2044_v0  ;;  %1969 = vmatprep.mubr.msk.bf16.mxu1 %vm2045_vm0, %v2044_v0 }
  0x92   :  { %1942 = vmatmul.mubr.msk.bf16.gmra.mrb[64].mxu0 %vm131_vm2, %v2360_v34  ;;  %1970 = vmatmul.mubr.msk.bf16.gmra.mrb[64].mxu1 %vm131_vm2, %v2345_v24 }
  0x93   :  { %1945 = vmatprep.mubr.msk.bf16.mxu0 %vm2045_vm0, %v2044_v0  ;;  %1973 = vmatprep.mubr.msk.bf16.mxu1 %vm2045_vm0, %v2044_v0 }
  0x9a   :  { %1946 = vmatmul.mubr.msk.bf16.gmra.mrb[68].mxu0 %vm131_vm2, %v2371_v43  ;;  %1974 = vmatmul.mubr.msk.bf16.gmra.mrb[68].mxu1 %vm131_vm2, %v2348_v27 }
  0x9b   :  { %1949 = vmatprep.mubr.msk.bf16.mxu0 %vm2045_vm0, %v2044_v0  ;;  %1977 = vmatprep.mubr.msk.bf16.mxu1 %vm2045_vm0, %v2044_v0 }
  0xa2   :  { %1950 = vmatmul.mubr.msk.bf16.gmra.mrb[72].mxu0 %vm131_vm2, %v2390_v54  ;;  %1978 = vmatmul.mubr.msk.bf16.gmra.mrb[72].mxu1 %vm131_vm2, %v2378_v45 }
  0xa3   :  { %1953 = vmatprep.mubr.msk.bf16.mxu0 %vm2045_vm0, %v2044_v0  ;;  %1981 = vmatprep.mubr.msk.bf16.mxu1 %vm2045_vm0, %v2044_v0 }
  0xaa   :  { %1954 = vmatmul.mubr.msk.bf16.gmra.mrb[76].mxu0 %vm131_vm2, %v1137_v31  ;;  %1982 = vmatmul.mubr.msk.bf16.gmra.mrb[76].mxu1 %vm131_vm2, %v1277_v39 }
  0xe5   :  { %v181_v42 = vpop.f32.mrb[0].mxu0  ;;  %v289_v50 = vpop.f32.mrb[0].mxu1 }
  0xe6   :  { %v290_v3 = vadd.f32 %v289_v50, %v181_v42  ;;  %v1771_v4 = vpop.f32.mrb[1].mxu0  ;;  %v1799_v6 = vpop.f32.mrb[1].mxu1 }
  0xe7   :  { %v184_v7 = vpop.f32.mrb[2].mxu0  ;;  %v292_v8 = vpop.f32.mrb[2].mxu1 }
  0xe8   :  { %v293_v9 = vadd.f32 %v292_v8, %v184_v7  ;;  %v1772_v10 = vpop.f32.mrb[3].mxu0  ;;  %v1800_v12 = vpop.f32.mrb[3].mxu1 }
  0xed   :  { %v189_v14 = vpop.f32.mrb[4].mxu0  ;;  %v297_v0 = vpop.f32.mrb[4].mxu1 }
  0xee   :  { %v298_v15 = vadd.f32 %v297_v0, %v189_v14  ;;  %v1775_v16 = vpop.f32.mrb[5].mxu0  ;;  %v1803_v17 = vpop.f32.mrb[5].mxu1 }
  0xef   :  { %v192_v19 = vpop.f32.mrb[6].mxu0  ;;  %v300_v20 = vpop.f32.mrb[6].mxu1 }
  0xf0   :  { %v301_v21 = vadd.f32 %v300_v20, %v192_v19  ;;  %v1776_v22 = vpop.f32.mrb[7].mxu0  ;;  %v1804_v24 = vpop.f32.mrb[7].mxu1 }
  0xf5   :  { %v197_v26 = vpop.f32.mrb[8].mxu0  ;;  %v305_v27 = vpop.f32.mrb[8].mxu1 }
  0xf6   :  { %v2564_v29 = vadd.f32 %v305_v27, %v197_v26  ;;  %v1779_v30 = vpop.f32.mrb[9].mxu0  ;;  %v1807_v32 = vpop.f32.mrb[9].mxu1 }
  0xf7   :  { %v200_v33 = vpop.f32.mrb[10].mxu0  ;;  %v308_v34 = vpop.f32.mrb[10].mxu1 }
  0xf8   :  { %v2566_v35 = vadd.f32 %v308_v34, %v200_v33  ;;  %v1780_v37 = vpop.f32.mrb[11].mxu0  ;;  %v1808_v38 = vpop.f32.mrb[11].mxu1 }
  0xfd   :  { %v205_v39 = vpop.f32.mrb[12].mxu0  ;;  %v313_v43 = vpop.f32.mrb[12].mxu1 }
  0xfe   :  { %v2568_v44 = vadd.f32 %v313_v43, %v205_v39  ;;  %v1783_v45 = vpop.f32.mrb[13].mxu0  ;;  %v1811_v46 = vpop.f32.mrb[13].mxu1 }
  0xff   :  { %v208_v51 = vpop.f32.mrb[14].mxu0  ;;  %v316_v52 = vpop.f32.mrb[14].mxu1 }
 0x100   :  { %v2570_v54 = vadd.f32 %v316_v52, %v208_v51  ;;  %v1784_v48 = vpop.f32.mrb[15].mxu0  ;;  %v1812_v53 = vpop.f32.mrb[15].mxu1 }
 0x105   :  { %v213_v13 = vpop.f32.mrb[16].mxu0  ;;  %v321_v55 = vpop.f32.mrb[16].mxu1 }
 0x106   :  { %v2572_v56 = vadd.f32 %v321_v55, %v213_v13  ;;  %v1787_v57 = vpop.f32.mrb[17].mxu0  ;;  %v1815_v61 = vpop.f32.mrb[17].mxu1 }
 0x107   :  { %v216_v41 = vpop.f32.mrb[18].mxu0  ;;  %v324_v47 = vpop.f32.mrb[18].mxu1 }
 0x108   :  { %v1788_v11 = vpop.f32.mrb[19].mxu0  ;;  %v1816_v36 = vpop.f32.mrb[19].mxu1 }
 0x10d   :  { %v483_v40 = vpop.f32.mrb[20].mxu0  ;;  %v626_v49 = vpop.f32.mrb[20].mxu1 }
 0x10e   :  { %v521_v2 = vadd.f32 %v483_v40, %v290_v3  ;;  %v1827_v58 = vpop.f32.mrb[21].mxu0  ;;  %v1855_v62 = vpop.f32.mrb[21].mxu1 }
 0x10f   :  { %v486_v23 = vpop.f32.mrb[22].mxu0  ;;  %v629_v63 = vpop.f32.mrb[22].mxu1 }
 0x110   :  { %v664_v1 = vadd.f32 %v626_v49, %v521_v2  ;;  %v522_v60 = vadd.f32 %v486_v23, %v293_v9  ;;  %v1828_v5 = vpop.f32.mrb[23].mxu0  ;;  %v1856_v25 = vpop.f32.mrb[23].mxu1 }
 0x112   :  { %v680_v18 = vadd.f32 %v2577_v59, %v664_v1  ;;  %v665_v28 = vadd.f32 %v629_v63, %v522_v60 }
 0x114   :  { %v689_v31 = vmax.f32 %v680_v18, 0.0  ;;  %v681_v42 = vadd.f32 %v2577_v59, %v665_v28 }
 0x115   :  { %v491_v50 = vpop.f32.mrb[24].mxu0  ;;  %v634_v3 = vpop.f32.mrb[24].mxu1 }
 0x116   :  { %v1671_v4 = vpack.c.bf16 %v689_v31, %v689_v31  ;;  %v690_v6 = vmax.f32 %v681_v42, 0.0  ;;  %v523_v7 = vadd.f32 %v491_v50, %v298_v15  ;;  %v1831_v8 = vpop.f32.mrb[25].mxu0  ;;  %v1859_v10 = vpop.f32.mrb[25].mxu1 }
 0x117   :  { %v494_v12 = vpop.f32.mrb[26].mxu0  ;;  %v637_v14 = vpop.f32.mrb[26].mxu1 }
 0x118   :  { %736 = vst.msk [vmem:[%s2691_s3] sm:$0xf] %vm735_vm4, %v1671_v4  ;;  %v1672_v9 = vpack.c.bf16 %v690_v6, %v690_v6  ;;  %v666_v0 = vadd.f32 %v634_v3, %v523_v7  ;;  %v524_v16 = vadd.f32 %v494_v12, %v301_v21  ;;  %v1832_v17 = vpop.f32.mrb[27].mxu0  ;;  %v1860_v19 = vpop.f32.mrb[27].mxu1 }
 0x11a   :  { %737 = vst.msk [vmem:[%s2691_s3 + $0x4] sm:$0xf] %vm735_vm4, %v1672_v9  ;;  %v682_v15 = vadd.f32 %v2577_v59, %v666_v0  ;;  %v667_v20 = vadd.f32 %v637_v14, %v524_v16 }
 0x11c   :  { %v691_v22 = vmax.f32 %v682_v15, 0.0  ;;  %v683_v24 = vadd.f32 %v2577_v59, %v667_v20 }
 0x11d   :  { %v499_v26 = vpop.f32.mrb[28].mxu0  ;;  %v642_v27 = vpop.f32.mrb[28].mxu1 }
 0x11e   :  { %v1673_v30 = vpack.c.bf16 %v691_v22, %v691_v22  ;;  %v692_v32 = vmax.f32 %v683_v24, 0.0  ;;  %v525_v33 = vadd.f32 %v499_v26, %v2564_v29  ;;  %v1835_v21 = vpop.f32.mrb[29].mxu0  ;;  %v1863_v34 = vpop.f32.mrb[29].mxu1 }
 0x11f   :  { %v502_v37 = vpop.f32.mrb[30].mxu0  ;;  %v645_v38 = vpop.f32.mrb[30].mxu1 }
 0x120   :  { %738 = vst.msk [vmem:[%s2691_s3 + $0x8] sm:$0xf] %vm735_vm4, %v1673_v30  ;;  %v1674_v39 = vpack.c.bf16 %v692_v32, %v692_v32  ;;  %v668_v43 = vadd.f32 %v642_v27, %v525_v33  ;;  %v526_v45 = vadd.f32 %v502_v37, %v2566_v35  ;;  %v1836_v46 = vpop.f32.mrb[31].mxu0  ;;  %v1864_v51 = vpop.f32.mrb[31].mxu1 }
 0x122   :  { %739 = vst.msk [vmem:[%s2691_s3 + $0xc] sm:$0xf] %vm735_vm4, %v1674_v39  ;;  %v684_v29 = vadd.f32 %v2577_v59, %v668_v43  ;;  %v669_v52 = vadd.f32 %v645_v38, %v526_v45 }
 0x124   :  { %v693_v48 = vmax.f32 %v684_v29, 0.0  ;;  %v685_v53 = vadd.f32 %v2577_v59, %v669_v52 }
 0x125   :  { %v507_v13 = vpop.f32.mrb[32].mxu0  ;;  %v650_v55 = vpop.f32.mrb[32].mxu1 }
 0x126   :  { %v1675_v57 = vpack.c.bf16 %v693_v48, %v693_v48  ;;  %v694_v61 = vmax.f32 %v685_v53, 0.0  ;;  %v527_v41 = vadd.f32 %v507_v13, %v2568_v44  ;;  %v1839_v35 = vpop.f32.mrb[33].mxu0  ;;  %v1867_v47 = vpop.f32.mrb[33].mxu1 }
 0x127   :  { %v510_v11 = vpop.f32.mrb[34].mxu0  ;;  %v653_v36 = vpop.f32.mrb[34].mxu1 }
 0x128   :  { %740 = vst.msk [vmem:[%s2691_s3 + $0x10] sm:$0xf] %vm735_vm4, %v1675_v57  ;;  %v1676_v40 = vpack.c.bf16 %v694_v61, %v694_v61  ;;  %v670_v49 = vadd.f32 %v650_v55, %v527_v41  ;;  %v528_v2 = vadd.f32 %v510_v11, %v2570_v54  ;;  %v1840_v58 = vpop.f32.mrb[35].mxu0  ;;  %v1868_v62 = vpop.f32.mrb[35].mxu1 }
 0x12a   :  { %741 = vst.msk [vmem:[%s2691_s3 + $0x14] sm:$0xf] %vm735_vm4, %v1676_v40  ;;  %v686_v44 = vadd.f32 %v2577_v59, %v670_v49  ;;  %v671_v23 = vadd.f32 %v653_v36, %v528_v2 }
 0x12c   :  { %v695_v63 = vmax.f32 %v686_v44, 0.0  ;;  %v687_v1 = vadd.f32 %v2577_v59, %v671_v23 }
 0x12d   :  { %v515_v60 = vpop.f32.mrb[36].mxu0  ;;  %v658_v5 = vpop.f32.mrb[36].mxu1 }
 0x12e   :  { %v1677_v25 = vpack.c.bf16 %v695_v63, %v695_v63  ;;  %v696_v18 = vmax.f32 %v687_v1, 0.0  ;;  %v529_v28 = vadd.f32 %v515_v60, %v2572_v56  ;;  %v1843_v54 = vpop.f32.mrb[37].mxu0  ;;  %v1871_v31 = vpop.f32.mrb[37].mxu1 }
 0x12f   :  { %v518_v42 = vpop.f32.mrb[38].mxu0  ;;  %v661_v50 = vpop.f32.mrb[38].mxu1 }
 0x130   :  { %742 = vst.msk [vmem:[%s2691_s3 + $0x18] sm:$0xf] %vm735_vm4, %v1677_v25  ;;  %v1678_v3 = vpack.c.bf16 %v696_v18, %v696_v18  ;;  %v672_v4 = vadd.f32 %v658_v5, %v529_v28  ;;  %v1844_v6 = vpop.f32.mrb[39].mxu0  ;;  %v1872_v7 = vpop.f32.mrb[39].mxu1 }
 0x132   :  { %743 = vst.msk [vmem:[%s2691_s3 + $0x1c] sm:$0xf] %vm735_vm4, %v1678_v3  ;;  %v688_v56 = vadd.f32 %v2577_v59, %v672_v4 }
 0x134   :  { %v697_v8 = vmax.f32 %v688_v56, 0.0 }
 0x135   :  { %v910_v10 = vpop.f32.mrb[40].mxu0  ;;  %v1018_v12 = vpop.f32.mrb[40].mxu1 }
 0x136   :  { %v1679_v14 = vpack.c.bf16 %v697_v8, %v697_v8  ;;  %v1019_v9 = vadd.f32 %v1018_v12, %v910_v10  ;;  %v1883_v0 = vpop.f32.mrb[41].mxu0  ;;  %v1911_v16 = vpop.f32.mrb[41].mxu1 }
 0x137   :  { %v913_v17 = vpop.f32.mrb[42].mxu0  ;;  %v1021_v19 = vpop.f32.mrb[42].mxu1 }
 0x138   :  { %744 = vst.msk [vmem:[%s2691_s3 + $0x20] sm:$0xf] %vm735_vm4, %v1679_v14  ;;  %v1022_v15 = vadd.f32 %v1021_v19, %v913_v17  ;;  %v1884_v20 = vpop.f32.mrb[43].mxu0  ;;  %v1912_v22 = vpop.f32.mrb[43].mxu1 }
 0x13d   :  { %v918_v24 = vpop.f32.mrb[44].mxu0  ;;  %v1026_v26 = vpop.f32.mrb[44].mxu1 }
 0x13e   :  { %v1027_v27 = vadd.f32 %v1026_v26, %v918_v24  ;;  %v1887_v30 = vpop.f32.mrb[45].mxu0  ;;  %v1915_v32 = vpop.f32.mrb[45].mxu1 }
 0x13f   :  { %v921_v33 = vpop.f32.mrb[46].mxu0  ;;  %v1029_v21 = vpop.f32.mrb[46].mxu1 }
 0x140   :  { %v1030_v34 = vadd.f32 %v1029_v21, %v921_v33  ;;  %v1888_v37 = vpop.f32.mrb[47].mxu0  ;;  %v1916_v38 = vpop.f32.mrb[47].mxu1 }
 0x145   :  { %v926_v39 = vpop.f32.mrb[48].mxu0  ;;  %v1034_v43 = vpop.f32.mrb[48].mxu1 }
 0x146   :  { %v2629_v45 = vadd.f32 %v1034_v43, %v926_v39  ;;  %v1891_v46 = vpop.f32.mrb[49].mxu0  ;;  %v1919_v51 = vpop.f32.mrb[49].mxu1 }
 0x147   :  { %v929_v29 = vpop.f32.mrb[50].mxu0  ;;  %v1037_v52 = vpop.f32.mrb[50].mxu1 }
 0x148   :  { %v2631_v48 = vadd.f32 %v1037_v52, %v929_v29  ;;  %v1892_v53 = vpop.f32.mrb[51].mxu0  ;;  %v1920_v13 = vpop.f32.mrb[51].mxu1 }
 0x14d   :  { %v934_v55 = vpop.f32.mrb[52].mxu0  ;;  %v1042_v57 = vpop.f32.mrb[52].mxu1 }
 0x14e   :  { %v2633_v61 = vadd.f32 %v1042_v57, %v934_v55  ;;  %v1895_v41 = vpop.f32.mrb[53].mxu0  ;;  %v1923_v35 = vpop.f32.mrb[53].mxu1 }
 0x14f   :  { %v937_v47 = vpop.f32.mrb[54].mxu0  ;;  %v1045_v11 = vpop.f32.mrb[54].mxu1 }
 0x150   :  { %v2635_v36 = vadd.f32 %v1045_v11, %v937_v47  ;;  %v1896_v40 = vpop.f32.mrb[55].mxu0  ;;  %v1924_v49 = vpop.f32.mrb[55].mxu1 }
 0x155   :  { %v942_v2 = vpop.f32.mrb[56].mxu0  ;;  %v1050_v58 = vpop.f32.mrb[56].mxu1 }
 0x156   :  { %v2637_v62 = vadd.f32 %v1050_v58, %v942_v2  ;;  %v1899_v44 = vpop.f32.mrb[57].mxu0  ;;  %v1927_v23 = vpop.f32.mrb[57].mxu1 }
 0x157   :  { %v945_v63 = vpop.f32.mrb[58].mxu0  ;;  %v1053_v1 = vpop.f32.mrb[58].mxu1 }
 0x158   :  { %v1900_v60 = vpop.f32.mrb[59].mxu0  ;;  %v1928_v5 = vpop.f32.mrb[59].mxu1 }
 0x15d   :  { %v1211_v25 = vpop.f32.mrb[60].mxu0  ;;  %v1352_v18 = vpop.f32.mrb[60].mxu1 }
 0x15e   :  { %v1249_v28 = vadd.f32 %v1211_v25, %v1019_v9  ;;  %v1939_v54 = vpop.f32.mrb[61].mxu0  ;;  %v1967_v31 = vpop.f32.mrb[61].mxu1 }
 0x15f   :  { %v1214_v42 = vpop.f32.mrb[62].mxu0  ;;  %v1355_v50 = vpop.f32.mrb[62].mxu1 }
 0x160   :  { %v1390_v3 = vadd.f32 %v1352_v18, %v1249_v28  ;;  %v1250_v4 = vadd.f32 %v1214_v42, %v1022_v15  ;;  %v1940_v6 = vpop.f32.mrb[63].mxu0  ;;  %v1968_v7 = vpop.f32.mrb[63].mxu1 }
 0x162   :  { %v1406_v56 = vadd.f32 %v2577_v59, %v1390_v3  ;;  %v1391_v8 = vadd.f32 %v1355_v50, %v1250_v4 }
 0x164   :  { %v1415_v10 = vmax.f32 %v1406_v56, 0.0  ;;  %v1407_v12 = vadd.f32 %v2577_v59, %v1391_v8 }
 0x165   :  { %v1219_v14 = vpop.f32.mrb[64].mxu0  ;;  %v1360_v0 = vpop.f32.mrb[64].mxu1 }
 0x166   :  { %v1680_v16 = vpack.c.bf16 %v1415_v10, %v1415_v10  ;;  %v1416_v17 = vmax.f32 %v1407_v12, 0.0  ;;  %v1251_v19 = vadd.f32 %v1219_v14, %v1027_v27  ;;  %v1943_v9 = vpop.f32.mrb[65].mxu0  ;;  %v1971_v20 = vpop.f32.mrb[65].mxu1 }
 0x167   :  { %v1222_v22 = vpop.f32.mrb[66].mxu0  ;;  %v1363_v24 = vpop.f32.mrb[66].mxu1 }
 0x168   :  { %1661 = vst.msk [vmem:[%s2691_s3 + $0x28] sm:$0xf] %vm735_vm4, %v1680_v16  ;;  %v1681_v15 = vpack.c.bf16 %v1416_v17, %v1416_v17  ;;  %v1392_v26 = vadd.f32 %v1360_v0, %v1251_v19  ;;  %v1252_v30 = vadd.f32 %v1222_v22, %v1030_v34  ;;  %v1944_v32 = vpop.f32.mrb[67].mxu0  ;;  %v1972_v33 = vpop.f32.mrb[67].mxu1 }
 0x16a   :  { %1662 = vst.msk [vmem:[%s2691_s3 + $0x2c] sm:$0xf] %vm735_vm4, %v1681_v15  ;;  %v1408_v27 = vadd.f32 %v2577_v59, %v1392_v26  ;;  %v1393_v21 = vadd.f32 %v1363_v24, %v1252_v30 }
 0x16c   :  { %v1417_v37 = vmax.f32 %v1408_v27, 0.0  ;;  %v1409_v38 = vadd.f32 %v2577_v59, %v1393_v21 }
 0x16d   :  { %v1227_v39 = vpop.f32.mrb[68].mxu0  ;;  %v1368_v43 = vpop.f32.mrb[68].mxu1 }
 0x16e   :  { %v1682_v46 = vpack.c.bf16 %v1417_v37, %v1417_v37  ;;  %v1418_v51 = vmax.f32 %v1409_v38, 0.0  ;;  %v1253_v29 = vadd.f32 %v1227_v39, %v2629_v45  ;;  %v1947_v34 = vpop.f32.mrb[69].mxu0  ;;  %v1975_v52 = vpop.f32.mrb[69].mxu1 }
 0x16f   :  { %v1230_v53 = vpop.f32.mrb[70].mxu0  ;;  %v1371_v13 = vpop.f32.mrb[70].mxu1 }
 0x170   :  { %1663 = vst.msk [vmem:[%s2691_s3 + $0x30] sm:$0xf] %vm735_vm4, %v1682_v46  ;;  %v1683_v55 = vpack.c.bf16 %v1418_v51, %v1418_v51  ;;  %v1394_v57 = vadd.f32 %v1368_v43, %v1253_v29  ;;  %v1254_v41 = vadd.f32 %v1230_v53, %v2631_v48  ;;  %v1948_v35 = vpop.f32.mrb[71].mxu0  ;;  %v1976_v47 = vpop.f32.mrb[71].mxu1 }
 0x172   :  { %1664 = vst.msk [vmem:[%s2691_s3 + $0x34] sm:$0xf] %vm735_vm4, %v1683_v55  ;;  %v1410_v45 = vadd.f32 %v2577_v59, %v1394_v57  ;;  %v1395_v11 = vadd.f32 %v1371_v13, %v1254_v41 }
 0x174   :  { %v1419_v40 = vmax.f32 %v1410_v45, 0.0  ;;  %v1411_v49 = vadd.f32 %v2577_v59, %v1395_v11 }
 0x175   :  { %v1235_v2 = vpop.f32.mrb[72].mxu0  ;;  %v1376_v58 = vpop.f32.mrb[72].mxu1 }
 0x176   :  { %v1684_v44 = vpack.c.bf16 %v1419_v40, %v1419_v40  ;;  %v1420_v23 = vmax.f32 %v1411_v49, 0.0  ;;  %v1255_v63 = vadd.f32 %v1235_v2, %v2633_v61  ;;  %v1951_v48 = vpop.f32.mrb[73].mxu0  ;;  %v1979_v1 = vpop.f32.mrb[73].mxu1 }
 0x177   :  { %v1238_v60 = vpop.f32.mrb[74].mxu0  ;;  %v1379_v5 = vpop.f32.mrb[74].mxu1 }
 0x178   :  { %1665 = vst.msk [vmem:[%s2691_s3 + $0x38] sm:$0xf] %vm735_vm4, %v1684_v44  ;;  %v1685_v25 = vpack.c.bf16 %v1420_v23, %v1420_v23  ;;  %v1396_v18 = vadd.f32 %v1376_v58, %v1255_v63  ;;  %v1256_v28 = vadd.f32 %v1238_v60, %v2635_v36  ;;  %v1952_v54 = vpop.f32.mrb[75].mxu0  ;;  %v1980_v31 = vpop.f32.mrb[75].mxu1 }
 0x17a   :  { %1666 = vst.msk [vmem:[%s2691_s3 + $0x3c] sm:$0xf] %vm735_vm4, %v1685_v25  ;;  %v1412_v61 = vadd.f32 %v2577_v59, %v1396_v18  ;;  %v1397_v42 = vadd.f32 %v1379_v5, %v1256_v28 }
 0x17c   :  { %v1421_v50 = vmax.f32 %v1412_v61, 0.0  ;;  %v1413_v3 = vadd.f32 %v2577_v59, %v1397_v42 }
 0x17d   :  { %v1243_v4 = vpop.f32.mrb[76].mxu0  ;;  %v1384_v6 = vpop.f32.mrb[76].mxu1 }
 0x17e   :  { %v1686_v7 = vpack.c.bf16 %v1421_v50, %v1421_v50  ;;  %v1422_v56 = vmax.f32 %v1413_v3, 0.0  ;;  %v1257_v8 = vadd.f32 %v1243_v4, %v2637_v62  ;;  %v1955_v36 = vpop.f32.mrb[77].mxu0  ;;  %v1983_v10 = vpop.f32.mrb[77].mxu1 }
 0x17f   :  { %v1246_v12 = vpop.f32.mrb[78].mxu0  ;;  %v1387_v14 = vpop.f32.mrb[78].mxu1 }
 0x180   :  { %1667 = vst.msk [vmem:[%s2691_s3 + $0x40] sm:$0xf] %vm735_vm4, %v1686_v7  ;;  %v1687_v0 = vpack.c.bf16 %v1422_v56, %v1422_v56  ;;  %v1398_v16 = vadd.f32 %v1384_v6, %v1257_v8  ;;  %v1956_v17 = vpop.f32.mrb[79].mxu0  ;;  %v1984_v19 = vpop.f32.mrb[79].mxu1 }
 0x182   :  { %1668 = vst.msk [vmem:[%s2691_s3 + $0x44] sm:$0xf] %vm735_vm4, %v1687_v0  ;;  %v1414_v62 = vadd.f32 %v2577_v59, %v1398_v16 }
 0x184   :  { %v1423_v9 = vmax.f32 %v1414_v62, 0.0 }
 0x186   :  { %v1688_v20 = vpack.c.bf16 %v1423_v9, %v1423_v9 }
 0x188   :  { %1669 = vst.msk [vmem:[%s2691_s3 + $0x48] sm:$0xf] %vm735_vm4, %v1688_v20 }

// kernel: _lambda_.5
= control target key start
LH: loop header
LB: loop body
LE: loop exit
PB: predicated region body
PF: predicated region fallthrough
CT: control target
= control target key end

     0   :  { %v1531_v0 = vmov 0.0   ;;  %vm1532_vm0 = vmmov 0   ;;  %vm391_vm1 = vsmask.f32 5376  ;;  %vm516_vm2 = vcmask 519168   ;;  %s1900_s1 = inlined_call_operand.vmem [shape: bf16[4,128,64], index: 1, kind: input, shape index: {}]   ;;  %s1901_s0 = inlined_call_operand.vmem [shape: bf16[2,24,128], index: 0, kind: input, shape index: {}]   ;;  %s1902_s3 = inlined_call_operand.vmem [shape: bf16[2,24,64], index: 3, kind: output, shape index: {}]   ;;  %s1903_s2 = inlined_call_operand.vmem [shape: f32[1,64], index: 2, kind: input, shape index: {}]  }
   0x1   :  { %1294 = vmatprep.subr.bf16.mxu0 %v1531_v0  ;;  %1314 = vmatprep.subr.bf16.mxu1 %v1531_v0  ;;  %v1457_v1 = vld [vmem:[%s1900_s1 + $0x40] sm:$0xff]   ;;  %v1459_v3 = vld [vmem:[%s1900_s1 + $0x48] sm:$0xff]   ;;  %v1461_v5 = vld [vmem:[%s1900_s1 + $0x50] sm:$0xff]   ;;  %vm520_vm3 = vcmask 519170   ;;  %vm518_vm4 = vcmask 517120  }
   0x2   :  { %v1458_v2 = vld [vmem:[%s1900_s1] sm:$0xff]   ;;  %1310 = vmatprep.mubr.msk.bf16.mxu0 %vm1532_vm0, %v1531_v0  ;;  %1330 = vmatprep.mubr.msk.bf16.mxu1 %vm1532_vm0, %v1531_v0  ;;  %v1460_v4 = vld [vmem:[%s1900_s1 + $0x8] sm:$0xff]   ;;  %v1462_v6 = vld [vmem:[%s1900_s1 + $0x10] sm:$0xff]  }
   0x3   :  { %1295 = vmatpush3.bf16.msra.mxu0 %v1457_v1  ;;  %1315 = vmatpush3.bf16.msra.mxu1 %v1458_v2  ;;  %v1463_v7 = vld [vmem:[%s1900_s1 + $0x58] sm:$0xff]   ;;  %v1465_v9 = vld [vmem:[%s1900_s1 + $0x60] sm:$0xff]   ;;  %v1467_v14 = vld [vmem:[%s1900_s1 + $0x68] sm:$0xff]  }
   0x4   :  { %1296 = vmatprep.subr.bf16.mxu0 %v1531_v0  ;;  %1316 = vmatprep.subr.bf16.mxu1 %v1531_v0  ;;  %v1464_v8 = vld [vmem:[%s1900_s1 + $0x18] sm:$0xff]   ;;  %v1466_v10 = vld [vmem:[%s1900_s1 + $0x20] sm:$0xff]   ;;  %v1468_v15 = vld [vmem:[%s1900_s1 + $0x28] sm:$0xff]  }
   0x5   :  { %v15_v11 = vld [vmem:[%s1901_s0] sm:$0xf]  ;;  %v33_v12 = vld [vmem:[%s1901_s0 + $0x4] sm:$0x7]  ;;  %v1469_v17 = vld [vmem:[%s1900_s1 + $0x70] sm:$0xff]  }
   0x6   :  { %v1046_v13 = vcombine.low %v15_v11, %v33_v12  ;;  %v1470_v18 = vld [vmem:[%s1900_s1 + $0x30] sm:$0xff]   ;;  %v1471_v19 = vld [vmem:[%s1900_s1 + $0x78] sm:$0xff]   ;;  %v16_v23 = vld [vmem:[%s1901_s0 + $0x4] sm:$0x3] }
   0x7   :  { %1297 = vmatpush3.bf16.msra.mxu0 %v1459_v3  ;;  %1317 = vmatpush3.bf16.msra.mxu1 %v1460_v4  ;;  %v1472_v22 = vld [vmem:[%s1900_s1 + $0x38] sm:$0xff]   ;;  %v1055_v25 = vcombine.low %v15_v11, %v16_v23  ;;  %v1475_v26 = vld [vmem:[%s1900_s1 + $0x80] sm:$0xff]   ;;  %v1477_v28 = vld [vmem:[%s1900_s1 + $0x88] sm:$0xff]  }
   0x8   :  { %1298 = vmatprep.subr.bf16.mxu0 %v1531_v0  ;;  %1318 = vmatprep.subr.bf16.mxu1 %v1531_v0  ;;  %v59_v16 = vshll.u32 %v1046_v13, 16  ;;  %v57_v20 = vshrl.u32 %v1046_v13, 16  ;;  %v1476_v27 = vld [vmem:[%s1900_s1 + $0xc0] sm:$0xff]   ;;  %v1478_v29 = vld [vmem:[%s1900_s1 + $0xc8] sm:$0xff]   ;;  %v1479_v30 = vld [vmem:[%s1900_s1 + $0x90] sm:$0xff]  }
   0x9   :  { %v1480_v31 = vld [vmem:[%s1900_s1 + $0xd0] sm:$0xff]   ;;  %v1481_v32 = vld [vmem:[%s1900_s1 + $0x98] sm:$0xff]   ;;  %v1483_v34 = vld [vmem:[%s1900_s1 + $0xa0] sm:$0xff]  }
   0xa   :  { %v61_v21 = vrot.slane %v59_v16, 1  ;;  %v1482_v33 = vld [vmem:[%s1900_s1 + $0xd8] sm:$0xff]   ;;  %v1484_v35 = vld [vmem:[%s1900_s1 + $0xe0] sm:$0xff]   ;;  %v1493_v37 = vld [vmem:[%s1901_s0 + $0x8] ss:$0 sps:$4 sm:$0x11]  }
   0xb   :  { %1299 = vmatpush3.bf16.msra.mxu0 %v1461_v5  ;;  %1319 = vmatpush3.bf16.msra.mxu1 %v1462_v6  ;;  %v1492_v36 = vld [vmem:[%s1901_s0] sm:$0xfc]   ;;  %v1485_v38 = vld [vmem:[%s1900_s1 + $0xa8] sm:$0xff]   ;;  %v1487_v42 = vld [vmem:[%s1900_s1 + $0xb0] sm:$0xff]   ;;  %v401_v44 = vshll.u32 %v1493_v37, 16 }
   0xc   :  { %1300 = vmatprep.subr.bf16.mxu0 %v1531_v0  ;;  %1320 = vmatprep.subr.bf16.mxu1 %v1531_v0  ;;  %v62_v24 = vor.u32 %v61_v21, %v57_v20  ;;  %v1486_v39 = vld [vmem:[%s1900_s1 + $0xe8] sm:$0xff]   ;;  %v393_v40 = vshrl.u32 %v1492_v36, 16  ;;  %v396_v41 = vshll.u32 %v1492_v36, 16  ;;  %v1488_v43 = vld [vmem:[%s1900_s1 + $0xf0] sm:$0xff]   ;;  %v1491_v47 = vld [vmem:[%s1901_s0] sm:$0xfc]  }
   0xd   :  { %v1489_v48 = vld [vmem:[%s1900_s1 + $0xb8] sm:$0xff]   ;;  %v403_v51 = vrot.slane %v401_v44, 3  ;;  %v270_v52 = vrot.slane %v1491_v47, 2  ;;  %v1494_v53 = vld [vmem:[%s1900_s1 + $0x40] sm:$0xff]   ;;  %v1496_v56 = vld [vmem:[%s1900_s1 + $0x48] sm:$0xff]   ;;  %v1533_v44 = vmov 0  }
   0xe   :  { %v395_v45 = vrot.slane %v393_v40, 2  ;;  %v398_v46 = vrot.slane %v396_v41, 3  ;;  %v1490_v49 = vld [vmem:[%s1900_s1 + $0xf8] sm:$0xff]   ;;  %v1495_v55 = vld [vmem:[%s1900_s1] sm:$0xff]   ;;  %v1497_v57 = vld [vmem:[%s1900_s1 + $0x8] sm:$0xff]  }
   0xf   :  { %1301 = vmatpush3.bf16.msra.mxu0 %v1463_v7  ;;  %1321 = vmatpush3.bf16.msra.mxu1 %v1464_v8  ;;  %v1498_v58 = vld [vmem:[%s1900_s1 + $0x50] sm:$0xff]   ;;  %v1500_v1 = vld [vmem:[%s1900_s1 + $0x58] sm:$0xff]   ;;  %v1502_v8 = vld [vmem:[%s1900_s1 + $0x60] sm:$0xff]   ;;  %521 = vst.msk [vmem:[%s1902_s3 + $0x4] sm:$0xc] %vm520_vm3, %v1533_v44 }
  0x10   :  { %1302 = vmatprep.subr.bf16.mxu0 %v1531_v0  ;;  %1322 = vmatprep.subr.bf16.mxu1 %v1531_v0  ;;  %v399_v50 = vor.u32 %v398_v46, %v395_v45  ;;  %v1499_v59 = vld [vmem:[%s1900_s1 + $0x10] sm:$0xff]   ;;  %v1501_v3 = vld [vmem:[%s1900_s1 + $0x18] sm:$0xff]   ;;  %v1503_v11 = vld [vmem:[%s1900_s1 + $0x20] sm:$0xff]   ;;  %522 = vst.msk [vmem:[%s1902_s3 + $0x8] sm:$0xf] %vm516_vm2, %v1533_v44 }
  0x11   :  { %v1529_v60 = vld [vmem:[%s1901_s0 + $0xc] sm:$0xfc]   ;;  %v1530_v61 = vld [vmem:[%s1901_s0 + $0x14] ss:$0 sps:$4 sm:$0x11]   ;;  %v1508_v21 = vld [vmem:[%s1900_s1 + $0x78] sm:$0xff]  }
  0x12   :  { %v404_v54 = vsel %vm391_vm1, %v399_v50, %v403_v51  ;;  %v898_v62 = vshrl.u32 %v1529_v60, 16  ;;  %v901_v63 = vshll.u32 %v1529_v60, 16  ;;  %v906_v2 = vshll.u32 %v1530_v61, 16  ;;  %v1119_v23 = vld [vmem:[%s1901_s0 + $0x10] sm:$0x3]  ;;  %v1522_v36 = vld [vmem:[%s1900_s1 + $0xa8] sm:$0xff]  }
  0x13   :  { %1303 = vmatpush3.bf16.msra.mxu0 %v1465_v9  ;;  %1323 = vmatpush3.bf16.msra.mxu1 %v1466_v10  ;;  %v1118_v9 = vld [vmem:[%s1901_s0 + $0xc] sm:$0xf]  ;;  %v1120_v10 = vld [vmem:[%s1901_s0 + $0x10] sm:$0x7]  ;;  %v1526_v41 = vld [vmem:[%s1900_s1 + $0xb8] sm:$0xff]  }
  0x14   :  { %1304 = vmatprep.subr.bf16.mxu0 %v1531_v0  ;;  %1324 = vmatprep.subr.bf16.mxu1 %v1531_v0  ;;  %v900_v4 = vrot.slane %v898_v62, 2  ;;  %v903_v5 = vrot.slane %v901_v63, 3  ;;  %v908_v6 = vrot.slane %v906_v2, 3  ;;  %v1137_v13 = vcombine.low %v1118_v9, %v1120_v10  ;;  %v1523_v37 = vld [vmem:[%s1900_s1 + $0xe8] sm:$0xff]   ;;  %1216 = vst.msk [vmem:[%s1902_s3 + $0x10] sm:$0xc] %vm520_vm3, %v1533_v44 }
  0x15   :  { %v1528_v40 = vld [vmem:[%s1901_s0 + $0xc] sm:$0xfc]   ;;  %1217 = vst.msk [vmem:[%s1902_s3 + $0x14] sm:$0xf] %vm516_vm2, %v1533_v44 }
  0x16   :  { %v904_v7 = vor.u32 %v903_v5, %v900_v4  ;;  %v567_v16 = vshll.u32 %v1137_v13, 16 }
  0x17   :  { %1305 = vmatpush3.bf16.msra.mxu0 %v1467_v14  ;;  %1325 = vmatpush3.bf16.msra.mxu1 %v1468_v15  ;;  %v1504_v14 = vld [vmem:[%s1900_s1 + $0x68] sm:$0xff]  }
  0x18   :  { %1306 = vmatprep.subr.bf16.mxu0 %v1531_v0  ;;  %1326 = vmatprep.subr.bf16.mxu1 %v1531_v0  ;;  %v1765_v12 = vsel %vm391_vm1, %v904_v7, %v908_v6  ;;  %v1505_v15 = vld [vmem:[%s1900_s1 + $0x28] sm:$0xff]   ;;  %v569_v20 = vrot.slane %v567_v16, 1 }
  0x1b   :  { %1307 = vmatpush3.bf16.msra.mxu0 %v1469_v17  ;;  %1327 = vmatpush3.bf16.msra.mxu1 %v1470_v18  ;;  %v1506_v17 = vld [vmem:[%s1900_s1 + $0x70] sm:$0xff]  }
  0x1c   :  { %1308 = vmatprep.subr.bf16.mxu0 %v1531_v0  ;;  %1328 = vmatprep.subr.bf16.mxu1 %v1531_v0  ;;  %v1507_v18 = vld [vmem:[%s1900_s1 + $0x30] sm:$0xff]  }
  0x1f   :  { %1309 = vmatpush3.bf16.msra.mxu0 %v1471_v19  ;;  %1329 = vmatpush3.bf16.msra.mxu1 %v1472_v22  ;;  %v565_v19 = vshrl.u32 %v1137_v13, 16  ;;  %v1509_v22 = vld [vmem:[%s1900_s1 + $0x38] sm:$0xff]  }
  0x20   :  { %1334 = vmatprep.subr.bf16.mxu0 %v1531_v0  ;;  %1354 = vmatprep.subr.bf16.mxu1 %v1531_v0 }
  0x22   :  { %1311 = vmatmul.mubr.bf16.vlgmr.msra.gmra.mrb[0].mxu0 %v62_v24  ;;  %1331 = vmatmul.mubr.bf16.vlgmr.msra.gmra.mrb[0].mxu1 %v1055_v25  ;;  %v570_v24 = vor.u32 %v569_v20, %v565_v19  ;;  %v1146_v25 = vcombine.low %v1118_v9, %v1119_v23 }
  0x23   :  { %1335 = vmatpush3.bf16.msra.mxu0 %v1475_v26  ;;  %1355 = vmatpush3.bf16.msra.mxu1 %v1476_v27  ;;  %v1512_v26 = vld [vmem:[%s1900_s1 + $0x80] sm:$0xff]  }
  0x24   :  { %1336 = vmatprep.subr.bf16.mxu0 %v1531_v0  ;;  %1356 = vmatprep.subr.bf16.mxu1 %v1531_v0  ;;  %v1513_v27 = vld [vmem:[%s1900_s1 + $0xc0] sm:$0xff]  }
  0x25   :  { %1350 = vmatprep.mubr.msk.bf16.mxu0 %vm1532_vm0, %v1531_v0  ;;  %1370 = vmatprep.mubr.msk.bf16.mxu1 %vm1532_vm0, %v1531_v0 }
  0x27   :  { %1337 = vmatpush3.bf16.msra.mxu0 %v1477_v28  ;;  %1357 = vmatpush3.bf16.msra.mxu1 %v1478_v29  ;;  %v1514_v28 = vld [vmem:[%s1900_s1 + $0x88] sm:$0xff]  }
  0x28   :  { %1338 = vmatprep.subr.bf16.mxu0 %v1531_v0  ;;  %1358 = vmatprep.subr.bf16.mxu1 %v1531_v0  ;;  %v1515_v29 = vld [vmem:[%s1900_s1 + $0xc8] sm:$0xff]  }
  0x2b   :  { %1339 = vmatpush3.bf16.msra.mxu0 %v1479_v30  ;;  %1359 = vmatpush3.bf16.msra.mxu1 %v1480_v31  ;;  %v1516_v30 = vld [vmem:[%s1900_s1 + $0x90] sm:$0xff]  }
  0x2c   :  { %1340 = vmatprep.subr.bf16.mxu0 %v1531_v0  ;;  %1360 = vmatprep.subr.bf16.mxu1 %v1531_v0  ;;  %v1517_v31 = vld [vmem:[%s1900_s1 + $0xd0] sm:$0xff]  }
  0x2f   :  { %1341 = vmatpush3.bf16.msra.mxu0 %v1481_v32  ;;  %1361 = vmatpush3.bf16.msra.mxu1 %v1482_v33  ;;  %v1518_v32 = vld [vmem:[%s1900_s1 + $0x98] sm:$0xff]  }
  0x30   :  { %1342 = vmatprep.subr.bf16.mxu0 %v1531_v0  ;;  %1362 = vmatprep.subr.bf16.mxu1 %v1531_v0  ;;  %v1519_v33 = vld [vmem:[%s1900_s1 + $0xd8] sm:$0xff]  }
  0x33   :  { %1343 = vmatpush3.bf16.msra.mxu0 %v1483_v34  ;;  %1363 = vmatpush3.bf16.msra.mxu1 %v1484_v35  ;;  %v1520_v34 = vld [vmem:[%s1900_s1 + $0xa0] sm:$0xff]  }
  0x34   :  { %1344 = vmatprep.subr.bf16.mxu0 %v1531_v0  ;;  %1364 = vmatprep.subr.bf16.mxu1 %v1531_v0  ;;  %v1521_v35 = vld [vmem:[%s1900_s1 + $0xe0] sm:$0xff]  }
  0x37   :  { %1345 = vmatpush3.bf16.msra.mxu0 %v1485_v38  ;;  %1365 = vmatpush3.bf16.msra.mxu1 %v1486_v39  ;;  %v1524_v38 = vld [vmem:[%s1900_s1 + $0xb0] sm:$0xff]  }
  0x38   :  { %1346 = vmatprep.subr.bf16.mxu0 %v1531_v0  ;;  %1366 = vmatprep.subr.bf16.mxu1 %v1531_v0  ;;  %v1525_v39 = vld [vmem:[%s1900_s1 + $0xf0] sm:$0xff]  }
  0x3b   :  { %1347 = vmatpush3.bf16.msra.mxu0 %v1487_v42  ;;  %1367 = vmatpush3.bf16.msra.mxu1 %v1488_v43  ;;  %v1527_v42 = vld [vmem:[%s1900_s1 + $0xf8] sm:$0xff]   ;;  %v777_v43 = vrot.slane %v1528_v40, 2 }
  0x3c   :  { %1348 = vmatprep.subr.bf16.mxu0 %v1531_v0  ;;  %1368 = vmatprep.subr.bf16.mxu1 %v1531_v0 }
  0x3f   :  { %1349 = vmatpush3.bf16.msra.mxu0 %v1489_v48  ;;  %1369 = vmatpush3.bf16.msra.mxu1 %v1490_v49 }
  0x40   :  { %1374 = vmatprep.subr.bf16.mxu0 %v1531_v0  ;;  %1394 = vmatprep.subr.bf16.mxu1 %v1531_v0 }
  0x42   :  { %1351 = vmatmul.mubr.bf16.vlgmr.msra.gmra.mrb[4].mxu0 %v270_v52  ;;  %1371 = vmatmul.mubr.bf16.vlgmr.msra.gmra.mrb[4].mxu1 %v404_v54 }
  0x43   :  { %1375 = vmatpush3.bf16.msra.mxu0 %v1494_v53  ;;  %1395 = vmatpush3.bf16.msra.mxu1 %v1495_v55 }
  0x44   :  { %1376 = vmatprep.subr.bf16.mxu0 %v1531_v0  ;;  %1396 = vmatprep.subr.bf16.mxu1 %v1531_v0 }
  0x45   :  { %1390 = vmatprep.mubr.msk.bf16.mxu0 %vm1532_vm0, %v1531_v0  ;;  %1410 = vmatprep.mubr.msk.bf16.mxu1 %vm1532_vm0, %v1531_v0 }
  0x47   :  { %1377 = vmatpush3.bf16.msra.mxu0 %v1496_v56  ;;  %1397 = vmatpush3.bf16.msra.mxu1 %v1497_v57 }
  0x48   :  { %1378 = vmatprep.subr.bf16.mxu0 %v1531_v0  ;;  %1398 = vmatprep.subr.bf16.mxu1 %v1531_v0 }
  0x4b   :  { %1379 = vmatpush3.bf16.msra.mxu0 %v1498_v58  ;;  %1399 = vmatpush3.bf16.msra.mxu1 %v1499_v59  ;;  %v1115_v58 = vld [vmem:[%s1903_s2] ss:$0 sm:$0xff] }
  0x4c   :  { %1380 = vmatprep.subr.bf16.mxu0 %v1531_v0  ;;  %1400 = vmatprep.subr.bf16.mxu1 %v1531_v0 }
  0x4f   :  { %1381 = vmatpush3.bf16.msra.mxu0 %v1500_v1  ;;  %1401 = vmatpush3.bf16.msra.mxu1 %v1501_v3 }
  0x50   :  { %1382 = vmatprep.subr.bf16.mxu0 %v1531_v0  ;;  %1402 = vmatprep.subr.bf16.mxu1 %v1531_v0 }
  0x53   :  { %1383 = vmatpush3.bf16.msra.mxu0 %v1502_v8  ;;  %1403 = vmatpush3.bf16.msra.mxu1 %v1503_v11 }
  0x54   :  { %1384 = vmatprep.subr.bf16.mxu0 %v1531_v0  ;;  %1404 = vmatprep.subr.bf16.mxu1 %v1531_v0 }
  0x57   :  { %1385 = vmatpush3.bf16.msra.mxu0 %v1504_v14  ;;  %1405 = vmatpush3.bf16.msra.mxu1 %v1505_v15 }
  0x58   :  { %1386 = vmatprep.subr.bf16.mxu0 %v1531_v0  ;;  %1406 = vmatprep.subr.bf16.mxu1 %v1531_v0 }
  0x5b   :  { %1387 = vmatpush3.bf16.msra.mxu0 %v1506_v17  ;;  %1407 = vmatpush3.bf16.msra.mxu1 %v1507_v18 }
  0x5c   :  { %1388 = vmatprep.subr.bf16.mxu0 %v1531_v0  ;;  %1408 = vmatprep.subr.bf16.mxu1 %v1531_v0 }
  0x5f   :  { %1389 = vmatpush3.bf16.msra.mxu0 %v1508_v21  ;;  %1409 = vmatpush3.bf16.msra.mxu1 %v1509_v22 }
  0x60   :  { %1414 = vmatprep.subr.bf16.mxu0 %v1531_v0  ;;  %1434 = vmatprep.subr.bf16.mxu1 %v1531_v0 }
  0x62   :  { %1391 = vmatmul.mubr.bf16.vlgmr.msra.gmra.mrb[8].mxu0 %v570_v24  ;;  %1411 = vmatmul.mubr.bf16.vlgmr.msra.gmra.mrb[8].mxu1 %v1146_v25 }
  0x63   :  { %1415 = vmatpush3.bf16.msra.mxu0 %v1512_v26  ;;  %1435 = vmatpush3.bf16.msra.mxu1 %v1513_v27 }
  0x64   :  { %1416 = vmatprep.subr.bf16.mxu0 %v1531_v0  ;;  %1436 = vmatprep.subr.bf16.mxu1 %v1531_v0 }
  0x65   :  { %1430 = vmatprep.mubr.msk.bf16.mxu0 %vm1532_vm0, %v1531_v0  ;;  %1450 = vmatprep.mubr.msk.bf16.mxu1 %vm1532_vm0, %v1531_v0 }
  0x67   :  { %1417 = vmatpush3.bf16.msra.mxu0 %v1514_v28  ;;  %1437 = vmatpush3.bf16.msra.mxu1 %v1515_v29 }
  0x68   :  { %1418 = vmatprep.subr.bf16.mxu0 %v1531_v0  ;;  %1438 = vmatprep.subr.bf16.mxu1 %v1531_v0 }
  0x6b   :  { %1419 = vmatpush3.bf16.msra.mxu0 %v1516_v30  ;;  %1439 = vmatpush3.bf16.msra.mxu1 %v1517_v31 }
  0x6c   :  { %1420 = vmatprep.subr.bf16.mxu0 %v1531_v0  ;;  %1440 = vmatprep.subr.bf16.mxu1 %v1531_v0 }
  0x6f   :  { %1421 = vmatpush3.bf16.msra.mxu0 %v1518_v32  ;;  %1441 = vmatpush3.bf16.msra.mxu1 %v1519_v33 }
  0x70   :  { %1422 = vmatprep.subr.bf16.mxu0 %v1531_v0  ;;  %1442 = vmatprep.subr.bf16.mxu1 %v1531_v0 }
  0x73   :  { %1423 = vmatpush3.bf16.msra.mxu0 %v1520_v34  ;;  %1443 = vmatpush3.bf16.msra.mxu1 %v1521_v35 }
  0x74   :  { %1424 = vmatprep.subr.bf16.mxu0 %v1531_v0  ;;  %1444 = vmatprep.subr.bf16.mxu1 %v1531_v0 }
  0x77   :  { %1425 = vmatpush3.bf16.msra.mxu0 %v1522_v36  ;;  %1445 = vmatpush3.bf16.msra.mxu1 %v1523_v37 }
  0x78   :  { %1426 = vmatprep.subr.bf16.mxu0 %v1531_v0  ;;  %1446 = vmatprep.subr.bf16.mxu1 %v1531_v0 }
  0x7b   :  { %1427 = vmatpush3.bf16.msra.mxu0 %v1524_v38  ;;  %1447 = vmatpush3.bf16.msra.mxu1 %v1525_v39 }
  0x7c   :  { %1428 = vmatprep.subr.bf16.mxu0 %v1531_v0  ;;  %1448 = vmatprep.subr.bf16.mxu1 %v1531_v0 }
  0x7f   :  { %1429 = vmatpush3.bf16.msra.mxu0 %v1526_v41  ;;  %1449 = vmatpush3.bf16.msra.mxu1 %v1527_v42 }
  0x82   :  { %1431 = vmatmul.mubr.bf16.vlgmr.msra.gmra.mrb[12].mxu0 %v777_v43  ;;  %1451 = vmatmul.mubr.bf16.vlgmr.msra.gmra.mrb[12].mxu1 %v1765_v12 }
  0xf5   :  { %v146_v0 = vpop.f32.mrb[0].mxu0  ;;  %v239_v45 = vpop.f32.mrb[0].mxu1 }
  0xf6   :  { %v1312_v46 = vpop.f32.mrb[1].mxu0  ;;  %v240_v47 = vadd.f32 %v239_v45, %v146_v0  ;;  %v1332_v48 = vpop.f32.mrb[1].mxu1 }
  0xf7   :  { %v149_v49 = vpop.f32.mrb[2].mxu0  ;;  %v242_v50 = vpop.f32.mrb[2].mxu1 }
  0xf8   :  { %v1313_v51 = vpop.f32.mrb[3].mxu0  ;;  %v243_v52 = vadd.f32 %v242_v50, %v149_v49  ;;  %v1333_v53 = vpop.f32.mrb[3].mxu1 }
 0x115   :  { %v354_v54 = vpop.f32.mrb[4].mxu0  ;;  %v488_v56 = vpop.f32.mrb[4].mxu1 }
 0x116   :  { %v361_v55 = vadd.f32 %v354_v54, %v240_v47  ;;  %v1352_v57 = vpop.f32.mrb[5].mxu0  ;;  %v1372_v59 = vpop.f32.mrb[5].mxu1 }
 0x117   :  { %v357_v60 = vpop.f32.mrb[6].mxu0  ;;  %v491_v63 = vpop.f32.mrb[6].mxu1 }
 0x118   :  { %v495_v61 = vadd.f32 %v488_v56, %v361_v55  ;;  %v362_v62 = vadd.f32 %v357_v60, %v243_v52  ;;  %v1353_v1 = vpop.f32.mrb[7].mxu0  ;;  %v1373_v2 = vpop.f32.mrb[7].mxu1 }
 0x11a   :  { %v504_v3 = vadd.f32 %v1115_v58, %v495_v61  ;;  %v496_v4 = vadd.f32 %v491_v63, %v362_v62 }
 0x11c   :  { %v506_v5 = vmax.f32 %v504_v3, 0.0  ;;  %v505_v6 = vadd.f32 %v1115_v58, %v496_v4 }
 0x11e   :  { %v1218_v7 = vpack.c.bf16 %v506_v5, %v506_v5  ;;  %v507_v8 = vmax.f32 %v505_v6, 0.0 }
 0x120   :  { %517 = vst.msk [vmem:[%s1902_s3] sm:$0xf] %vm516_vm2, %v1218_v7  ;;  %v1219_v9 = vpack.c.bf16 %v507_v8, %v507_v8 }
 0x122   :  { %519 = vst.msk [vmem:[%s1902_s3 + $0x4] sm:$0x3] %vm518_vm4, %v1219_v9 }
 0x135   :  { %v654_v10 = vpop.f32.mrb[8].mxu0  ;;  %v747_v11 = vpop.f32.mrb[8].mxu1 }
 0x136   :  { %v1392_v12 = vpop.f32.mrb[9].mxu0  ;;  %v748_v13 = vadd.f32 %v747_v11, %v654_v10  ;;  %v1412_v14 = vpop.f32.mrb[9].mxu1 }
 0x137   :  { %v657_v15 = vpop.f32.mrb[10].mxu0  ;;  %v750_v16 = vpop.f32.mrb[10].mxu1 }
 0x138   :  { %v1393_v17 = vpop.f32.mrb[11].mxu0  ;;  %v751_v18 = vadd.f32 %v750_v16, %v657_v15  ;;  %v1413_v19 = vpop.f32.mrb[11].mxu1 }
 0x155   :  { %v861_v20 = vpop.f32.mrb[12].mxu0  ;;  %v993_v22 = vpop.f32.mrb[12].mxu1 }
 0x156   :  { %v868_v21 = vadd.f32 %v861_v20, %v748_v13  ;;  %v1432_v23 = vpop.f32.mrb[13].mxu0  ;;  %v1452_v24 = vpop.f32.mrb[13].mxu1 }
 0x157   :  { %v864_v25 = vpop.f32.mrb[14].mxu0  ;;  %v996_v28 = vpop.f32.mrb[14].mxu1 }
 0x158   :  { %v1000_v26 = vadd.f32 %v993_v22, %v868_v21  ;;  %v869_v27 = vadd.f32 %v864_v25, %v751_v18  ;;  %v1433_v29 = vpop.f32.mrb[15].mxu0  ;;  %v1453_v30 = vpop.f32.mrb[15].mxu1 }
 0x15a   :  { %v1009_v31 = vadd.f32 %v1115_v58, %v1000_v26  ;;  %v1001_v32 = vadd.f32 %v996_v28, %v869_v27 }
 0x15c   :  { %v1011_v33 = vmax.f32 %v1009_v31, 0.0  ;;  %v1010_v34 = vadd.f32 %v1115_v58, %v1001_v32 }
 0x15e   :  { %v1220_v35 = vpack.c.bf16 %v1011_v33, %v1011_v33  ;;  %v1012_v36 = vmax.f32 %v1010_v34, 0.0 }
 0x160   :  { %1214 = vst.msk [vmem:[%s1902_s3 + $0xc] sm:$0xf] %vm516_vm2, %v1220_v35  ;;  %v1221_v37 = vpack.c.bf16 %v1012_v36, %v1012_v36 }
 0x162   :  { %1215 = vst.msk [vmem:[%s1902_s3 + $0x10] sm:$0x3] %vm518_vm4, %v1221_v37 }

// kernel: _lambda_.7
= control target key start
LH: loop header
LB: loop body
LE: loop exit
PB: predicated region body
PF: predicated region fallthrough
CT: control target
= control target key end

     0   :  { %v170_v1 = vmov 0.0   ;;  %vm171_vm0 = vmmov 0   ;;  %s223_s0 = inlined_call_operand.vmem [shape: bf16[2,64], index: 0, kind: input, shape index: {}]   ;;  %s224_s1 = inlined_call_operand.vmem [shape: bf16[64,128], index: 1, kind: input, shape index: {}]   ;;  %s225_s2 = inlined_call_operand.vmem [shape: f32[1,128], index: 2, kind: input, shape index: {}]   ;;  %s226_s3 = inlined_call_operand.hbm [shape: f32[2,128], index: 3, kind: output, shape index: {}]  }
   0x1   :  { %v142_v0 = vld [vmem:[%s224_s1] sm:$0xff]   ;;  %127 = vmatprep.subr.bf16.mxu0 %v170_v1  ;;  %v143_v2 = vld [vmem:[%s224_s1 + $0x8] sm:$0xff]   ;;  %135 = vmatprep.mubr.msk.bf16.mxu0 %vm171_vm0, %v170_v1 }
   0x2   :  { %128 = vmatpush3.bf16.msra.mxu0 %v142_v0 }
   0x3   :  { %129 = vmatprep.subr.bf16.mxu0 %v170_v1 }
   0x4   :  { %8 = vsyncpa [#allocation3], 0  ;;  %v144_v3 = vld [vmem:[%s224_s1 + $0x10] sm:$0xff]   ;;  %v145_v4 = vld [vmem:[%s224_s1 + $0x18] sm:$0xff]   ;;  %vm56_vm1 = vcmask 523264   ;;  %s172_s24 = smov [#allocation2]  }
   0x5   :  { %v16_v5 = vld [vmem:[%s223_s0] sm:$0x1]  ;;  %s108_s25 = sshll.u32 %s172_s24, 4  ;;  %s109_s25 = int_to_ptr.vmem [resolvable:$true] %s108_s25 }
   0x6   :  { %130 = vmatpush3.bf16.msra.mxu0 %v143_v2  ;;  %v116_v6 = vld [vmem:[%s225_s2] ss:$0 sm:$0xff]  ;;  %s146_s1 = scalar_lea.vmem %s109_s25, 32  ;;  %p151_p1 = scmp.lt.s32.totalorder %s109_s25, %s109_s25 }
   0x7   :  { %131 = vmatprep.subr.bf16.mxu0 %v170_v1  ;;  %p147_p0 = scmp.ne.s32.totalorder %s109_s25, %s146_s1  ;;  %p152_p2 = scmp.lt.s32.totalorder %s146_s1, %s146_s1 }
   0x9   :  { %p153_p3 = por %p152_p2, %p151_p1 }
   0xa   :  { %132 = vmatpush3.bf16.msra.mxu0 %v144_v3 }
   0xb   :  { %133 = vmatprep.subr.bf16.mxu0 %v170_v1  ;;  %p154_p4 = pnand %p153_p3, %p147_p0 }
   0xe   :  { %134 = vmatpush3.bf16.msra.mxu0 %v145_v4 }
  0x11   :  { %136 = vmatmul.mubr.msk.bf16.vlgmr.msra.gmra.mrb[0].mxu0 %vm56_vm1, %v16_v5 }
  0xe4   :  { %v94_v7 = vpop.f32.mrb[0].mxu0 }
  0xe5   :  { %v95_v8 = vadd.f32 %v116_v6, %v94_v7  ;;  %v137_v9 = vpop.f32.mrb[1].mxu0 }
  0xe6   :  { %v97_v10 = vpop.f32.mrb[2].mxu0 }
  0xe7   :  { %v100_v11 = vmax.f32 %v95_v8, 0.0  ;;  %v138_v12 = vpop.f32.mrb[3].mxu0 }
  0xe9   :  { %101 = vst [vmem:[#allocation2] sm:$0x3] %v100_v11 }
  0xea   :  { %157 = shalt.err (!%p154_p4)
}
  0xeb   :  { %s158_s2 = scalar_lea.hbm %s226_s3, 32 }
  0xec   :  { %p159_p5 = scmp.ne.s32.totalorder %s226_s3, %s158_s2  ;;  %p162_p6 = scmp.lt.u32.totalorder %s158_s2, %s226_s3 }
  0xee   :  { %p164_p7 = pnand %p162_p6, %p159_p5 }
  0xf0   :  { %167 = shalt.err (!%p164_p7)
}
  0xf1   :  { %111 = dma.vmem_to_hbm [thread:$0]  %s109_s25, 32, %s226_s3, [#allocation3]  }
  0xf2   :  { %168 = dma.done.wait [#allocation3], 32  }
  0xf3   :  { %169 = vsyncadd [#allocation3], 4294967264 }
  0xf4   :  { %115 = vsyncpa [#allocation3], 1 }

// kernel: _lambda_.6
= control target key start
LH: loop header
LB: loop body
LE: loop exit
PB: predicated region body
PF: predicated region fallthrough
CT: control target
= control target key end

     0   :  { %v2183_v0 = vmov 0.0   ;;  %vm2184_vm0 = vmmov 0   ;;  %vm68_vm1 = vcmask 523264   ;;  %vm777_vm2 = vcmask 519170   ;;  %s2631_s1 = inlined_call_operand.vmem [shape: bf16[9,64,64], index: 1, kind: input, shape index: {}]   ;;  %s2632_s0 = inlined_call_operand.vmem [shape: bf16[2,24,64], index: 0, kind: input, shape index: {}]   ;;  %s2633_s3 = inlined_call_operand.vmem [shape: bf16[2,16,64], index: 3, kind: output, shape index: {}]   ;;  %s2634_s2 = inlined_call_operand.vmem [shape: f32[1,64], index: 2, kind: input, shape index: {}]  }
   0x1   :  { %1878 = vmatprep.subr.bf16.mxu0 %v2183_v0  ;;  %1890 = vmatprep.subr.bf16.mxu1 %v2183_v0  ;;  %v2097_v1 = vld [vmem:[%s2631_s1 + $0x20] sm:$0xff]   ;;  %v2099_v3 = vld [vmem:[%s2631_s1 + $0x28] sm:$0xff]   ;;  %v2101_v5 = vld [vmem:[%s2631_s1 + $0x30] sm:$0xff]   ;;  %vm779_vm3 = vcmask 519168   ;;  %vm775_vm4 = vcmask 517120  }
   0x2   :  { %v2098_v2 = vld [vmem:[%s2631_s1] sm:$0xff]   ;;  %1886 = vmatprep.mubr.msk.bf16.mxu0 %vm2184_vm0, %v2183_v0  ;;  %1898 = vmatprep.mubr.msk.bf16.mxu1 %vm2184_vm0, %v2183_v0  ;;  %v2100_v4 = vld [vmem:[%s2631_s1 + $0x8] sm:$0xff]   ;;  %v2102_v6 = vld [vmem:[%s2631_s1 + $0x10] sm:$0xff]  }
   0x3   :  { %1879 = vmatpush3.bf16.msra.mxu0 %v2097_v1  ;;  %1891 = vmatpush3.bf16.msra.mxu1 %v2098_v2  ;;  %v2105_v7 = vld [vmem:[%s2632_s0] ss:$0 sps:$4 sm:$0x77]   ;;  %v2103_v8 = vld [vmem:[%s2631_s1 + $0x38] sm:$0xff]   ;;  %v2108_v17 = vld [vmem:[%s2631_s1 + $0x48] sm:$0xff]  }
   0x4   :  { %1880 = vmatprep.subr.bf16.mxu0 %v2183_v0  ;;  %1892 = vmatprep.subr.bf16.mxu1 %v2183_v0  ;;  %v38_v9 = vshrl.u32 %v2105_v7, 16  ;;  %v40_v10 = vshll.u32 %v2105_v7, 16  ;;  %v2104_v11 = vld [vmem:[%s2631_s1 + $0x18] sm:$0xff]   ;;  %v2106_v13 = vld [vmem:[%s2631_s1 + $0x40] sm:$0xff]   ;;  %v2109_v18 = vld [vmem:[%s2631_s1 + $0x68] sm:$0xff]  }
   0x5   :  { %v15_v15 = vld [vmem:[%s2632_s0] sm:$0x3]  ;;  %v2110_v19 = vld [vmem:[%s2631_s1 + $0x50] sm:$0xff]   ;;  %v2112_v23 = vld [vmem:[%s2631_s1 + $0x58] sm:$0xff]  }
   0x6   :  { %v42_v12 = vrot.slane %v40_v10, 1  ;;  %v2107_v16 = vld [vmem:[%s2631_s1 + $0x60] sm:$0xff]   ;;  %v2111_v20 = vld [vmem:[%s2631_s1 + $0x70] sm:$0xff]   ;;  %v2113_v24 = vld [vmem:[%s2631_s1 + $0x78] sm:$0xff]  }
   0x7   :  { %1881 = vmatpush3.bf16.msra.mxu0 %v2099_v3  ;;  %1893 = vmatpush3.bf16.msra.mxu1 %v2100_v4  ;;  %v2114_v21 = vld [vmem:[%s2632_s0] ss:$0 sps:$4 sm:$0x66]   ;;  %v343_v28 = vld [vmem:[%s2632_s0] sm:$0xc]  ;;  %v2118_v32 = vld [vmem:[%s2631_s1 + $0x88] sm:$0xff]  }
   0x8   :  { %1882 = vmatprep.subr.bf16.mxu0 %v2183_v0  ;;  %1894 = vmatprep.subr.bf16.mxu1 %v2183_v0  ;;  %v43_v14 = vor.u32 %v42_v12, %v38_v9  ;;  %v2115_v22 = vld [vmem:[%s2632_s0] ss:$0 sps:$4 sm:$0xcc]   ;;  %v192_v26 = vrot.slane %v2114_v21, 1  ;;  %v344_v29 = vld [vmem:[%s2632_s0 + $0x4] sm:$0x1] }
   0x9   :  { %v2116_v25 = vld [vmem:[%s2631_s1 + $0x80] sm:$0xff]   ;;  %v274_v27 = vrot.slane %v2115_v22, 2  ;;  %v1596_v31 = vcombine.low %v343_v28, %v344_v29  ;;  %v2119_v33 = vld [vmem:[%s2631_s1 + $0xa8] sm:$0xff]   ;;  %v2120_v34 = vld [vmem:[%s2631_s1 + $0x90] sm:$0xff]  }
   0xa   :  { %v2117_v30 = vld [vmem:[%s2631_s1 + $0xa0] sm:$0xff]   ;;  %v2121_v37 = vld [vmem:[%s2631_s1 + $0xb0] sm:$0xff]   ;;  %v2122_v41 = vld [vmem:[%s2631_s1 + $0x98] sm:$0xff]  }
   0xb   :  { %1883 = vmatpush3.bf16.msra.mxu0 %v2101_v5  ;;  %1895 = vmatpush3.bf16.msra.mxu1 %v2102_v6  ;;  %v360_v35 = vshrl.u32 %v1596_v31, 16  ;;  %v363_v36 = vshll.u32 %v1596_v31, 16  ;;  %v435_v38 = vld [vmem:[%s2632_s0] sm:$0x8]  ;;  %v2123_v43 = vld [vmem:[%s2631_s1 + $0xb8] sm:$0xff]   ;;  %v2128_v49 = vld [vmem:[%s2631_s1 + $0xc8] sm:$0xff]  }
   0xc   :  { %1884 = vmatprep.subr.bf16.mxu0 %v2183_v0  ;;  %1896 = vmatprep.subr.bf16.mxu1 %v2183_v0  ;;  %v1610_v42 = vcombine.low %v435_v38, %v344_v29  ;;  %v2126_v46 = vld [vmem:[%s2631_s1 + $0xc0] sm:$0xff]   ;;  %v2129_v50 = vld [vmem:[%s2631_s1 + $0xe8] sm:$0xff]   ;;  %v2130_v51 = vld [vmem:[%s2631_s1 + $0xd0] sm:$0xff]  }
   0xd   :  { %v362_v39 = vrot.slane %v360_v35, 2  ;;  %v365_v40 = vrot.slane %v363_v36, 3  ;;  %v2127_v47 = vld [vmem:[%s2631_s1 + $0xe0] sm:$0xff]   ;;  %v2131_v53 = vld [vmem:[%s2631_s1 + $0xf0] sm:$0xff]   ;;  %v2132_v54 = vld [vmem:[%s2631_s1 + $0xd8] sm:$0xff]  }
   0xe   :  { %v448_v45 = vrot.slane %v1610_v42, 3  ;;  %v2134_v48 = vld [vmem:[%s2632_s0 + $0x4] ss:$0 sps:$4 sm:$0x77]   ;;  %v2133_v57 = vld [vmem:[%s2631_s1 + $0xf8] sm:$0xff]   ;;  %v2137_v62 = vld [vmem:[%s2631_s1 + $0x108] sm:$0xff]  }
   0xf   :  { %1885 = vmatpush3.bf16.msra.mxu0 %v2103_v8  ;;  %1897 = vmatpush3.bf16.msra.mxu1 %v2104_v11  ;;  %v366_v44 = vor.u32 %v365_v40, %v362_v39  ;;  %v611_v52 = vshll.u32 %v2134_v48, 16  ;;  %v609_v55 = vshrl.u32 %v2134_v48, 16  ;;  %v517_v58 = vld [vmem:[%s2632_s0 + $0x4] sm:$0x3]  ;;  %v2138_v1 = vld [vmem:[%s2631_s1 + $0x28] sm:$0xff]   ;;  %v2139_v2 = vld [vmem:[%s2631_s1 + $0x110] sm:$0xff]  }
  0x10   :  { %1902 = vmatprep.subr.bf16.mxu0 %v2183_v0  ;;  %1914 = vmatprep.subr.bf16.mxu1 %v2183_v0  ;;  %v2135_v60 = vld [vmem:[%s2631_s1 + $0x100] sm:$0xff]   ;;  %v2144_v63 = vld [vmem:[%s2632_s0 + $0xc] ss:$0 sps:$4 sm:$0x77]   ;;  %v2140_v3 = vld [vmem:[%s2631_s1 + $0x30] sm:$0xff]  }
  0x11   :  { %v613_v56 = vrot.slane %v611_v52, 1  ;;  %v2136_v61 = vld [vmem:[%s2631_s1 + $0x20] sm:$0xff]   ;;  %v806_v4 = vshll.u32 %v2144_v63, 16  ;;  %v2141_v5 = vld [vmem:[%s2631_s1 + $0x118] sm:$0xff]   ;;  %v804_v7 = vshrl.u32 %v2144_v63, 16  ;;  %v2157_v29 = vld [vmem:[%s2631_s1 + $0x88] sm:$0xff]  }
  0x12   :  { %1887 = vmatmul.mubr.msk.bf16.vlgmr.msra.gmra.mrb[0].mxu0 %vm68_vm1, %v43_v14  ;;  %1899 = vmatmul.mubr.msk.bf16.vlgmr.msra.gmra.mrb[0].mxu1 %vm68_vm1, %v15_v15  ;;  %v2143_v6 = vld [vmem:[%s2632_s0 + $0x4] ss:$0 sps:$4 sm:$0x66]   ;;  %v2142_v9 = vld [vmem:[%s2631_s1 + $0x38] sm:$0xff]   ;;  %v2147_v14 = vld [vmem:[%s2631_s1 + $0x8] sm:$0xff]  }
  0x13   :  { %1903 = vmatpush3.bf16.msra.mxu0 %v2106_v13  ;;  %1915 = vmatpush3.bf16.msra.mxu1 %v2107_v16  ;;  %v614_v59 = vor.u32 %v613_v56, %v609_v55  ;;  %v808_v8 = vrot.slane %v806_v4, 1  ;;  %v696_v10 = vrot.slane %v2143_v6, 1  ;;  %v2145_v12 = vld [vmem:[%s2631_s1] sm:$0xff]   ;;  %v2148_v15 = vld [vmem:[%s2631_s1 + $0x48] sm:$0xff]   ;;  %v2149_v16 = vld [vmem:[%s2631_s1 + $0x10] sm:$0xff]  }
  0x14   :  { %1904 = vmatprep.subr.bf16.mxu0 %v2183_v0  ;;  %1916 = vmatprep.subr.bf16.mxu1 %v2183_v0  ;;  %v2146_v13 = vld [vmem:[%s2631_s1 + $0x40] sm:$0xff]   ;;  %v1658_v21 = vld [vmem:[%s2632_s0 + $0xc] sm:$0x3]  ;;  %v2160_v35 = vld [vmem:[%s2631_s1 + $0x78] sm:$0xff]  }
  0x15   :  { %1910 = vmatprep.mubr.msk.bf16.mxu0 %vm2184_vm0, %v2183_v0  ;;  %1922 = vmatprep.mubr.msk.bf16.mxu1 %vm2184_vm0, %v2183_v0  ;;  %v809_v11 = vor.u32 %v808_v8, %v804_v7  ;;  %v2161_v38 = vld [vmem:[%s2631_s1 + $0x98] sm:$0xff]   ;;  %v2165_v42 = vld [vmem:[%s2631_s1 + $0xc0] sm:$0xff]   ;;  %v2181_v55 = vld [vmem:[%s2632_s0 + $0x10] ss:$0 sps:$4 sm:$0x77]  }
  0x16   :  { %v2173_v52 = vld [vmem:[%s2631_s1 + $0xe0] sm:$0xff]   ;;  %v2175_v56 = vld [vmem:[%s2631_s1 + $0xe8] sm:$0xff]   ;;  %v2179_v63 = vld [vmem:[%s2631_s1 + $0xf8] sm:$0xff]  }
  0x17   :  { %1905 = vmatpush3.bf16.msra.mxu0 %v2108_v17  ;;  %1917 = vmatpush3.bf16.msra.mxu1 %v2109_v18  ;;  %v2150_v17 = vld [vmem:[%s2631_s1 + $0x50] sm:$0xff]   ;;  %v2151_v18 = vld [vmem:[%s2631_s1 + $0x18] sm:$0xff]  }
  0x18   :  { %1906 = vmatprep.subr.bf16.mxu0 %v2183_v0  ;;  %1918 = vmatprep.subr.bf16.mxu1 %v2183_v0 }
  0x1b   :  { %1907 = vmatpush3.bf16.msra.mxu0 %v2110_v19  ;;  %1919 = vmatpush3.bf16.msra.mxu1 %v2111_v20  ;;  %v2153_v19 = vld [vmem:[%s2632_s0 + $0xc] ss:$0 sps:$4 sm:$0x66]   ;;  %v2152_v20 = vld [vmem:[%s2631_s1 + $0x58] sm:$0xff]  }
  0x1c   :  { %1908 = vmatprep.subr.bf16.mxu0 %v2183_v0  ;;  %1920 = vmatprep.subr.bf16.mxu1 %v2183_v0  ;;  %v956_v22 = vrot.slane %v2153_v19, 1 }
  0x1f   :  { %1909 = vmatpush3.bf16.msra.mxu0 %v2112_v23  ;;  %1921 = vmatpush3.bf16.msra.mxu1 %v2113_v24  ;;  %v2154_v23 = vld [vmem:[%s2631_s1 + $0x60] sm:$0xff]  }
  0x20   :  { %1926 = vmatprep.subr.bf16.mxu0 %v2183_v0  ;;  %1938 = vmatprep.subr.bf16.mxu1 %v2183_v0  ;;  %v2155_v24 = vld [vmem:[%s2631_s1 + $0x80] sm:$0xff]  }
  0x22   :  { %1911 = vmatmul.mubr.msk.bf16.vlgmr.msra.gmra.mrb[4].mxu0 %vm68_vm1, %v192_v26  ;;  %1923 = vmatmul.mubr.msk.bf16.vlgmr.msra.gmra.mrb[4].mxu1 %vm68_vm1, %v274_v27  ;;  %v1710_v26 = vld [vmem:[%s2632_s0 + $0x10] sm:$0x1]  ;;  %v2156_v27 = vld [vmem:[%s2631_s1 + $0x68] sm:$0xff]  }
  0x23   :  { %1927 = vmatpush3.bf16.msra.mxu0 %v2116_v25  ;;  %1939 = vmatpush3.bf16.msra.mxu1 %v2117_v30  ;;  %v1709_v25 = vld [vmem:[%s2632_s0 + $0xc] sm:$0xc]  ;;  %v2158_v30 = vld [vmem:[%s2631_s1 + $0x70] sm:$0xff]  }
  0x24   :  { %1928 = vmatprep.subr.bf16.mxu0 %v2183_v0  ;;  %1940 = vmatprep.subr.bf16.mxu1 %v2183_v0  ;;  %v1719_v28 = vcombine.low %v1709_v25, %v1710_v26 }
  0x25   :  { %1934 = vmatprep.mubr.msk.bf16.mxu0 %vm2184_vm0, %v2183_v0  ;;  %1946 = vmatprep.mubr.msk.bf16.mxu1 %vm2184_vm0, %v2183_v0 }
  0x26   :  { %v1122_v31 = vshrl.u32 %v1719_v28, 16 }
  0x27   :  { %1929 = vmatpush3.bf16.msra.mxu0 %v2118_v32  ;;  %1941 = vmatpush3.bf16.msra.mxu1 %v2119_v33  ;;  %v1125_v32 = vshll.u32 %v1719_v28, 16  ;;  %v2159_v33 = vld [vmem:[%s2631_s1 + $0x90] sm:$0xff]  }
  0x28   :  { %1930 = vmatprep.subr.bf16.mxu0 %v2183_v0  ;;  %1942 = vmatprep.subr.bf16.mxu1 %v2183_v0  ;;  %v1124_v36 = vrot.slane %v1122_v31, 2 }
  0x2b   :  { %1931 = vmatpush3.bf16.msra.mxu0 %v2120_v34  ;;  %1943 = vmatpush3.bf16.msra.mxu1 %v2121_v37  ;;  %v2162_v34 = vld [vmem:[%s2632_s0 + $0xc] ss:$0 sps:$4 sm:$0xcc]   ;;  %v1127_v37 = vrot.slane %v1125_v32, 3 }
  0x2c   :  { %1932 = vmatprep.subr.bf16.mxu0 %v2183_v0  ;;  %1944 = vmatprep.subr.bf16.mxu1 %v2183_v0  ;;  %v1037_v39 = vrot.slane %v2162_v34, 2 }
  0x2d   :  { %v1128_v40 = vor.u32 %v1127_v37, %v1124_v36 }
  0x2f   :  { %1933 = vmatpush3.bf16.msra.mxu0 %v2122_v41  ;;  %1945 = vmatpush3.bf16.msra.mxu1 %v2123_v43  ;;  %v2164_v41 = vld [vmem:[%s2631_s1 + $0xa0] sm:$0xff]   ;;  %v2166_v43 = vld [vmem:[%s2631_s1 + $0xa8] sm:$0xff]  }
  0x30   :  { %1950 = vmatprep.subr.bf16.mxu0 %v2183_v0  ;;  %1962 = vmatprep.subr.bf16.mxu1 %v2183_v0 }
  0x32   :  { %1935 = vmatmul.mubr.msk.bf16.vlgmr.msra.gmra.mrb[8].mxu0 %vm68_vm1, %v366_v44  ;;  %1947 = vmatmul.mubr.msk.bf16.vlgmr.msra.gmra.mrb[8].mxu1 %vm68_vm1, %v448_v45  ;;  %v2167_v44 = vld [vmem:[%s2631_s1 + $0xc8] sm:$0xff]   ;;  %v2168_v45 = vld [vmem:[%s2631_s1 + $0xb0] sm:$0xff]  }
  0x33   :  { %1951 = vmatpush3.bf16.msra.mxu0 %v2126_v46  ;;  %1963 = vmatpush3.bf16.msra.mxu1 %v2127_v47  ;;  %v1725_v46 = vld [vmem:[%s2632_s0 + $0xc] sm:$0x8]  ;;  %v2169_v47 = vld [vmem:[%s2631_s1 + $0xd0] sm:$0xff]  }
  0x34   :  { %1952 = vmatprep.subr.bf16.mxu0 %v2183_v0  ;;  %1964 = vmatprep.subr.bf16.mxu1 %v2183_v0  ;;  %v1734_v48 = vcombine.low %v1725_v46, %v1710_v26 }
  0x35   :  { %1958 = vmatprep.mubr.msk.bf16.mxu0 %vm2184_vm0, %v2183_v0  ;;  %1970 = vmatprep.mubr.msk.bf16.mxu1 %vm2184_vm0, %v2183_v0 }
  0x37   :  { %1953 = vmatpush3.bf16.msra.mxu0 %v2128_v49  ;;  %1965 = vmatpush3.bf16.msra.mxu1 %v2129_v50  ;;  %v2170_v49 = vld [vmem:[%s2631_s1 + $0xb8] sm:$0xff]  }
  0x38   :  { %1954 = vmatprep.subr.bf16.mxu0 %v2183_v0  ;;  %1966 = vmatprep.subr.bf16.mxu1 %v2183_v0  ;;  %v2171_v50 = vld [vmem:[%s2631_s1 + $0xd8] sm:$0xff]  }
  0x3b   :  { %1955 = vmatpush3.bf16.msra.mxu0 %v2130_v51  ;;  %1967 = vmatpush3.bf16.msra.mxu1 %v2131_v53  ;;  %v1209_v51 = vrot.slane %v1734_v48, 3  ;;  %v1740_v53 = vld [vmem:[%s2632_s0 + $0x10] sm:$0x3] }
  0x3c   :  { %1956 = vmatprep.subr.bf16.mxu0 %v2183_v0  ;;  %1968 = vmatprep.subr.bf16.mxu1 %v2183_v0 }
  0x3f   :  { %1957 = vmatpush3.bf16.msra.mxu0 %v2132_v54  ;;  %1969 = vmatpush3.bf16.msra.mxu1 %v2133_v57  ;;  %v2174_v54 = vld [vmem:[%s2631_s1 + $0x100] sm:$0xff]   ;;  %v2176_v57 = vld [vmem:[%s2631_s1 + $0x108] sm:$0xff]  }
  0x40   :  { %1974 = vmatprep.subr.bf16.mxu0 %v2183_v0  ;;  %1986 = vmatprep.subr.bf16.mxu1 %v2183_v0 }
  0x42   :  { %1959 = vmatmul.mubr.msk.bf16.vlgmr.msra.gmra.mrb[12].mxu0 %vm68_vm1, %v517_v58  ;;  %1971 = vmatmul.mubr.msk.bf16.vlgmr.msra.gmra.mrb[12].mxu1 %vm68_vm1, %v614_v59  ;;  %v1370_v58 = vshll.u32 %v2181_v55, 16  ;;  %v2177_v59 = vld [vmem:[%s2631_s1 + $0xf0] sm:$0xff]  }
  0x43   :  { %1975 = vmatpush3.bf16.msra.mxu0 %v2135_v60  ;;  %1987 = vmatpush3.bf16.msra.mxu1 %v2136_v61  ;;  %v2178_v60 = vld [vmem:[%s2631_s1 + $0x110] sm:$0xff]   ;;  %v1368_v61 = vshrl.u32 %v2181_v55, 16 }
  0x44   :  { %1976 = vmatprep.subr.bf16.mxu0 %v2183_v0  ;;  %1988 = vmatprep.subr.bf16.mxu1 %v2183_v0 }
  0x45   :  { %1982 = vmatprep.mubr.msk.bf16.mxu0 %vm2184_vm0, %v2183_v0  ;;  %1994 = vmatprep.mubr.msk.bf16.mxu1 %vm2184_vm0, %v2183_v0 }
  0x47   :  { %1977 = vmatpush3.bf16.msra.mxu0 %v2137_v62  ;;  %1989 = vmatpush3.bf16.msra.mxu1 %v2138_v1  ;;  %v1372_v62 = vrot.slane %v1370_v58, 1  ;;  %v2182_v1 = vld [vmem:[%s2632_s0 + $0x10] ss:$0 sps:$4 sm:$0x66]  }
  0x48   :  { %1978 = vmatprep.subr.bf16.mxu0 %v2183_v0  ;;  %1990 = vmatprep.subr.bf16.mxu1 %v2183_v0  ;;  %v1454_v4 = vrot.slane %v2182_v1, 1 }
  0x4b   :  { %1979 = vmatpush3.bf16.msra.mxu0 %v2139_v2  ;;  %1991 = vmatpush3.bf16.msra.mxu1 %v2140_v3  ;;  %v2180_v2 = vld [vmem:[%s2631_s1 + $0x118] sm:$0xff]   ;;  %v1373_v3 = vor.u32 %v1372_v62, %v1368_v61 }
  0x4c   :  { %1980 = vmatprep.subr.bf16.mxu0 %v2183_v0  ;;  %1992 = vmatprep.subr.bf16.mxu1 %v2183_v0 }
  0x4f   :  { %1981 = vmatpush3.bf16.msra.mxu0 %v2141_v5  ;;  %1993 = vmatpush3.bf16.msra.mxu1 %v2142_v9  ;;  %v2185_v5 = vmov 0  }
  0x50   :  { %1998 = vmatprep.subr.bf16.mxu0 %v2183_v0  ;;  %2010 = vmatprep.subr.bf16.mxu1 %v2183_v0  ;;  %778 = vst.msk [vmem:[%s2633_s3] sm:$0xc] %vm777_vm2, %v2185_v5  ;;  %1786 = vst.msk [vmem:[%s2633_s3 + $0x8] sm:$0xc] %vm777_vm2, %v2185_v5 }
  0x51   :  { %780 = vst.msk [vmem:[%s2633_s3 + $0x4] sm:$0xf] %vm779_vm3, %v2185_v5  ;;  %1787 = vst.msk [vmem:[%s2633_s3 + $0xc] sm:$0xf] %vm779_vm3, %v2185_v5 }
  0x52   :  { %1983 = vmatmul.mubr.msk.bf16.vlgmr.msra.gmra.mrb[16].mxu0 %vm68_vm1, %v696_v10  ;;  %1995 = vmatmul.mubr.msk.bf16.vlgmr.msra.gmra.mrb[16].mxu1 %vm68_vm1, %v809_v11 }
  0x53   :  { %1999 = vmatpush3.bf16.msra.mxu0 %v2145_v12  ;;  %2011 = vmatpush3.bf16.msra.mxu1 %v2146_v13 }
  0x54   :  { %2000 = vmatprep.subr.bf16.mxu0 %v2183_v0  ;;  %2012 = vmatprep.subr.bf16.mxu1 %v2183_v0 }
  0x55   :  { %2006 = vmatprep.mubr.msk.bf16.mxu0 %vm2184_vm0, %v2183_v0  ;;  %2018 = vmatprep.mubr.msk.bf16.mxu1 %vm2184_vm0, %v2183_v0 }
  0x57   :  { %2001 = vmatpush3.bf16.msra.mxu0 %v2147_v14  ;;  %2013 = vmatpush3.bf16.msra.mxu1 %v2148_v15 }
  0x58   :  { %2002 = vmatprep.subr.bf16.mxu0 %v2183_v0  ;;  %2014 = vmatprep.subr.bf16.mxu1 %v2183_v0 }
  0x5b   :  { %2003 = vmatpush3.bf16.msra.mxu0 %v2149_v16  ;;  %2015 = vmatpush3.bf16.msra.mxu1 %v2150_v17 }
  0x5c   :  { %2004 = vmatprep.subr.bf16.mxu0 %v2183_v0  ;;  %2016 = vmatprep.subr.bf16.mxu1 %v2183_v0 }
  0x5f   :  { %2005 = vmatpush3.bf16.msra.mxu0 %v2151_v18  ;;  %2017 = vmatpush3.bf16.msra.mxu1 %v2152_v20 }
  0x60   :  { %2022 = vmatprep.subr.bf16.mxu0 %v2183_v0  ;;  %2034 = vmatprep.subr.bf16.mxu1 %v2183_v0 }
  0x62   :  { %2007 = vmatmul.mubr.msk.bf16.vlgmr.msra.gmra.mrb[20].mxu0 %vm68_vm1, %v1658_v21  ;;  %2019 = vmatmul.mubr.msk.bf16.vlgmr.msra.gmra.mrb[20].mxu1 %vm68_vm1, %v956_v22 }
  0x63   :  { %2023 = vmatpush3.bf16.msra.mxu0 %v2154_v23  ;;  %2035 = vmatpush3.bf16.msra.mxu1 %v2155_v24 }
  0x64   :  { %2024 = vmatprep.subr.bf16.mxu0 %v2183_v0  ;;  %2036 = vmatprep.subr.bf16.mxu1 %v2183_v0 }
  0x65   :  { %2030 = vmatprep.mubr.msk.bf16.mxu0 %vm2184_vm0, %v2183_v0  ;;  %2042 = vmatprep.mubr.msk.bf16.mxu1 %vm2184_vm0, %v2183_v0 }
  0x67   :  { %2025 = vmatpush3.bf16.msra.mxu0 %v2156_v27  ;;  %2037 = vmatpush3.bf16.msra.mxu1 %v2157_v29 }
  0x68   :  { %2026 = vmatprep.subr.bf16.mxu0 %v2183_v0  ;;  %2038 = vmatprep.subr.bf16.mxu1 %v2183_v0 }
  0x6b   :  { %2027 = vmatpush3.bf16.msra.mxu0 %v2158_v30  ;;  %2039 = vmatpush3.bf16.msra.mxu1 %v2159_v33 }
  0x6c   :  { %2028 = vmatprep.subr.bf16.mxu0 %v2183_v0  ;;  %2040 = vmatprep.subr.bf16.mxu1 %v2183_v0 }
  0x6f   :  { %2029 = vmatpush3.bf16.msra.mxu0 %v2160_v35  ;;  %2041 = vmatpush3.bf16.msra.mxu1 %v2161_v38 }
  0x70   :  { %2046 = vmatprep.subr.bf16.mxu0 %v2183_v0  ;;  %2058 = vmatprep.subr.bf16.mxu1 %v2183_v0 }
  0x72   :  { %2031 = vmatmul.mubr.msk.bf16.vlgmr.msra.gmra.mrb[24].mxu0 %vm68_vm1, %v1037_v39  ;;  %2043 = vmatmul.mubr.msk.bf16.vlgmr.msra.gmra.mrb[24].mxu1 %vm68_vm1, %v1128_v40 }
  0x73   :  { %2047 = vmatpush3.bf16.msra.mxu0 %v2164_v41  ;;  %2059 = vmatpush3.bf16.msra.mxu1 %v2165_v42 }
  0x74   :  { %2048 = vmatprep.subr.bf16.mxu0 %v2183_v0  ;;  %2060 = vmatprep.subr.bf16.mxu1 %v2183_v0 }
  0x75   :  { %2054 = vmatprep.mubr.msk.bf16.mxu0 %vm2184_vm0, %v2183_v0  ;;  %2066 = vmatprep.mubr.msk.bf16.mxu1 %vm2184_vm0, %v2183_v0 }
  0x77   :  { %2049 = vmatpush3.bf16.msra.mxu0 %v2166_v43  ;;  %2061 = vmatpush3.bf16.msra.mxu1 %v2167_v44 }
  0x78   :  { %2050 = vmatprep.subr.bf16.mxu0 %v2183_v0  ;;  %2062 = vmatprep.subr.bf16.mxu1 %v2183_v0 }
  0x7b   :  { %2051 = vmatpush3.bf16.msra.mxu0 %v2168_v45  ;;  %2063 = vmatpush3.bf16.msra.mxu1 %v2169_v47  ;;  %v1657_v45 = vld [vmem:[%s2634_s2] ss:$0 sm:$0xff] }
  0x7c   :  { %2052 = vmatprep.subr.bf16.mxu0 %v2183_v0  ;;  %2064 = vmatprep.subr.bf16.mxu1 %v2183_v0 }
  0x7f   :  { %2053 = vmatpush3.bf16.msra.mxu0 %v2170_v49  ;;  %2065 = vmatpush3.bf16.msra.mxu1 %v2171_v50 }
  0x80   :  { %2070 = vmatprep.subr.bf16.mxu0 %v2183_v0  ;;  %2082 = vmatprep.subr.bf16.mxu1 %v2183_v0 }
  0x82   :  { %2055 = vmatmul.mubr.msk.bf16.vlgmr.msra.gmra.mrb[28].mxu0 %vm68_vm1, %v1209_v51  ;;  %2067 = vmatmul.mubr.msk.bf16.vlgmr.msra.gmra.mrb[28].mxu1 %vm68_vm1, %v1740_v53 }
  0x83   :  { %2071 = vmatpush3.bf16.msra.mxu0 %v2173_v52  ;;  %2083 = vmatpush3.bf16.msra.mxu1 %v2174_v54 }
  0x84   :  { %2072 = vmatprep.subr.bf16.mxu0 %v2183_v0  ;;  %2084 = vmatprep.subr.bf16.mxu1 %v2183_v0 }
  0x85   :  { %2078 = vmatprep.mubr.msk.bf16.mxu0 %vm2184_vm0, %v2183_v0  ;;  %2090 = vmatprep.mubr.msk.bf16.mxu1 %vm2184_vm0, %v2183_v0 }
  0x87   :  { %2073 = vmatpush3.bf16.msra.mxu0 %v2175_v56  ;;  %2085 = vmatpush3.bf16.msra.mxu1 %v2176_v57 }
  0x88   :  { %2074 = vmatprep.subr.bf16.mxu0 %v2183_v0  ;;  %2086 = vmatprep.subr.bf16.mxu1 %v2183_v0 }
  0x8b   :  { %2075 = vmatpush3.bf16.msra.mxu0 %v2177_v59  ;;  %2087 = vmatpush3.bf16.msra.mxu1 %v2178_v60 }
  0x8c   :  { %2076 = vmatprep.subr.bf16.mxu0 %v2183_v0  ;;  %2088 = vmatprep.subr.bf16.mxu1 %v2183_v0 }
  0x8f   :  { %2077 = vmatpush3.bf16.msra.mxu0 %v2179_v63  ;;  %2089 = vmatpush3.bf16.msra.mxu1 %v2180_v2 }
  0x92   :  { %2079 = vmatmul.mubr.msk.bf16.vlgmr.msra.gmra.mrb[32].mxu0 %vm68_vm1, %v1373_v3  ;;  %2091 = vmatmul.mubr.msk.bf16.vlgmr.msra.gmra.mrb[32].mxu1 %vm68_vm1, %v1454_v4 }
  0xe5   :  { %v106_v0 = vpop.f32.mrb[0].mxu0  ;;  %v173_v6 = vpop.f32.mrb[0].mxu1 }
  0xe6   :  { %v1888_v7 = vpop.f32.mrb[1].mxu0  ;;  %v174_v8 = vadd.f32 %v173_v6, %v106_v0  ;;  %v1900_v9 = vpop.f32.mrb[1].mxu1 }
  0xe7   :  { %v109_v10 = vpop.f32.mrb[2].mxu0  ;;  %v176_v11 = vpop.f32.mrb[2].mxu1 }
  0xe8   :  { %v1889_v12 = vpop.f32.mrb[3].mxu0  ;;  %v1901_v13 = vpop.f32.mrb[3].mxu1 }
  0xf5   :  { %v254_v14 = vpop.f32.mrb[4].mxu0  ;;  %v336_v16 = vpop.f32.mrb[4].mxu1 }
  0xf6   :  { %v260_v15 = vadd.f32 %v254_v14, %v174_v8  ;;  %v1912_v17 = vpop.f32.mrb[5].mxu0  ;;  %v1924_v18 = vpop.f32.mrb[5].mxu1 }
  0xf7   :  { %v257_v19 = vpop.f32.mrb[6].mxu0  ;;  %v339_v21 = vpop.f32.mrb[6].mxu1 }
  0xf8   :  { %v342_v20 = vadd.f32 %v336_v16, %v260_v15  ;;  %v1913_v22 = vpop.f32.mrb[7].mxu0  ;;  %v1925_v23 = vpop.f32.mrb[7].mxu1 }
 0x105   :  { %v428_v24 = vpop.f32.mrb[8].mxu0  ;;  %v510_v26 = vpop.f32.mrb[8].mxu1 }
 0x106   :  { %v434_v25 = vadd.f32 %v428_v24, %v342_v20  ;;  %v1936_v27 = vpop.f32.mrb[9].mxu0  ;;  %v1948_v28 = vpop.f32.mrb[9].mxu1 }
 0x107   :  { %v431_v29 = vpop.f32.mrb[10].mxu0  ;;  %v513_v31 = vpop.f32.mrb[10].mxu1 }
 0x108   :  { %v516_v30 = vadd.f32 %v510_v26, %v434_v25  ;;  %v1937_v32 = vpop.f32.mrb[11].mxu0  ;;  %v1949_v33 = vpop.f32.mrb[11].mxu1 }
 0x115   :  { %v588_v34 = vpop.f32.mrb[12].mxu0  ;;  %v676_v36 = vpop.f32.mrb[12].mxu1 }
 0x116   :  { %v594_v35 = vadd.f32 %v588_v34, %v516_v30  ;;  %v1960_v37 = vpop.f32.mrb[13].mxu0  ;;  %v1972_v38 = vpop.f32.mrb[13].mxu1 }
 0x117   :  { %v591_v39 = vpop.f32.mrb[14].mxu0  ;;  %v679_v41 = vpop.f32.mrb[14].mxu1 }
 0x118   :  { %v682_v40 = vadd.f32 %v676_v36, %v594_v35  ;;  %v1961_v42 = vpop.f32.mrb[15].mxu0  ;;  %v1973_v43 = vpop.f32.mrb[15].mxu1 }
 0x125   :  { %v758_v44 = vpop.f32.mrb[16].mxu0  ;;  %v871_v47 = vpop.f32.mrb[16].mxu1 }
 0x126   :  { %v764_v46 = vadd.f32 %v758_v44, %v682_v40  ;;  %v1984_v48 = vpop.f32.mrb[17].mxu0  ;;  %v1996_v49 = vpop.f32.mrb[17].mxu1 }
 0x127   :  { %v761_v50 = vpop.f32.mrb[18].mxu0  ;;  %v874_v52 = vpop.f32.mrb[18].mxu1 }
 0x128   :  { %v772_v51 = vadd.f32 %v1657_v45, %v764_v46  ;;  %v1985_v53 = vpop.f32.mrb[19].mxu0  ;;  %v1997_v54 = vpop.f32.mrb[19].mxu1 }
 0x12a   :  { %v773_v55 = vmax.f32 %v772_v51, 0.0 }
 0x12c   :  { %v774_v56 = vpack.c.bf16 %v773_v55, %v773_v55 }
 0x12e   :  { %776 = vst.msk [vmem:[%s2633_s3] sm:$0x3] %vm775_vm4, %v774_v56 }
 0x135   :  { %v938_v57 = vpop.f32.mrb[20].mxu0  ;;  %v1018_v59 = vpop.f32.mrb[20].mxu1 }
 0x136   :  { %v939_v58 = vadd.f32 %v938_v57, %v871_v47  ;;  %v2008_v60 = vpop.f32.mrb[21].mxu0  ;;  %v2020_v61 = vpop.f32.mrb[21].mxu1 }
 0x137   :  { %v941_v62 = vpop.f32.mrb[22].mxu0  ;;  %v1021_v1 = vpop.f32.mrb[22].mxu1 }
 0x138   :  { %v1024_v63 = vadd.f32 %v1018_v59, %v939_v58  ;;  %v2009_v2 = vpop.f32.mrb[23].mxu0  ;;  %v2021_v3 = vpop.f32.mrb[23].mxu1 }
 0x145   :  { %v1099_v4 = vpop.f32.mrb[24].mxu0  ;;  %v1190_v0 = vpop.f32.mrb[24].mxu1 }
 0x146   :  { %v1105_v5 = vadd.f32 %v1099_v4, %v1024_v63  ;;  %v2032_v6 = vpop.f32.mrb[25].mxu0  ;;  %v2044_v7 = vpop.f32.mrb[25].mxu1 }
 0x147   :  { %v1102_v8 = vpop.f32.mrb[26].mxu0  ;;  %v1193_v10 = vpop.f32.mrb[26].mxu1 }
 0x148   :  { %v1196_v9 = vadd.f32 %v1190_v0, %v1105_v5  ;;  %v2033_v11 = vpop.f32.mrb[27].mxu0  ;;  %v2045_v12 = vpop.f32.mrb[27].mxu1 }
 0x155   :  { %v1271_v13 = vpop.f32.mrb[28].mxu0  ;;  %v1348_v15 = vpop.f32.mrb[28].mxu1 }
 0x156   :  { %v1277_v14 = vadd.f32 %v1271_v13, %v1196_v9  ;;  %v2056_v16 = vpop.f32.mrb[29].mxu0  ;;  %v2068_v17 = vpop.f32.mrb[29].mxu1 }
 0x157   :  { %v1274_v18 = vpop.f32.mrb[30].mxu0  ;;  %v1351_v20 = vpop.f32.mrb[30].mxu1 }
 0x158   :  { %v1354_v19 = vadd.f32 %v1348_v15, %v1277_v14  ;;  %v2057_v21 = vpop.f32.mrb[31].mxu0  ;;  %v2069_v22 = vpop.f32.mrb[31].mxu1 }
 0x165   :  { %v1435_v23 = vpop.f32.mrb[32].mxu0  ;;  %v1516_v25 = vpop.f32.mrb[32].mxu1 }
 0x166   :  { %v1441_v24 = vadd.f32 %v1435_v23, %v1354_v19  ;;  %v2080_v26 = vpop.f32.mrb[33].mxu0  ;;  %v2092_v27 = vpop.f32.mrb[33].mxu1 }
 0x167   :  { %v1438_v28 = vpop.f32.mrb[34].mxu0  ;;  %v1519_v30 = vpop.f32.mrb[34].mxu1 }
 0x168   :  { %v1522_v29 = vadd.f32 %v1516_v25, %v1441_v24  ;;  %v2081_v31 = vpop.f32.mrb[35].mxu0  ;;  %v2093_v32 = vpop.f32.mrb[35].mxu1 }
 0x16a   :  { %v1530_v33 = vadd.f32 %v1657_v45, %v1522_v29 }
 0x16c   :  { %v1531_v34 = vmax.f32 %v1530_v33, 0.0 }
 0x16e   :  { %v1532_v35 = vpack.c.bf16 %v1531_v34, %v1531_v34 }
 0x170   :  { %1785 = vst.msk [vmem:[%s2633_s3 + $0x8] sm:$0x3] %vm775_vm4, %v1532_v35 }

</bundles_post_ra>
